<compile_context>
chip_gen: v7x
topology: tpu7x:2x2x1
jax: 0.10.0
libtpu: 0.0.40
codegen_flags: <defaults>
</compile_context>

<pallas_src>
import functools

import jax
import jax.numpy as jnp
from jax.experimental import pallas as pl
from jax.experimental.pallas import tpu as pltpu


# ----------------------------------------------------------------------------
# Lane-aligned "ext" layout helpers (plain JAX glue)
#   NCHW (B,C,H,W) -> (B,C,NRE): zero-pad ring, flatten Hp*Wp into lanes, place the
#   interior at a 128-aligned offset START with zero guard zones so every 3x3 tap is an
#   in-bounds lane slice; outputs are emitted as lane-dense (B,C,NP) slabs (NP % 128 == 0).
# ----------------------------------------------------------------------------

def _round_up(x, m):
    return (x + m - 1) // m * m


def _geom(H, W):
    Hp, Wp = H + 2, W + 2
    HpWp = Hp * Wp
    NP = _round_up(HpWp, 128)              # lane-dense interior width
    START = _round_up(Wp + 1, 128)         # 128-aligned interior offset
    NRE = _round_up(START + NP + Wp + 1, 128)
    return Hp, Wp, HpWp, NP, START, NRE


def to_ext(z, H, W):
    B, C = z.shape[0], z.shape[1]
    Hp, Wp, HpWp, NP, START, NRE = _geom(H, W)
    zp = jnp.pad(z, ((0, 0), (0, 0), (1, 1), (1, 1)))
    flat = zp.reshape(B, C, HpWp)
    return jnp.pad(flat, ((0, 0), (0, 0), (START, NRE - START - HpWp)))


def from_padded(y, H, W):
    """(B, C, NP) padded-flat interior -> NCHW crop."""
    B, C = y.shape[0], y.shape[1]
    Hp, Wp, HpWp, _, _, _ = _geom(H, W)
    z = y[:, :, :HpWp].reshape(B, C, Hp, Wp)
    return z[:, :, 1:H + 1, 1:W + 1]


def make_mask(H, W):
    """(1, NP) f32 mask: 1 at interior pixels, 0 on the padding ring / alignment tail."""
    Hp, Wp, HpWp, NP, _, _ = _geom(H, W)
    p = jnp.arange(NP, dtype=jnp.int32)
    r = p // Wp
    c = p % Wp
    valid = (p < HpWp) & (r >= 1) & (r <= H) & (c >= 1) & (c <= W)
    return valid.astype(jnp.float32).reshape(1, NP)


def flatten_w(w):
    """(3,3,Cin,Cout) -> (Cout, Kp) bf16, K = 9*Cin zero-padded up to a multiple of 16."""
    _, _, cin, cout = w.shape
    k = 9 * cin
    kp = _round_up(k, 16)
    wf = jnp.transpose(w.reshape(k, cout))            # row order k*Cin + i, k = dy*3+dx
    wf = jnp.pad(wf, ((0, 0), (0, kp - k)))
    return wf.astype(jnp.bfloat16)


# ----------------------------------------------------------------------------
# Fused Pallas kernel (one batch element per grid step)
# ----------------------------------------------------------------------------

def _docdiff_kernel(ab_ref, cond_ref, x_ref, nz_ref, tm_ref, td_ref,
                    mw1_ref, mb1_ref, mw2_ref, mb2_ref, mw34_ref, mb34_ref,
                    dw1_ref, db1_ref, dw2_ref, db2_ref, dw3_ref, db3_ref,
                    mask_ref,
                    head_ref, xdd_ref, noisy_ref,
                    h_scr, nx_scr,
                    *, start, wp, npad):
    bi = pl.program_id(0)
    mask = mask_ref[...]                                        # (1, NP) f32

    def conv3x3(xv, w_ref_, b_ref_, temb=None, relu=False):
        """3x3 same-conv as a single stacked bf16 matmul: (Cout,Kp) @ (Kp,NP), K=9*Cin."""
        cin = xv.shape[0]
        kp = w_ref_.shape[1]
        parts = []
        for dy in range(3):
            for dx in range(3):
                s = start - (wp + 1) + dy * wp + dx             # static lane shift
                parts.append(xv[:, s:s + npad])
        if kp > 9 * cin:
            parts.append(jnp.zeros((kp - 9 * cin, npad), xv.dtype))
        stacked = jnp.concatenate(parts, axis=0).astype(jnp.bfloat16)   # (Kp, NP)
        y = jnp.dot(w_ref_[...], stacked, preferred_element_type=jnp.float32)
        y = y + b_ref_[...]
        if temb is not None:
            y = y + temb
        if relu:
            y = jnp.maximum(y, 0.0)
        return y * mask                                          # re-zero the padding ring

    # Zero the ext-layout scratch: guard zones must stay zero for the shifted taps;
    # interior slabs get overwritten (128-aligned, full-width, unmasked stores) per layer.
    h_scr[...] = jnp.zeros_like(h_scr)
    nx_scr[...] = jnp.zeros_like(nx_scr)

    temb_m = tm_ref[0]                                           # (C, 1) f32
    temb_d = td_ref[0]
    cond_v = cond_ref[0]                                         # (1, NRE) f32, zero ring
    cond_int = cond_v[:, start:start + npad]                     # (1, NP)

    # ---------------- init_predictor (MIMOUNet stand-in) ----------------
    h = conv3x3(cond_v, mw1_ref, mb1_ref, temb=temb_m, relu=True)          # (C, NP) f32
    h_scr[:, start:start + npad] = h.astype(h_scr.dtype)
    h = h + conv3x3(h_scr[...], mw2_ref, mb2_ref, temb=temb_m, relu=True)  # residual add
    h_scr[:, start:start + npad] = h.astype(h_scr.dtype)
    head = conv3x3(h_scr[...], mw34_ref, mb34_ref, relu=False)             # (2, NP)
    out_mid = head[0:1]
    x_hat = head[1:2] + cond_int            # `+ condition` residual on channel 1 only
    head_ref[0] = jnp.concatenate([out_mid, x_hat], axis=0)

    # -------- diffusion forward-noising + denoiser (DenoiserUNet stand-in) --------
    a = ab_ref[bi, 0]                                            # sqrt(abar_t)
    b = ab_ref[bi, 1]                                            # sqrt(1 - abar_t)
    x_int = x_ref[0][:, start:start + npad]
    nz_int = nz_ref[0][:, start:start + npad]
    noisy = a * (x_int - x_hat) + b * nz_int                     # (1, NP), zero ring
    noisy_ref[0] = noisy

    nx = jnp.concatenate([noisy, x_hat], axis=0)                 # (2, NP) cat channels
    nx_scr[:, start:start + npad] = nx.astype(nx_scr.dtype)
    g = conv3x3(nx_scr[...], dw1_ref, db1_ref, temb=temb_d, relu=True)      # (C, NP)
    h_scr[:, start:start + npad] = g.astype(h_scr.dtype)         # reuse MIMO scratch
    g = g + conv3x3(h_scr[...], dw2_ref, db2_ref, temb=temb_d, relu=True)
    h_scr[:, start:start + npad] = g.astype(h_scr.dtype)
    xdd_ref[0] = conv3x3(h_scr[...], dw3_ref, db3_ref, relu=False)          # (1, NP)


# ----------------------------------------------------------------------------
# Model glue (plain JAX)
# ----------------------------------------------------------------------------

def sinusoidal_embedding(t, dim):
    half = dim // 2
    freqs = jnp.exp(-jnp.log(10000.0) * jnp.arange(half, dtype=jnp.float32) / (half - 1))
    args = t.astype(jnp.float32)[:, None] * freqs[None, :]
    return jnp.concatenate([jnp.sin(args), jnp.cos(args)], axis=-1)   # (B, dim)


def init_params(key, C=32):
    ks = jax.random.split(key, 16)
    w = lambda k, shape, s=0.05: jax.random.normal(k, shape, jnp.float32) * s
    z = lambda shape: jnp.zeros(shape, jnp.float32)
    return {
        "mimo": {   # init_predictor (MIMOUNet, simplified stand-in)
            "wt": w(ks[0], (C, C)), "bt": z((C,)),
            "w1": w(ks[1], (3, 3, 1, C)), "b1": z((C,)),
            "w2": w(ks[2], (3, 3, C, C)), "b2": z((C,)),
            "w3": w(ks[3], (3, 3, C, 1)), "b3": z((1,)),
            "w4": w(ks[4], (3, 3, C, 1)), "b4": z((1,)),
        },
        "den": {    # denoiser (DenoiserUNet, simplified stand-in; in=2 ch, out=1 ch)
            "wt": w(ks[5], (C, C)), "bt": z((C,)),
            "w1": w(ks[6], (3, 3, 2, C)), "b1": z((C,)),
            "w2": w(ks[7], (3, 3, C, C)), "b2": z((C,)),
            "w3": w(ks[8], (3, 3, C, 1)), "b3": z((1,)),
        },
    }


def docdiff_forward(params, x_nchw, cond_nchw, t, noise_key, *, T=100, C=32):
    B, _, H, W = x_nchw.shape
    Hp, Wp, HpWp, NP, START, NRE = _geom(H, W)
    mask = make_mask(H, W)

    x_ext = to_ext(x_nchw.astype(jnp.float32), H, W)
    cond_ext = to_ext(cond_nchw.astype(jnp.float32), H, W)
    noise_nchw = jax.random.normal(noise_key, x_nchw.shape, jnp.float32)
    noise_ext = to_ext(noise_nchw, H, W)

    # Tiny time-MLPs stay in XLA (a Pallas call here would be pure launch overhead).
    temb_base = sinusoidal_embedding(t, C)
    m, d = params["mimo"], params["den"]
    temb_mimo = jax.nn.silu(temb_base @ m["wt"] + m["bt"]).reshape(B, C, 1)
    temb_den = jax.nn.silu(temb_base @ d["wt"] + d["bt"]).reshape(B, C, 1)

    # DDPM schedule scalars per batch element, read from SMEM inside the kernel.
    betas = jnp.linspace(1e-4, 0.02, T, dtype=jnp.float32)
    alphas_bar = jnp.cumprod(1.0 - betas)
    ab = jnp.stack([jnp.sqrt(alphas_bar)[t], jnp.sqrt(1.0 - alphas_bar)[t]], axis=-1)

    # Fused 2-channel MIMO head: ch0 = conv(h,w3)+b3 ; ch1 = conv(h,w4)+b4 (+ cond in-kernel)
    w34 = jnp.concatenate([m["w3"], m["w4"]], axis=-1)            # (3,3,C,2)
    b34 = jnp.concatenate([m["b3"], m["b4"]], axis=-1)            # (2,)

    weights = [
        flatten_w(m["w1"]), m["b1"].reshape(C, 1),
        flatten_w(m["w2"]), m["b2"].reshape(C, 1),
        flatten_w(w34), b34.reshape(2, 1),
        flatten_w(d["w1"]), d["b1"].reshape(C, 1),
        flatten_w(d["w2"]), d["b2"].reshape(C, 1),
        flatten_w(d["w3"]), d["b3"].reshape(1, 1),
    ]

    def rep(shape):
        return pl.BlockSpec(shape, lambda bi: (0,) * len(shape))

    def per_batch(shape):
        return pl.BlockSpec(shape, lambda bi: (bi,) + (0,) * (len(shape) - 1))

    kernel = functools.partial(_docdiff_kernel, start=START, wp=Wp, npad=NP)
    head, xdd, noisy = pl.pallas_call(
        kernel,
        out_shape=(jax.ShapeDtypeStruct((B, 2, NP), jnp.float32),
                   jax.ShapeDtypeStruct((B, 1, NP), jnp.float32),
                   jax.ShapeDtypeStruct((B, 1, NP), jnp.float32)),
        grid=(B,),
        in_specs=[
            pl.BlockSpec(memory_space=pltpu.MemorySpace.SMEM),    # ab (B,2) scalars
            per_batch((1, 1, NRE)),                               # condition (ext)
            per_batch((1, 1, NRE)),                               # clean image x (ext)
            per_batch((1, 1, NRE)),                               # gaussian noise (ext)
            per_batch((1, C, 1)),                                 # temb MIMO
            per_batch((1, C, 1)),                                 # temb denoiser
            *[rep(w.shape) for w in weights],                     # flattened weights/biases
            rep((1, NP)),                                         # interior mask
        ],
        out_specs=(per_batch((1, 2, NP)),
                   per_batch((1, 1, NP)),
                   per_batch((1, 1, NP))),
        scratch_shapes=[pltpu.VMEM((C, NRE), jnp.bfloat16),       # h / g ext scratch
                        pltpu.VMEM((2, NRE), jnp.bfloat16)],      # [noisy, x_hat] ext scratch
        compiler_params=pltpu.CompilerParams(
            dimension_semantics=("parallel",),
            vmem_limit_bytes=48 * 1024 * 1024),
    )(ab, cond_ext, x_ext, noise_ext, temb_mimo, temb_den, *weights, mask)

    head_nchw = from_padded(head, H, W)                           # (B, 2, H, W)
    out_mid = head_nchw[:, 0:1]
    x_hat = head_nchw[:, 1:2]
    x_dd = from_padded(xdd, H, W)
    noisy_image = from_padded(noisy, H, W)
    return x_hat, x_dd, noisy_image, noise_nchw, [out_mid, x_hat]


# ----------------------------------------------------------------------------

if __name__ == "__main__":
    key = jax.random.PRNGKey(0)
    kp, kx, kc, kt, kn = jax.random.split(key, 5)
    B, H, W, C, T = 2, 16, 16, 32, 100

    params = init_params(kp, C=C)
    x = jax.random.normal(kx, (B, 1, H, W), jnp.float32)          # clean image, NCHW
    condition = jax.random.normal(kc, (B, 1, H, W), jnp.float32)  # degraded image, NCHW
    t = jax.random.randint(kt, (B,), 0, T)

    fwd = jax.jit(functools.partial(docdiff_forward, T=T, C=C))
    outs = fwd(params, x, condition, t, kn)
    jax.block_until_ready(outs)

    x_, x__, noisy_image, noise_ref, x_list = outs
    assert x_.shape == (B, 1, H, W) and x__.shape == (B, 1, H, W)
    assert noisy_image.shape == (B, 1, H, W) and noise_ref.shape == (B, 1, H, W)
    assert len(x_list) == 2 and x_list[0].shape == (B, 1, H, W)
    assert bool(jnp.isfinite(x_).all()) and bool(jnp.isfinite(x__).all())
    assert bool(jnp.isfinite(noisy_image).all())
    print("KERNEL_OK")
</pallas_src>

<mosaic_0001>
module attributes {stable_mosaic.version = 11 : i64} {
  func.func @_docdiff_kernel(%arg0: i32, %arg1: memref<2x2xf32, #tpu.memory_space<smem>>, %arg2: memref<1x1x640xf32, #tpu.memory_space<vmem>>, %arg3: memref<1x1x640xf32, #tpu.memory_space<vmem>>, %arg4: memref<1x1x640xf32, #tpu.memory_space<vmem>>, %arg5: memref<1x32x1xf32, #tpu.memory_space<vmem>>, %arg6: memref<1x32x1xf32, #tpu.memory_space<vmem>>, %arg7: memref<32x16xbf16, #tpu.memory_space<vmem>>, %arg8: memref<32x1xf32, #tpu.memory_space<vmem>>, %arg9: memref<32x288xbf16, #tpu.memory_space<vmem>>, %arg10: memref<32x1xf32, #tpu.memory_space<vmem>>, %arg11: memref<2x288xbf16, #tpu.memory_space<vmem>>, %arg12: memref<2x1xf32, #tpu.memory_space<vmem>>, %arg13: memref<32x32xbf16, #tpu.memory_space<vmem>>, %arg14: memref<32x1xf32, #tpu.memory_space<vmem>>, %arg15: memref<32x288xbf16, #tpu.memory_space<vmem>>, %arg16: memref<32x1xf32, #tpu.memory_space<vmem>>, %arg17: memref<1x288xbf16, #tpu.memory_space<vmem>>, %arg18: memref<1x1xf32, #tpu.memory_space<vmem>>, %arg19: memref<1x384xf32, #tpu.memory_space<vmem>>, %arg20: memref<1x2x384xf32, #tpu.memory_space<vmem>>, %arg21: memref<1x1x384xf32, #tpu.memory_space<vmem>>, %arg22: memref<1x1x384xf32, #tpu.memory_space<vmem>>, %arg23: memref<32x640xbf16, #tpu.memory_space<vmem>>, %arg24: memref<2x640xbf16, #tpu.memory_space<vmem>>) attributes {dimension_semantics = [#tpu.dimension_semantics<parallel>], iteration_bounds = array<i64: 2>, scalar_prefetch = 0 : i64, scratch_operands = 2 : i64, tpu.core_type = #tpu.core_type<tc>, window_params = [{transform_indices = @transform_0, window_bounds = array<i64: 2, 2>}, {transform_indices = @transform_1, window_bounds = array<i64: 1, 1, 640>}, {transform_indices = @transform_2, window_bounds = array<i64: 1, 1, 640>}, {transform_indices = @transform_3, window_bounds = array<i64: 1, 1, 640>}, {transform_indices = @transform_4, window_bounds = array<i64: 1, 32, 1>}, {transform_indices = @transform_5, window_bounds = array<i64: 1, 32, 1>}, {pipeline_mode = #tpu.pipeline_mode<synchronous>, transform_indices = @transform_6, window_bounds = array<i64: 32, 16>}, {pipeline_mode = #tpu.pipeline_mode<synchronous>, transform_indices = @transform_7, window_bounds = array<i64: 32, 1>}, {pipeline_mode = #tpu.pipeline_mode<synchronous>, transform_indices = @transform_8, window_bounds = array<i64: 32, 288>}, {pipeline_mode = #tpu.pipeline_mode<synchronous>, transform_indices = @transform_9, window_bounds = array<i64: 32, 1>}, {pipeline_mode = #tpu.pipeline_mode<synchronous>, transform_indices = @transform_10, window_bounds = array<i64: 2, 288>}, {pipeline_mode = #tpu.pipeline_mode<synchronous>, transform_indices = @transform_11, window_bounds = array<i64: 2, 1>}, {pipeline_mode = #tpu.pipeline_mode<synchronous>, transform_indices = @transform_12, window_bounds = array<i64: 32, 32>}, {pipeline_mode = #tpu.pipeline_mode<synchronous>, transform_indices = @transform_13, window_bounds = array<i64: 32, 1>}, {pipeline_mode = #tpu.pipeline_mode<synchronous>, transform_indices = @transform_14, window_bounds = array<i64: 32, 288>}, {pipeline_mode = #tpu.pipeline_mode<synchronous>, transform_indices = @transform_15, window_bounds = array<i64: 32, 1>}, {pipeline_mode = #tpu.pipeline_mode<synchronous>, transform_indices = @transform_16, window_bounds = array<i64: 1, 288>}, {pipeline_mode = #tpu.pipeline_mode<synchronous>, transform_indices = @transform_17, window_bounds = array<i64: 1, 1>}, {pipeline_mode = #tpu.pipeline_mode<synchronous>, transform_indices = @transform_18, window_bounds = array<i64: 1, 384>}, {transform_indices = @transform_19, window_bounds = array<i64: 1, 2, 384>}, {transform_indices = @transform_20, window_bounds = array<i64: 1, 1, 384>}, {transform_indices = @transform_21, window_bounds = array<i64: 1, 1, 384>}]} {
    %c0 = arith.constant 0 : index
    %c0_0 = arith.constant 0 : index
    %0 = vector.load %arg19[%c0, %c0_0] : memref<1x384xf32, #tpu.memory_space<vmem>>, vector<1x384xf32>
    %cst = arith.constant 0.000000e+00 : bf16
    %1 = vector.broadcast %cst : bf16 to vector<32x640xbf16>
    %c0_1 = arith.constant 0 : index
    %c0_2 = arith.constant 0 : index
    %2 = vector.load %arg23[%c0_1, %c0_2] : memref<32x640xbf16, #tpu.memory_space<vmem>>, vector<32x640xbf16>
    tpu.vector_store %arg23[%c0_1, %c0_2], %1 {strides = array<i32>} : memref<32x640xbf16, #tpu.memory_space<vmem>>, vector<32x640xbf16>,
    %cst_3 = arith.constant 0.000000e+00 : bf16
    %3 = vector.broadcast %cst_3 : bf16 to vector<2x640xbf16>
    %c0_4 = arith.constant 0 : index
    %c0_5 = arith.constant 0 : index
    %4 = vector.load %arg24[%c0_4, %c0_5] : memref<2x640xbf16, #tpu.memory_space<vmem>>, vector<2x640xbf16>
    tpu.vector_store %arg24[%c0_4, %c0_5], %3 {strides = array<i32>} : memref<2x640xbf16, #tpu.memory_space<vmem>>, vector<2x640xbf16>,
    %c0_6 = arith.constant 0 : index
    %c0_7 = arith.constant 0 : index
    %c0_8 = arith.constant 0 : index
    %5 = vector.load %arg5[%c0_6, %c0_7, %c0_8] : memref<1x32x1xf32, #tpu.memory_space<vmem>>, vector<1x32x1xf32>
    %6 = vector.shape_cast %5 : vector<1x32x1xf32> to vector<32x1xf32>
    %c0_9 = arith.constant 0 : index
    %c0_10 = arith.constant 0 : index
    %c0_11 = arith.constant 0 : index
    %7 = vector.load %arg6[%c0_9, %c0_10, %c0_11] : memref<1x32x1xf32, #tpu.memory_space<vmem>>, vector<1x32x1xf32>
    %8 = vector.shape_cast %7 : vector<1x32x1xf32> to vector<32x1xf32>
    %c0_12 = arith.constant 0 : index
    %c0_13 = arith.constant 0 : index
    %c0_14 = arith.constant 0 : index
    %9 = vector.load %arg2[%c0_12, %c0_13, %c0_14] : memref<1x1x640xf32, #tpu.memory_space<vmem>>, vector<1x1x640xf32>
    %10 = vector.shape_cast %9 : vector<1x1x640xf32> to vector<1x640xf32>
    %11 = vector.extract_strided_slice %10 {offsets = [0, 128], sizes = [1, 384], strides = [1, 1]} : vector<1x640xf32> to vector<1x384xf32>
    %12 = vector.extract_strided_slice %10 {offsets = [0, 109], sizes = [1, 384], strides = [1, 1]} : vector<1x640xf32> to vector<1x384xf32>
    %13 = vector.extract_strided_slice %10 {offsets = [0, 110], sizes = [1, 384], strides = [1, 1]} : vector<1x640xf32> to vector<1x384xf32>
    %14 = vector.extract_strided_slice %10 {offsets = [0, 111], sizes = [1, 384], strides = [1, 1]} : vector<1x640xf32> to vector<1x384xf32>
    %15 = vector.extract_strided_slice %10 {offsets = [0, 127], sizes = [1, 384], strides = [1, 1]} : vector<1x640xf32> to vector<1x384xf32>
    %16 = vector.extract_strided_slice %10 {offsets = [0, 128], sizes = [1, 384], strides = [1, 1]} : vector<1x640xf32> to vector<1x384xf32>
    %17 = vector.extract_strided_slice %10 {offsets = [0, 129], sizes = [1, 384], strides = [1, 1]} : vector<1x640xf32> to vector<1x384xf32>
    %18 = vector.extract_strided_slice %10 {offsets = [0, 145], sizes = [1, 384], strides = [1, 1]} : vector<1x640xf32> to vector<1x384xf32>
    %19 = vector.extract_strided_slice %10 {offsets = [0, 146], sizes = [1, 384], strides = [1, 1]} : vector<1x640xf32> to vector<1x384xf32>
    %20 = vector.extract_strided_slice %10 {offsets = [0, 147], sizes = [1, 384], strides = [1, 1]} : vector<1x640xf32> to vector<1x384xf32>
    %cst_15 = arith.constant 0.000000e+00 : f32
    %21 = vector.broadcast %cst_15 : f32 to vector<7x384xf32>
    %22 = tpu.concatenate %12, %13, %14, %15, %16, %17, %18, %19, %20, %21 in 0 : vector<1x384xf32>, vector<1x384xf32>, vector<1x384xf32>, vector<1x384xf32>, vector<1x384xf32>, vector<1x384xf32>, vector<1x384xf32>, vector<1x384xf32>, vector<1x384xf32>, vector<7x384xf32> -> vector<16x384xf32>
    %23 = arith.truncf %22 : vector<16x384xf32> to vector<16x384xbf16>
    %c0_16 = arith.constant 0 : index
    %c0_17 = arith.constant 0 : index
    %24 = vector.load %arg7[%c0_16, %c0_17] : memref<32x16xbf16, #tpu.memory_space<vmem>>, vector<32x16xbf16>
    %cst_18 = arith.constant dense<0.000000e+00> : vector<32x384xf32>
    %25 = tpu.matmul %24, %23, %cst_18 {dimension_numbers = #tpu.dot_dimension_numbers<[1], [0], [0], [1], [0, 0, 1, 1], [], []>} : vector<32x16xbf16>, vector<16x384xbf16>, vector<32x384xf32> -> vector<32x384xf32>
    %c0_19 = arith.constant 0 : index
    %c0_20 = arith.constant 0 : index
    %26 = vector.load %arg8[%c0_19, %c0_20] : memref<32x1xf32, #tpu.memory_space<vmem>>, vector<32x1xf32>
    %27 = vector.broadcast %26 : vector<32x1xf32> to vector<32x384xf32>
    %28 = arith.addf %25, %27 : vector<32x384xf32>
    %29 = vector.broadcast %6 : vector<32x1xf32> to vector<32x384xf32>
    %30 = arith.addf %28, %29 : vector<32x384xf32>
    %cst_21 = arith.constant 0.000000e+00 : f32
    %31 = vector.broadcast %cst_21 : f32 to vector<32x384xf32>
    %32 = arith.maximumf %30, %31 : vector<32x384xf32>
    %33 = vector.broadcast %0 : vector<1x384xf32> to vector<32x384xf32>
    %34 = arith.mulf %32, %33 : vector<32x384xf32>
    %35 = arith.truncf %34 : vector<32x384xf32> to vector<32x384xbf16>
    %c0_22 = arith.constant 0 : index
    %c128 = arith.constant 128 : index
    %36 = vector.load %arg23[%c0_22, %c128] : memref<32x640xbf16, #tpu.memory_space<vmem>>, vector<32x384xbf16>
    tpu.vector_store %arg23[%c0_22, %c128], %35 {strides = array<i32>} : memref<32x640xbf16, #tpu.memory_space<vmem>>, vector<32x384xbf16>,
    %c0_23 = arith.constant 0 : index
    %c0_24 = arith.constant 0 : index
    %37 = vector.load %arg23[%c0_23, %c0_24] : memref<32x640xbf16, #tpu.memory_space<vmem>>, vector<32x640xbf16>
    %38 = vector.extract_strided_slice %37 {offsets = [0, 109], sizes = [32, 384], strides = [1, 1]} : vector<32x640xbf16> to vector<32x384xbf16>
    %39 = vector.extract_strided_slice %37 {offsets = [0, 110], sizes = [32, 384], strides = [1, 1]} : vector<32x640xbf16> to vector<32x384xbf16>
    %40 = vector.extract_strided_slice %37 {offsets = [0, 111], sizes = [32, 384], strides = [1, 1]} : vector<32x640xbf16> to vector<32x384xbf16>
    %41 = vector.extract_strided_slice %37 {offsets = [0, 127], sizes = [32, 384], strides = [1, 1]} : vector<32x640xbf16> to vector<32x384xbf16>
    %42 = vector.extract_strided_slice %37 {offsets = [0, 128], sizes = [32, 384], strides = [1, 1]} : vector<32x640xbf16> to vector<32x384xbf16>
    %43 = vector.extract_strided_slice %37 {offsets = [0, 129], sizes = [32, 384], strides = [1, 1]} : vector<32x640xbf16> to vector<32x384xbf16>
    %44 = vector.extract_strided_slice %37 {offsets = [0, 145], sizes = [32, 384], strides = [1, 1]} : vector<32x640xbf16> to vector<32x384xbf16>
    %45 = vector.extract_strided_slice %37 {offsets = [0, 146], sizes = [32, 384], strides = [1, 1]} : vector<32x640xbf16> to vector<32x384xbf16>
    %46 = vector.extract_strided_slice %37 {offsets = [0, 147], sizes = [32, 384], strides = [1, 1]} : vector<32x640xbf16> to vector<32x384xbf16>
    %47 = tpu.concatenate %38, %39, %40, %41, %42, %43, %44, %45, %46 in 0 : vector<32x384xbf16>, vector<32x384xbf16>, vector<32x384xbf16>, vector<32x384xbf16>, vector<32x384xbf16>, vector<32x384xbf16>, vector<32x384xbf16>, vector<32x384xbf16>, vector<32x384xbf16> -> vector<288x384xbf16>
    %c0_25 = arith.constant 0 : index
    %c0_26 = arith.constant 0 : index
    %48 = vector.load %arg9[%c0_25, %c0_26] : memref<32x288xbf16, #tpu.memory_space<vmem>>, vector<32x288xbf16>
    %cst_27 = arith.constant dense<0.000000e+00> : vector<32x384xf32>
    %49 = tpu.matmul %48, %47, %cst_27 {dimension_numbers = #tpu.dot_dimension_numbers<[1], [0], [0], [1], [0, 0, 1, 1], [], []>} : vector<32x288xbf16>, vector<288x384xbf16>, vector<32x384xf32> -> vector<32x384xf32>
    %c0_28 = arith.constant 0 : index
    %c0_29 = arith.constant 0 : index
    %50 = vector.load %arg10[%c0_28, %c0_29] : memref<32x1xf32, #tpu.memory_space<vmem>>, vector<32x1xf32>
    %51 = vector.broadcast %50 : vector<32x1xf32> to vector<32x384xf32>
    %52 = arith.addf %49, %51 : vector<32x384xf32>
    %53 = vector.broadcast %6 : vector<32x1xf32> to vector<32x384xf32>
    %54 = arith.addf %52, %53 : vector<32x384xf32>
    %cst_30 = arith.constant 0.000000e+00 : f32
    %55 = vector.broadcast %cst_30 : f32 to vector<32x384xf32>
    %56 = arith.maximumf %54, %55 : vector<32x384xf32>
    %57 = vector.broadcast %0 : vector<1x384xf32> to vector<32x384xf32>
    %58 = arith.mulf %56, %57 : vector<32x384xf32>
    %59 = arith.addf %34, %58 : vector<32x384xf32>
    %60 = arith.truncf %59 : vector<32x384xf32> to vector<32x384xbf16>
    %c0_31 = arith.constant 0 : index
    %c128_32 = arith.constant 128 : index
    %61 = vector.load %arg23[%c0_31, %c128_32] : memref<32x640xbf16, #tpu.memory_space<vmem>>, vector<32x384xbf16>
    tpu.vector_store %arg23[%c0_31, %c128_32], %60 {strides = array<i32>} : memref<32x640xbf16, #tpu.memory_space<vmem>>, vector<32x384xbf16>,
    %c0_33 = arith.constant 0 : index
    %c0_34 = arith.constant 0 : index
    %62 = vector.load %arg23[%c0_33, %c0_34] : memref<32x640xbf16, #tpu.memory_space<vmem>>, vector<32x640xbf16>
    %63 = vector.extract_strided_slice %62 {offsets = [0, 109], sizes = [32, 384], strides = [1, 1]} : vector<32x640xbf16> to vector<32x384xbf16>
    %64 = vector.extract_strided_slice %62 {offsets = [0, 110], sizes = [32, 384], strides = [1, 1]} : vector<32x640xbf16> to vector<32x384xbf16>
    %65 = vector.extract_strided_slice %62 {offsets = [0, 111], sizes = [32, 384], strides = [1, 1]} : vector<32x640xbf16> to vector<32x384xbf16>
    %66 = vector.extract_strided_slice %62 {offsets = [0, 127], sizes = [32, 384], strides = [1, 1]} : vector<32x640xbf16> to vector<32x384xbf16>
    %67 = vector.extract_strided_slice %62 {offsets = [0, 128], sizes = [32, 384], strides = [1, 1]} : vector<32x640xbf16> to vector<32x384xbf16>
    %68 = vector.extract_strided_slice %62 {offsets = [0, 129], sizes = [32, 384], strides = [1, 1]} : vector<32x640xbf16> to vector<32x384xbf16>
    %69 = vector.extract_strided_slice %62 {offsets = [0, 145], sizes = [32, 384], strides = [1, 1]} : vector<32x640xbf16> to vector<32x384xbf16>
    %70 = vector.extract_strided_slice %62 {offsets = [0, 146], sizes = [32, 384], strides = [1, 1]} : vector<32x640xbf16> to vector<32x384xbf16>
    %71 = vector.extract_strided_slice %62 {offsets = [0, 147], sizes = [32, 384], strides = [1, 1]} : vector<32x640xbf16> to vector<32x384xbf16>
    %72 = tpu.concatenate %63, %64, %65, %66, %67, %68, %69, %70, %71 in 0 : vector<32x384xbf16>, vector<32x384xbf16>, vector<32x384xbf16>, vector<32x384xbf16>, vector<32x384xbf16>, vector<32x384xbf16>, vector<32x384xbf16>, vector<32x384xbf16>, vector<32x384xbf16> -> vector<288x384xbf16>
    %c0_35 = arith.constant 0 : index
    %c0_36 = arith.constant 0 : index
    %73 = vector.load %arg11[%c0_35, %c0_36] : memref<2x288xbf16, #tpu.memory_space<vmem>>, vector<2x288xbf16>
    %cst_37 = arith.constant dense<0.000000e+00> : vector<2x384xf32>
    %74 = tpu.matmul %73, %72, %cst_37 {dimension_numbers = #tpu.dot_dimension_numbers<[1], [0], [0], [1], [0, 0, 1, 1], [], []>} : vector<2x288xbf16>, vector<288x384xbf16>, vector<2x384xf32> -> vector<2x384xf32>
    %c0_38 = arith.constant 0 : index
    %c0_39 = arith.constant 0 : index
    %75 = vector.load %arg12[%c0_38, %c0_39] : memref<2x1xf32, #tpu.memory_space<vmem>>, vector<2x1xf32>
    %76 = vector.broadcast %75 : vector<2x1xf32> to vector<2x384xf32>
    %77 = arith.addf %74, %76 : vector<2x384xf32>
    %78 = vector.broadcast %0 : vector<1x384xf32> to vector<2x384xf32>
    %79 = arith.mulf %77, %78 : vector<2x384xf32>
    %80 = vector.extract_strided_slice %79 {offsets = [0, 0], sizes = [1, 384], strides = [1, 1]} : vector<2x384xf32> to vector<1x384xf32>
    %81 = vector.extract_strided_slice %79 {offsets = [1, 0], sizes = [1, 384], strides = [1, 1]} : vector<2x384xf32> to vector<1x384xf32>
    %82 = arith.addf %81, %11 : vector<1x384xf32>
    %83 = tpu.concatenate %80, %82 in 0 : vector<1x384xf32>, vector<1x384xf32> -> vector<2x384xf32>
    %c0_40 = arith.constant 0 : index
    %c0_41 = arith.constant 0 : index
    %c0_42 = arith.constant 0 : index
    %84 = vector.load %arg20[%c0_40, %c0_41, %c0_42] : memref<1x2x384xf32, #tpu.memory_space<vmem>>, vector<1x2x384xf32>
    %85 = vector.shape_cast %84 : vector<1x2x384xf32> to vector<2x384xf32>
    %86 = vector.shape_cast %83 : vector<2x384xf32> to vector<1x2x384xf32>
    tpu.vector_store %arg20[%c0_40, %c0_41, %c0_42], %86 {strides = array<i32>} : memref<1x2x384xf32, #tpu.memory_space<vmem>>, vector<1x2x384xf32>,
    %87 = arith.index_cast %arg0 : i32 to index
    %c0_43 = arith.constant 0 : index
    %88 = memref.load %arg1[%87, %c0_43] : memref<2x2xf32, #tpu.memory_space<smem>>
    %89 = arith.index_cast %arg0 : i32 to index
    %c1 = arith.constant 1 : index
    %90 = memref.load %arg1[%89, %c1] : memref<2x2xf32, #tpu.memory_space<smem>>
    %c0_44 = arith.constant 0 : index
    %c0_45 = arith.constant 0 : index
    %c0_46 = arith.constant 0 : index
    %91 = vector.load %arg3[%c0_44, %c0_45, %c0_46] : memref<1x1x640xf32, #tpu.memory_space<vmem>>, vector<1x1x640xf32>
    %92 = vector.shape_cast %91 : vector<1x1x640xf32> to vector<1x640xf32>
    %93 = vector.extract_strided_slice %92 {offsets = [0, 128], sizes = [1, 384], strides = [1, 1]} : vector<1x640xf32> to vector<1x384xf32>
    %c0_47 = arith.constant 0 : index
    %c0_48 = arith.constant 0 : index
    %c0_49 = arith.constant 0 : index
    %94 = vector.load %arg4[%c0_47, %c0_48, %c0_49] : memref<1x1x640xf32, #tpu.memory_space<vmem>>, vector<1x1x640xf32>
    %95 = vector.shape_cast %94 : vector<1x1x640xf32> to vector<1x640xf32>
    %96 = vector.extract_strided_slice %95 {offsets = [0, 128], sizes = [1, 384], strides = [1, 1]} : vector<1x640xf32> to vector<1x384xf32>
    %97 = arith.subf %93, %82 : vector<1x384xf32>
    %98 = vector.broadcast %88 : f32 to vector<1x384xf32>
    %99 = arith.mulf %98, %97 : vector<1x384xf32>
    %100 = vector.broadcast %90 : f32 to vector<1x384xf32>
    %101 = arith.mulf %100, %96 : vector<1x384xf32>
    %102 = arith.addf %99, %101 : vector<1x384xf32>
    %c0_50 = arith.constant 0 : index
    %c0_51 = arith.constant 0 : index
    %c0_52 = arith.constant 0 : index
    %103 = vector.load %arg22[%c0_50, %c0_51, %c0_52] : memref<1x1x384xf32, #tpu.memory_space<vmem>>, vector<1x1x384xf32>
    %104 = vector.shape_cast %103 : vector<1x1x384xf32> to vector<1x384xf32>
    %105 = vector.shape_cast %102 : vector<1x384xf32> to vector<1x1x384xf32>
    tpu.vector_store %arg22[%c0_50, %c0_51, %c0_52], %105 {strides = array<i32>} : memref<1x1x384xf32, #tpu.memory_space<vmem>>, vector<1x1x384xf32>,
    %106 = tpu.concatenate %102, %82 in 0 : vector<1x384xf32>, vector<1x384xf32> -> vector<2x384xf32>
    %107 = arith.truncf %106 : vector<2x384xf32> to vector<2x384xbf16>
    %c0_53 = arith.constant 0 : index
    %c128_54 = arith.constant 128 : index
    %108 = vector.load %arg24[%c0_53, %c128_54] : memref<2x640xbf16, #tpu.memory_space<vmem>>, vector<2x384xbf16>
    tpu.vector_store %arg24[%c0_53, %c128_54], %107 {strides = array<i32>} : memref<2x640xbf16, #tpu.memory_space<vmem>>, vector<2x384xbf16>,
    %c0_55 = arith.constant 0 : index
    %c0_56 = arith.constant 0 : index
    %109 = vector.load %arg24[%c0_55, %c0_56] : memref<2x640xbf16, #tpu.memory_space<vmem>>, vector<2x640xbf16>
    %110 = vector.extract_strided_slice %109 {offsets = [0, 109], sizes = [2, 384], strides = [1, 1]} : vector<2x640xbf16> to vector<2x384xbf16>
    %111 = vector.extract_strided_slice %109 {offsets = [0, 110], sizes = [2, 384], strides = [1, 1]} : vector<2x640xbf16> to vector<2x384xbf16>
    %112 = vector.extract_strided_slice %109 {offsets = [0, 111], sizes = [2, 384], strides = [1, 1]} : vector<2x640xbf16> to vector<2x384xbf16>
    %113 = vector.extract_strided_slice %109 {offsets = [0, 127], sizes = [2, 384], strides = [1, 1]} : vector<2x640xbf16> to vector<2x384xbf16>
    %114 = vector.extract_strided_slice %109 {offsets = [0, 128], sizes = [2, 384], strides = [1, 1]} : vector<2x640xbf16> to vector<2x384xbf16>
    %115 = vector.extract_strided_slice %109 {offsets = [0, 129], sizes = [2, 384], strides = [1, 1]} : vector<2x640xbf16> to vector<2x384xbf16>
    %116 = vector.extract_strided_slice %109 {offsets = [0, 145], sizes = [2, 384], strides = [1, 1]} : vector<2x640xbf16> to vector<2x384xbf16>
    %117 = vector.extract_strided_slice %109 {offsets = [0, 146], sizes = [2, 384], strides = [1, 1]} : vector<2x640xbf16> to vector<2x384xbf16>
    %118 = vector.extract_strided_slice %109 {offsets = [0, 147], sizes = [2, 384], strides = [1, 1]} : vector<2x640xbf16> to vector<2x384xbf16>
    %cst_57 = arith.constant 0.000000e+00 : bf16
    %119 = vector.broadcast %cst_57 : bf16 to vector<14x384xbf16>
    %120 = tpu.concatenate %110, %111, %112, %113, %114, %115, %116, %117, %118, %119 in 0 : vector<2x384xbf16>, vector<2x384xbf16>, vector<2x384xbf16>, vector<2x384xbf16>, vector<2x384xbf16>, vector<2x384xbf16>, vector<2x384xbf16>, vector<2x384xbf16>, vector<2x384xbf16>, vector<14x384xbf16> -> vector<32x384xbf16>
    %c0_58 = arith.constant 0 : index
    %c0_59 = arith.constant 0 : index
    %121 = vector.load %arg13[%c0_58, %c0_59] : memref<32x32xbf16, #tpu.memory_space<vmem>>, vector<32x32xbf16>
    %cst_60 = arith.constant dense<0.000000e+00> : vector<32x384xf32>
    %122 = tpu.matmul %121, %120, %cst_60 {dimension_numbers = #tpu.dot_dimension_numbers<[1], [0], [0], [1], [0, 0, 1, 1], [], []>} : vector<32x32xbf16>, vector<32x384xbf16>, vector<32x384xf32> -> vector<32x384xf32>
    %c0_61 = arith.constant 0 : index
    %c0_62 = arith.constant 0 : index
    %123 = vector.load %arg14[%c0_61, %c0_62] : memref<32x1xf32, #tpu.memory_space<vmem>>, vector<32x1xf32>
    %124 = vector.broadcast %123 : vector<32x1xf32> to vector<32x384xf32>
    %125 = arith.addf %122, %124 : vector<32x384xf32>
    %126 = vector.broadcast %8 : vector<32x1xf32> to vector<32x384xf32>
    %127 = arith.addf %125, %126 : vector<32x384xf32>
    %cst_63 = arith.constant 0.000000e+00 : f32
    %128 = vector.broadcast %cst_63 : f32 to vector<32x384xf32>
    %129 = arith.maximumf %127, %128 : vector<32x384xf32>
    %130 = vector.broadcast %0 : vector<1x384xf32> to vector<32x384xf32>
    %131 = arith.mulf %129, %130 : vector<32x384xf32>
    %132 = arith.truncf %131 : vector<32x384xf32> to vector<32x384xbf16>
    %c0_64 = arith.constant 0 : index
    %c128_65 = arith.constant 128 : index
    %133 = vector.load %arg23[%c0_64, %c128_65] : memref<32x640xbf16, #tpu.memory_space<vmem>>, vector<32x384xbf16>
    tpu.vector_store %arg23[%c0_64, %c128_65], %132 {strides = array<i32>} : memref<32x640xbf16, #tpu.memory_space<vmem>>, vector<32x384xbf16>,
    %c0_66 = arith.constant 0 : index
    %c0_67 = arith.constant 0 : index
    %134 = vector.load %arg23[%c0_66, %c0_67] : memref<32x640xbf16, #tpu.memory_space<vmem>>, vector<32x640xbf16>
    %135 = vector.extract_strided_slice %134 {offsets = [0, 109], sizes = [32, 384], strides = [1, 1]} : vector<32x640xbf16> to vector<32x384xbf16>
    %136 = vector.extract_strided_slice %134 {offsets = [0, 110], sizes = [32, 384], strides = [1, 1]} : vector<32x640xbf16> to vector<32x384xbf16>
    %137 = vector.extract_strided_slice %134 {offsets = [0, 111], sizes = [32, 384], strides = [1, 1]} : vector<32x640xbf16> to vector<32x384xbf16>
    %138 = vector.extract_strided_slice %134 {offsets = [0, 127], sizes = [32, 384], strides = [1, 1]} : vector<32x640xbf16> to vector<32x384xbf16>
    %139 = vector.extract_strided_slice %134 {offsets = [0, 128], sizes = [32, 384], strides = [1, 1]} : vector<32x640xbf16> to vector<32x384xbf16>
    %140 = vector.extract_strided_slice %134 {offsets = [0, 129], sizes = [32, 384], strides = [1, 1]} : vector<32x640xbf16> to vector<32x384xbf16>
    %141 = vector.extract_strided_slice %134 {offsets = [0, 145], sizes = [32, 384], strides = [1, 1]} : vector<32x640xbf16> to vector<32x384xbf16>
    %142 = vector.extract_strided_slice %134 {offsets = [0, 146], sizes = [32, 384], strides = [1, 1]} : vector<32x640xbf16> to vector<32x384xbf16>
    %143 = vector.extract_strided_slice %134 {offsets = [0, 147], sizes = [32, 384], strides = [1, 1]} : vector<32x640xbf16> to vector<32x384xbf16>
    %144 = tpu.concatenate %135, %136, %137, %138, %139, %140, %141, %142, %143 in 0 : vector<32x384xbf16>, vector<32x384xbf16>, vector<32x384xbf16>, vector<32x384xbf16>, vector<32x384xbf16>, vector<32x384xbf16>, vector<32x384xbf16>, vector<32x384xbf16>, vector<32x384xbf16> -> vector<288x384xbf16>
    %c0_68 = arith.constant 0 : index
    %c0_69 = arith.constant 0 : index
    %145 = vector.load %arg15[%c0_68, %c0_69] : memref<32x288xbf16, #tpu.memory_space<vmem>>, vector<32x288xbf16>
    %cst_70 = arith.constant dense<0.000000e+00> : vector<32x384xf32>
    %146 = tpu.matmul %145, %144, %cst_70 {dimension_numbers = #tpu.dot_dimension_numbers<[1], [0], [0], [1], [0, 0, 1, 1], [], []>} : vector<32x288xbf16>, vector<288x384xbf16>, vector<32x384xf32> -> vector<32x384xf32>
    %c0_71 = arith.constant 0 : index
    %c0_72 = arith.constant 0 : index
    %147 = vector.load %arg16[%c0_71, %c0_72] : memref<32x1xf32, #tpu.memory_space<vmem>>, vector<32x1xf32>
    %148 = vector.broadcast %147 : vector<32x1xf32> to vector<32x384xf32>
    %149 = arith.addf %146, %148 : vector<32x384xf32>
    %150 = vector.broadcast %8 : vector<32x1xf32> to vector<32x384xf32>
    %151 = arith.addf %149, %150 : vector<32x384xf32>
    %cst_73 = arith.constant 0.000000e+00 : f32
    %152 = vector.broadcast %cst_73 : f32 to vector<32x384xf32>
    %153 = arith.maximumf %151, %152 : vector<32x384xf32>
    %154 = vector.broadcast %0 : vector<1x384xf32> to vector<32x384xf32>
    %155 = arith.mulf %153, %154 : vector<32x384xf32>
    %156 = arith.addf %131, %155 : vector<32x384xf32>
    %157 = arith.truncf %156 : vector<32x384xf32> to vector<32x384xbf16>
    %c0_74 = arith.constant 0 : index
    %c128_75 = arith.constant 128 : index
    %158 = vector.load %arg23[%c0_74, %c128_75] : memref<32x640xbf16, #tpu.memory_space<vmem>>, vector<32x384xbf16>
    tpu.vector_store %arg23[%c0_74, %c128_75], %157 {strides = array<i32>} : memref<32x640xbf16, #tpu.memory_space<vmem>>, vector<32x384xbf16>,
    %c0_76 = arith.constant 0 : index
    %c0_77 = arith.constant 0 : index
    %159 = vector.load %arg23[%c0_76, %c0_77] : memref<32x640xbf16, #tpu.memory_space<vmem>>, vector<32x640xbf16>
    %160 = vector.extract_strided_slice %159 {offsets = [0, 109], sizes = [32, 384], strides = [1, 1]} : vector<32x640xbf16> to vector<32x384xbf16>
    %161 = vector.extract_strided_slice %159 {offsets = [0, 110], sizes = [32, 384], strides = [1, 1]} : vector<32x640xbf16> to vector<32x384xbf16>
    %162 = vector.extract_strided_slice %159 {offsets = [0, 111], sizes = [32, 384], strides = [1, 1]} : vector<32x640xbf16> to vector<32x384xbf16>
    %163 = vector.extract_strided_slice %159 {offsets = [0, 127], sizes = [32, 384], strides = [1, 1]} : vector<32x640xbf16> to vector<32x384xbf16>
    %164 = vector.extract_strided_slice %159 {offsets = [0, 128], sizes = [32, 384], strides = [1, 1]} : vector<32x640xbf16> to vector<32x384xbf16>
    %165 = vector.extract_strided_slice %159 {offsets = [0, 129], sizes = [32, 384], strides = [1, 1]} : vector<32x640xbf16> to vector<32x384xbf16>
    %166 = vector.extract_strided_slice %159 {offsets = [0, 145], sizes = [32, 384], strides = [1, 1]} : vector<32x640xbf16> to vector<32x384xbf16>
    %167 = vector.extract_strided_slice %159 {offsets = [0, 146], sizes = [32, 384], strides = [1, 1]} : vector<32x640xbf16> to vector<32x384xbf16>
    %168 = vector.extract_strided_slice %159 {offsets = [0, 147], sizes = [32, 384], strides = [1, 1]} : vector<32x640xbf16> to vector<32x384xbf16>
    %169 = tpu.concatenate %160, %161, %162, %163, %164, %165, %166, %167, %168 in 0 : vector<32x384xbf16>, vector<32x384xbf16>, vector<32x384xbf16>, vector<32x384xbf16>, vector<32x384xbf16>, vector<32x384xbf16>, vector<32x384xbf16>, vector<32x384xbf16>, vector<32x384xbf16> -> vector<288x384xbf16>
    %c0_78 = arith.constant 0 : index
    %c0_79 = arith.constant 0 : index
    %170 = vector.load %arg17[%c0_78, %c0_79] : memref<1x288xbf16, #tpu.memory_space<vmem>>, vector<1x288xbf16>
    %cst_80 = arith.constant dense<0.000000e+00> : vector<1x384xf32>
    %171 = tpu.matmul %170, %169, %cst_80 {dimension_numbers = #tpu.dot_dimension_numbers<[1], [0], [0], [1], [0, 0, 1, 1], [], []>} : vector<1x288xbf16>, vector<288x384xbf16>, vector<1x384xf32> -> vector<1x384xf32>
    %c0_81 = arith.constant 0 : index
    %c0_82 = arith.constant 0 : index
    %172 = vector.load %arg18[%c0_81, %c0_82] : memref<1x1xf32, #tpu.memory_space<vmem>>, vector<1x1xf32>
    %173 = vector.broadcast %172 : vector<1x1xf32> to vector<1x384xf32>
    %174 = arith.addf %171, %173 : vector<1x384xf32>
    %175 = arith.mulf %174, %0 : vector<1x384xf32>
    %c0_83 = arith.constant 0 : index
    %c0_84 = arith.constant 0 : index
    %c0_85 = arith.constant 0 : index
    %176 = vector.load %arg21[%c0_83, %c0_84, %c0_85] : memref<1x1x384xf32, #tpu.memory_space<vmem>>, vector<1x1x384xf32>
    %177 = vector.shape_cast %176 : vector<1x1x384xf32> to vector<1x384xf32>
    %178 = vector.shape_cast %175 : vector<1x384xf32> to vector<1x1x384xf32>
    tpu.vector_store %arg21[%c0_83, %c0_84, %c0_85], %178 {strides = array<i32>} : memref<1x1x384xf32, #tpu.memory_space<vmem>>, vector<1x1x384xf32>,
    return
  }
  func.func @transform_0(%arg0: i32) -> (i32, i32) {
    %c0_i32 = arith.constant 0 : i32
    %c0_i32_0 = arith.constant 0 : i32
    %c0_i32_1 = arith.constant 0 : i32
    return %c0_i32, %c0_i32_0 : i32, i32
  }
  func.func @transform_1(%arg0: i32) -> (i32, i32, i32) {
    %c0_i32 = arith.constant 0 : i32
    %c0_i32_0 = arith.constant 0 : i32
    %c0_i32_1 = arith.constant 0 : i32
    return %arg0, %c0_i32, %c0_i32_0 : i32, i32, i32
  }
  func.func @transform_2(%arg0: i32) -> (i32, i32, i32) {
    %c0_i32 = arith.constant 0 : i32
    %c0_i32_0 = arith.constant 0 : i32
    %c0_i32_1 = arith.constant 0 : i32
    return %arg0, %c0_i32, %c0_i32_0 : i32, i32, i32
  }
  func.func @transform_3(%arg0: i32) -> (i32, i32, i32) {
    %c0_i32 = arith.constant 0 : i32
    %c0_i32_0 = arith.constant 0 : i32
    %c0_i32_1 = arith.constant 0 : i32
    return %arg0, %c0_i32, %c0_i32_0 : i32, i32, i32
  }
  func.func @transform_4(%arg0: i32) -> (i32, i32, i32) {
    %c0_i32 = arith.constant 0 : i32
    %c0_i32_0 = arith.constant 0 : i32
    %c0_i32_1 = arith.constant 0 : i32
    return %arg0, %c0_i32, %c0_i32_0 : i32, i32, i32
  }
  func.func @transform_5(%arg0: i32) -> (i32, i32, i32) {
    %c0_i32 = arith.constant 0 : i32
    %c0_i32_0 = arith.constant 0 : i32
    %c0_i32_1 = arith.constant 0 : i32
    return %arg0, %c0_i32, %c0_i32_0 : i32, i32, i32
  }
  func.func @transform_6(%arg0: i32) -> (i32, i32) {
    %c0_i32 = arith.constant 0 : i32
    %c0_i32_0 = arith.constant 0 : i32
    %c0_i32_1 = arith.constant 0 : i32
    return %c0_i32, %c0_i32_0 : i32, i32
  }
  func.func @transform_7(%arg0: i32) -> (i32, i32) {
    %c0_i32 = arith.constant 0 : i32
    %c0_i32_0 = arith.constant 0 : i32
    %c0_i32_1 = arith.constant 0 : i32
    return %c0_i32, %c0_i32_0 : i32, i32
  }
  func.func @transform_8(%arg0: i32) -> (i32, i32) {
    %c0_i32 = arith.constant 0 : i32
    %c0_i32_0 = arith.constant 0 : i32
    %c0_i32_1 = arith.constant 0 : i32
    return %c0_i32, %c0_i32_0 : i32, i32
  }
  func.func @transform_9(%arg0: i32) -> (i32, i32) {
    %c0_i32 = arith.constant 0 : i32
    %c0_i32_0 = arith.constant 0 : i32
    %c0_i32_1 = arith.constant 0 : i32
    return %c0_i32, %c0_i32_0 : i32, i32
  }
  func.func @transform_10(%arg0: i32) -> (i32, i32) {
    %c0_i32 = arith.constant 0 : i32
    %c0_i32_0 = arith.constant 0 : i32
    %c0_i32_1 = arith.constant 0 : i32
    return %c0_i32, %c0_i32_0 : i32, i32
  }
  func.func @transform_11(%arg0: i32) -> (i32, i32) {
    %c0_i32 = arith.constant 0 : i32
    %c0_i32_0 = arith.constant 0 : i32
    %c0_i32_1 = arith.constant 0 : i32
    return %c0_i32, %c0_i32_0 : i32, i32
  }
  func.func @transform_12(%arg0: i32) -> (i32, i32) {
    %c0_i32 = arith.constant 0 : i32
    %c0_i32_0 = arith.constant 0 : i32
    %c0_i32_1 = arith.constant 0 : i32
    return %c0_i32, %c0_i32_0 : i32, i32
  }
  func.func @transform_13(%arg0: i32) -> (i32, i32) {
    %c0_i32 = arith.constant 0 : i32
    %c0_i32_0 = arith.constant 0 : i32
    %c0_i32_1 = arith.constant 0 : i32
    return %c0_i32, %c0_i32_0 : i32, i32
  }
  func.func @transform_14(%arg0: i32) -> (i32, i32) {
    %c0_i32 = arith.constant 0 : i32
    %c0_i32_0 = arith.constant 0 : i32
    %c0_i32_1 = arith.constant 0 : i32
    return %c0_i32, %c0_i32_0 : i32, i32
  }
  func.func @transform_15(%arg0: i32) -> (i32, i32) {
    %c0_i32 = arith.constant 0 : i32
    %c0_i32_0 = arith.constant 0 : i32
    %c0_i32_1 = arith.constant 0 : i32
    return %c0_i32, %c0_i32_0 : i32, i32
  }
  func.func @transform_16(%arg0: i32) -> (i32, i32) {
    %c0_i32 = arith.constant 0 : i32
    %c0_i32_0 = arith.constant 0 : i32
    %c0_i32_1 = arith.constant 0 : i32
    return %c0_i32, %c0_i32_0 : i32, i32
  }
  func.func @transform_17(%arg0: i32) -> (i32, i32) {
    %c0_i32 = arith.constant 0 : i32
    %c0_i32_0 = arith.constant 0 : i32
    %c0_i32_1 = arith.constant 0 : i32
    return %c0_i32, %c0_i32_0 : i32, i32
  }
  func.func @transform_18(%arg0: i32) -> (i32, i32) {
    %c0_i32 = arith.constant 0 : i32
    %c0_i32_0 = arith.constant 0 : i32
    %c0_i32_1 = arith.constant 0 : i32
    return %c0_i32, %c0_i32_0 : i32, i32
  }
  func.func @transform_19(%arg0: i32) -> (i32, i32, i32) {
    %c0_i32 = arith.constant 0 : i32
    %c0_i32_0 = arith.constant 0 : i32
    %c0_i32_1 = arith.constant 0 : i32
    return %arg0, %c0_i32, %c0_i32_0 : i32, i32, i32
  }
  func.func @transform_20(%arg0: i32) -> (i32, i32, i32) {
    %c0_i32 = arith.constant 0 : i32
    %c0_i32_0 = arith.constant 0 : i32
    %c0_i32_1 = arith.constant 0 : i32
    return %arg0, %c0_i32, %c0_i32_0 : i32, i32, i32
  }
  func.func @transform_21(%arg0: i32) -> (i32, i32, i32) {
    %c0_i32 = arith.constant 0 : i32
    %c0_i32_0 = arith.constant 0 : i32
    %c0_i32_1 = arith.constant 0 : i32
    return %arg0, %c0_i32, %c0_i32_0 : i32, i32, i32
  }
}

</mosaic_0001>

<bundles_post_ra>
// kernel: docdiff_forward.1
= control target key start
LH: loop header
LB: loop body
LE: loop exit
PB: predicated region body
PF: predicated region fallthrough
CT: control target
= control target key end

     0   :  { %s8249_s0 = inlined_call_operand.vmem [shape: f32[2,2], index: 0, kind: input, shape index: {}]   ;;  %s8250_s1 = inlined_call_operand.vmem [shape: f32[2,1,640], index: 1, kind: input, shape index: {}]   ;;  %s8251_s2 = inlined_call_operand.vmem [shape: f32[2,1,640], index: 2, kind: input, shape index: {}]   ;;  %s8252_s3 = inlined_call_operand.vmem [shape: f32[2,1,640], index: 3, kind: input, shape index: {}]   ;;  %s8253_s4 = inlined_call_operand.vmem [shape: f32[2,32,1], index: 4, kind: input, shape index: {}]   ;;  %s8254_s5 = inlined_call_operand.vmem [shape: f32[2,32,1], index: 5, kind: input, shape index: {}]   ;;  %s8255_s6 = inlined_call_operand.vmem [shape: bf16[32,16], index: 6, kind: input, shape index: {}]   ;;  %s8256_s7 = inlined_call_operand.vmem [shape: f32[32,1], index: 7, kind: input, shape index: {}]   ;;  %s8257_s8 = inlined_call_operand.vmem [shape: bf16[32,288], index: 8, kind: input, shape index: {}]   ;;  %s8258_s9 = inlined_call_operand.vmem [shape: f32[32,1], index: 9, kind: input, shape index: {}]   ;;  %s8259_s10 = inlined_call_operand.vmem [shape: bf16[2,288], index: 10, kind: input, shape index: {}]   ;;  %s8260_s11 = inlined_call_operand.vmem [shape: f32[2,1], index: 11, kind: input, shape index: {}]   ;;  %s8261_s12 = inlined_call_operand.vmem [shape: bf16[32,32], index: 12, kind: input, shape index: {}]   ;;  %s8262_s13 = inlined_call_operand.vmem [shape: f32[32,1], index: 13, kind: input, shape index: {}]   ;;  %s8263_s14 = inlined_call_operand.vmem [shape: bf16[32,288], index: 14, kind: input, shape index: {}]   ;;  %s8264_s15 = inlined_call_operand.vmem [shape: f32[32,1], index: 15, kind: input, shape index: {}]   ;;  %s8265_s16 = inlined_call_operand.vmem [shape: bf16[1,288], index: 16, kind: input, shape index: {}]   ;;  %s8266_s17 = inlined_call_operand.<no memory space> [shape: f32[1,1], index: 17, kind: input, shape index: {}]   ;;  %s8267_s18 = inlined_call_operand.vmem [shape: f32[1,384], index: 18, kind: input, shape index: {}]   ;;  %s8268_s19 = inlined_call_operand.vmem [shape: f32[2,2,384], index: 19, kind: output, shape index: {0}]   ;;  %s8269_s20 = inlined_call_operand.vmem [shape: f32[2,1,384], index: 20, kind: output, shape index: {1}]   ;;  %s8270_s21 = inlined_call_operand.vmem [shape: f32[2,1,384], index: 21, kind: output, shape index: {2}]  }
   0x1   :  { %8316 = sst [smem:[#allocation17_spill]] %s8249_s0  ;;  %v27_v0 = vstv %s8266_s17 }
   0x2   :  { %8317 = sst [smem:[#allocation18_spill]] %s8250_s1  ;;  %28 = vst [vmem:[#allocation4] sm:$0x1] %v27_v0 }
   0x3   :  { %8318 = sst [smem:[#allocation19_spill]] %s8251_s2 }
   0x4   :  { %8319 = sst [smem:[#allocation20_spill]] %s8252_s3 }
   0x5   :  { %8320 = sst [smem:[#allocation21_spill]] %s8253_s4 }
   0x6   :  { %8321 = sst [smem:[#allocation22_spill]] %s8254_s5 }
   0x7   :  { %8322 = sst [smem:[#allocation23_spill]] %s8255_s6 }
   0x8   :  { %8323 = sst [smem:[#allocation24_spill]] %s8256_s7 }
   0x9   :  { %8324 = sst [smem:[#allocation25_spill]] %s8257_s8 }
   0xa   :  { %8325 = sst [smem:[#allocation26_spill]] %s8258_s9 }
   0xb   :  { %8326 = sst [smem:[#allocation27_spill]] %s8259_s10 }
   0xc   :  { %8327 = sst [smem:[#allocation28_spill]] %s8260_s11 }
   0xd   :  { %8328 = sst [smem:[#allocation29_spill]] %s8267_s18 }
   0xe   :  { %29 = vsyncpa [#allocation6], 0  ;;  %s5619_s26 = smov 0  }
   0xf LB: > { %8329 = sst [smem:[#allocation8_spill]] %s5489_s26  ;;  %s5625_s27 = sadd.s32 4294967295, %s5489_s26   ;;  %s5489_s26 = sphi %s5619_s26, %s35_s26  }
  0x10   : > { %p4913_p0 = scmp.ge.s32.totalorder %s5489_s26, 1  ;;  %p542_p1 = scmp.lt.s32.totalorder %s5489_s26, 3 }
  0x11   : > { %s8330_s28 = sld [smem:[#allocation17_spill]]  ;;  %p5190_p3 = scmp.eq.s32.totalorder %s5625_s27, 0 }
  0x12   : > { %p5632_p2 = pnand %p4913_p0, %p542_p1 }
  0x14   : > { %p5186_p4 = pneg %p5632_p2 }
  0x16   : > { %p5187_p5 = pnand %p5190_p3, %p5186_p4 }
  0x17   : > { %s555_s29 = sshll.u32 %s8330_s28, 4  ;;  %s556_s29 = int_to_ptr.vmem [resolvable:$true] %s555_s29 }
  0x18   : > { %s5464_s4 = scalar_lea.vmem %s556_s29, 32  ;;  %p5466_p7 = pneg %p5187_p5 }
  0x19   : > { %p5465_p6 = scmp.ne.s32.totalorder %s556_s29, %s5464_s4  ;;  %p5472_p10 = scmp.lt.s32.totalorder %s556_s29, %s556_s29 }
  0x1a   : > { %p5473_p11 = scmp.lt.s32.totalorder %s5464_s4, %s5464_s4 }
  0x1b   : > { %p5467_p8 = pnand %p5466_p7, %p5465_p6 }
  0x1c   : > { %p5474_p12 = por %p5473_p11, %p5472_p10 }
  0x1d   : > { %p5468_p9 = pneg %p5467_p8 }
  0x1f   : > { %p5475_p13 = pnand %p5474_p12, %p5468_p9 }
  0x21   : > { %5478 = shalt.err (!%p5475_p13)
}
  0x22   : > { %s5491_s30 = smov [#allocation5]   ;;  %644 = sbr.rel (%p5632_p2) target bundleno = 3624 (0xe28), region = 96 }
  0x23   : > { %5189 = dma.vmem_to_smem (!%p5187_p5), %s556_s29, 32, %s5491_s30, [#allocation6]  }
  0x29   : > { %5484 = dma.done.wait (%p5190_p3), [#allocation6], 32  }
  0x2a   : > { %5486 = vsyncadd (%p5190_p3), [#allocation6], 4294967264 }
  0x2b   : > { %650 = sfence }
  0x2c   : > { %p730_p0 = scmp.lt.s32.totalorder %s5625_s27, 1  ;;  %v8288_v1 = vlaneseq  ;;  %s8336_s24 = sld [smem:[#allocation18_spill]]  ;;  %vm816_vm0 = vcmask 1039360   ;;  %vm832_vm1 = vcmask 1031168   ;;  %vm937_vm2 = vcmask 1040384  }
  0x2d   : > { %s8302_s25 = smov 126   ;;  %s8281_s3 = smov 127   ;;  %vm848_vm3 = vcmask 900096   ;;  %vm942_vm4 = vcmask 1041408   ;;  %vm947_vm5 = vcmask 1042432   ;;  %vm952_vm6 = vcmask 1043456  }
  0x2e   : > { %s5649_s5 = scalar_select %p730_p0, %s5625_s27, 1  ;;  %v5652_v2 = vshrl.u32 %v8288_v1, 7  ;;  %vm8308_vm7 = vcmask 891904   ;;  %vm8307_vm8 = vcmask 883712   ;;  %vm957_vm9 = vcmask 1044480  }
  0x2f   : > { %s8277_s17 = smov 110   ;;  %s8271_s28 = smov 109   ;;  %vm897_vm10 = vcmask 752640   ;;  %vm913_vm11 = vcmask 744448   ;;  %vm962_vm12 = vcmask 1045504   ;;  %vm8304_vm13 = vcmask 736256  }
  0x30   : > { %8332 = vst [vmem:[#allocation9_spill] sm:$0xff] %v5652_v2  ;;  %s5655_s22 = smul.u32 5, %s5649_s5  ;;  %v5658_v3 = vsub.s32 1, %v5652_v2  ;;  %v5661_v4 = vsub.s32 2, %v5652_v2  ;;  %v5664_v5 = vsub.s32 0, %v5652_v2  ;;  %v802_v6 = vsub.s32 3, %v5652_v2 }
  0x31   : > { %v871_v14 = vsub.s32 4, %v5652_v2  ;;  %s8285_s29 = smov 108   ;;  %s8275_s0 = smov 92   ;;  %vm8287_vm14 = vcmask 1046528   ;;  %vm1037_vm15 = vcmask 130048  }
  0x32   : > { %8333 = vst [vmem:[#allocation10_spill] sm:$0xff] %v5658_v3  ;;  %8334 = vst [vmem:[#allocation11_spill] sm:$0xff] %v5661_v4  ;;  %s733_s2 = scalar_lea.vmem %s8336_s24, %s5655_s22  ;;  %s8279_s4 = smov 91  }
  0x33   : > { %8335 = vst [vmem:[#allocation12_spill] sm:$0xff] %v5664_v5  ;;  %v786_v7 = vld [vmem:[%s733_s2] sm:$0x1f]  ;;  %s8273_s30 = smov 90   ;;  %s8340_s6 = sld [smem:[#allocation23_spill]] }
  0x34   : > { %v5672_v8 = vrot.slane %v786_v7, %v5658_v3  ;;  %v5675_v9 = vrot.slane %v786_v7, %v5661_v4  ;;  %v5678_v10 = vrot.slane %v786_v7, %v5664_v5  ;;  %v5680_v11 = vrot.slane %v786_v7, %v802_v6  ;;  %s8283_s24 = smov 19   ;;  %s8301_s2 = sshll.u32 %s5649_s5, 5 }
  0x35   : > { %v872_v15 = vrot.slane %v786_v7, %v871_v14  ;;  %s8341_s7 = sld [smem:[#allocation24_spill]]  ;;  %s8349_s23 = smov 90  }
  0x36   : > { %8337 = vst [vmem:[#allocation13_spill] sm:$0xff] %v5672_v8  ;;  %8338 = vst [vmem:[#allocation14_spill] sm:$0xff] %v5675_v9  ;;  %v5225_v12 = vpack.i.bf16 %v5675_v9, %v5672_v8  ;;  %v5230_v13 = vpack.i.bf16 %v5678_v10, %v5680_v11  ;;  %s8350_s18 = sld [smem:[#allocation29_spill]]  ;;  %s8353_s8 = sld [smem:[#allocation25_spill]] }
  0x37   : > { %8339 = vst [vmem:[#allocation15_spill] sm:$0xff] %v5680_v11  ;;  %v5255_v16 = vpack.i.bf16 %v872_v15, %v5680_v11  ;;  %s8354_s9 = sld [smem:[#allocation26_spill]]  ;;  %s8360_s10 = sld [smem:[#allocation27_spill]] }
  0x38   : > { %5226 = vrot.lane.b32.xlu1 %v5225_v12, %s8302_s25  ;;  %5216 = vrot.lane.b32.xlu0 %v5225_v12, %s8281_s3  ;;  %s8361_s11 = sld [smem:[#allocation28_spill]]  ;;  %s4942_s1 = sshll.u32 %s5625_s27, 7 }
  0x39   : > { %s5180_s26 = smul.u32 6, %s5649_s5 }
  0x3c   : > { %5231 = vrot.lane.b32.xlu1 %v5230_v13, %s8302_s25  ;;  %5221 = vrot.lane.b32.xlu0 %v5230_v13, %s8281_s3 }
  0x40   : > { %5241 = vrot.lane.b32.xlu1 %v5230_v13, %s8277_s17  ;;  %5236 = vrot.lane.b32.xlu0 %v5225_v12, %s8277_s17  ;;  %s8343_s17 = smov 108  }
  0x44   : > { %860 = vrot.lane.b32.xlu1 %v5680_v11, %s8271_s28  ;;  %5246 = vrot.lane.b32.xlu0 %v5225_v12, %s8271_s28  ;;  %s8351_s28 = smov 109  }
  0x48   : > { %5256 = vrot.lane.b32.xlu1 %v5255_v16, %s8285_s29  ;;  %5251 = vrot.lane.b32.xlu0 %v5225_v12, %s8285_s29  ;;  %s8344_s29 = smov 127  }
  0x4c   : > { %5266 = vrot.lane.b32.xlu1 %v5255_v16, %s8275_s0  ;;  %5261 = vrot.lane.b32.xlu0 %v5225_v12, %s8275_s0  ;;  %s8345_s0 = smov 91  }
  0x50   : > { %909 = vrot.lane.b32.xlu1 %v5680_v11, %s8279_s4  ;;  %5271 = vrot.lane.b32.xlu0 %v5225_v12, %s8279_s4 }
  0x54   : > { %925 = vrot.lane.b32.xlu1 %v5680_v11, %s8273_s30  ;;  %5276 = vrot.lane.b32.xlu0 %v5225_v12, %s8273_s30 }
  0x58   : > { %927 = vrot.lane.b32.xlu1 %v872_v15, %s8273_s30  ;;  %911 = vrot.lane.b32.xlu0 %v872_v15, %s8279_s4  ;;  %s8342_s4 = sld [smem:[#allocation21_spill]]  ;;  %s8347_s30 = smov 19  }
  0x5e   : > { %s746_s3 = scalar_lea.vmem %s8342_s4, %s8301_s2  ;;  %s8346_s4 = smov 110  }
  0x5f   : > { %s8381_s2 = sshll.u32 %s5649_s5, 5 }
  0xaa   : > { %v5227_v17 = vpop.permute.xlu1 %5226  ;;  %v5217_v18 = vpop.permute.xlu0 %5216 }
  0xab   : > { %v5219_v23 = vunpack.i.h.bf16 %v5217_v18  ;;  %v5218_v24 = vunpack.i.l.bf16 %v5217_v18  ;;  %v5229_v27 = vunpack.i.h.bf16 %v5227_v17  ;;  %v5228_v28 = vunpack.i.l.bf16 %v5227_v17 }
  0xad   : > { %v818_v33 = vsel %vm816_vm0, %v5218_v24, %v5219_v23  ;;  %v834_v36 = vsel %vm832_vm1, %v5228_v28, %v5229_v27 }
  0xae   : > { %v5232_v19 = vpop.permute.xlu1 %5231  ;;  %v5222_v20 = vpop.permute.xlu0 %5221  ;;  %v939_v37 = vsel %vm937_vm2, %v5672_v8, %v818_v33 }
  0xaf   : > { %v5224_v25 = vunpack.i.h.bf16 %v5222_v20  ;;  %v5223_v26 = vunpack.i.l.bf16 %v5222_v20  ;;  %v5234_v29 = vunpack.i.h.bf16 %v5232_v19  ;;  %v5233_v30 = vunpack.i.l.bf16 %v5232_v19 }
  0xb0   : > { %v944_v51 = vsel %vm942_vm4, %v939_v37, %v834_v36 }
  0xb1   : > { %v817_v34 = vsel %vm816_vm0, %v5224_v25, %v5218_v24  ;;  %v819_v35 = vsel %vm816_vm0, %v5219_v23, %v5223_v26  ;;  %v833_v38 = vsel %vm832_vm1, %v5234_v29, %v5228_v28  ;;  %v835_v39 = vsel %vm832_vm1, %v5229_v27, %v5233_v30 }
  0xb2   : > { %v5242_v21 = vpop.permute.xlu1 %5241  ;;  %v5237_v22 = vpop.permute.xlu0 %5236  ;;  %v938_v40 = vsel %vm937_vm2, %v5678_v10, %v817_v34  ;;  %v940_v43 = vsel %vm937_vm2, %v5675_v9, %v819_v35  ;;  %v941_v47 = vsel %vm937_vm2, %v5680_v11, %v5223_v26  ;;  %v5762_v35 = vld [vmem:[%s8340_s6] sm:$0xff]  }
  0xb3   : > { %v5243_v44 = vunpack.i.l.bf16 %v5242_v21  ;;  %v5239_v45 = vunpack.i.h.bf16 %v5237_v22  ;;  %v5238_v46 = vunpack.i.l.bf16 %v5237_v22  ;;  %v5244_v48 = vunpack.i.h.bf16 %v5242_v21  ;;  %5091 = vmatprep.mubr.msk.bf16.mxu1 %vm1037_vm15, %v5762_v35 }
  0xb4   : > { %v945_v52 = vsel %vm942_vm4, %v940_v43, %v835_v39  ;;  %v946_v59 = vsel %vm942_vm4, %v941_v47, %v5233_v30  ;;  %v943_v60 = vsel %vm942_vm4, %v938_v40, %v833_v38  ;;  %v8289_v40 = vmov 0  }
  0xb5   : > { %v851_v57 = vsel %vm848_vm3, %v5239_v45, %v5243_v44  ;;  %v850_v58 = vsel %vm848_vm3, %v5238_v46, %v5239_v45  ;;  %v849_v61 = vsel %vm848_vm3, %v5244_v48, %v5238_v46  ;;  %v951_v62 = vsel %vm947_vm5, %v946_v59, %v5243_v44  ;;  %1076 = vmatprep.mubr.bf16.mxu0 %v8289_v40 }
  0xb6   : > { %v861_v31 = vpop.permute.xlu1 %860  ;;  %v5709_v32 = vpop.permute.xlu0 %5246  ;;  %v949_v13 = vsel %vm947_vm5, %v944_v51, %v850_v58  ;;  %v950_v19 = vsel %vm947_vm5, %v945_v52, %v851_v57  ;;  %v948_v20 = vsel %vm947_vm5, %v943_v60, %v849_v61  ;;  %777 = vst [vmem:[#allocation3] sm:$0x1f] %v8289_v40  ;;  %5281 = vset.pattern.permute.xlu1 %v8289_v40 }
  0xb7   : > { %v5249_v49 = vunpack.i.h.bf16 %v5709_v32  ;;  %v5248_v50 = vunpack.i.l.bf16 %v5709_v32  ;;  %v956_v23 = vsel %vm952_vm6, %v951_v62, %v861_v31  ;;  %5280 = vset.pattern.permute.xlu0 %v8289_v40 }
  0xb9   : > { %v864_v63 = vsel %vm8308_vm7, %v5249_v49, %v861_v31  ;;  %v863_v0 = vsel %vm8308_vm7, %v5248_v50, %v5249_v49  ;;  %v953_v24 = vsel %vm952_vm6, %v948_v20, %v5248_v50 }
  0xba   : > { %v5257_v41 = vpop.permute.xlu1 %5256  ;;  %v5721_v42 = vpop.permute.xlu0 %5251  ;;  %v954_v25 = vsel %vm952_vm6, %v949_v13, %v863_v0  ;;  %v955_v26 = vsel %vm952_vm6, %v950_v19, %v864_v63  ;;  %v778_v13 = vld [vmem:[%s746_s3] sm:$0xff] }
  0xbb   : > { %v5259_v53 = vunpack.i.h.bf16 %v5257_v41  ;;  %v5258_v54 = vunpack.i.l.bf16 %v5257_v41  ;;  %v5254_v6 = vunpack.i.h.bf16 %v5721_v42  ;;  %v5253_v7 = vunpack.i.l.bf16 %v5721_v42 }
  0xbd   : > { %v884_v14 = vsel %vm8307_vm8, %v5258_v54, %v5259_v53  ;;  %v883_v27 = vsel %vm8307_vm8, %v5254_v6, %v5258_v54  ;;  %v882_v28 = vsel %vm8307_vm8, %v5253_v7, %v5254_v6  ;;  %v958_v58 = vsel %vm957_vm9, %v953_v24, %v5253_v7  ;;  %v984_v7 = vld [vmem:[%s8341_s7] sm:$0xff] }
  0xbe   : > { %v5267_v55 = vpop.permute.xlu1 %5266  ;;  %v5731_v56 = vpop.permute.xlu0 %5261  ;;  %v961_v30 = vsel %vm957_vm9, %v956_v23, %v884_v14  ;;  %v959_v42 = vsel %vm957_vm9, %v954_v25, %v882_v28  ;;  %v960_v43 = vsel %vm957_vm9, %v955_v26, %v883_v27  ;;  %v987_v14 = vld [vmem:[%s8341_s7 + $0x18] sm:$0xff]  ;;  %v5443_v25 = vld [vmem:[%s8340_s6 + $0x8] sm:$0xff]  }
  0xbf   : > { %v5269_v10 = vunpack.i.h.bf16 %v5267_v55  ;;  %v5268_v12 = vunpack.i.l.bf16 %v5267_v55  ;;  %v5264_v15 = vunpack.i.h.bf16 %v5731_v56  ;;  %v5263_v16 = vunpack.i.l.bf16 %v5731_v56 }
  0xc1   : > { %v900_v29 = vsel %vm897_vm10, %v5268_v12, %v5269_v10  ;;  %v899_v32 = vsel %vm897_vm10, %v5264_v15, %v5268_v12  ;;  %v898_v33 = vsel %vm897_vm10, %v5263_v16, %v5264_v15  ;;  %v963_v62 = vsel %vm962_vm12, %v958_v58, %v5263_v16  ;;  %v985_v10 = vld [vmem:[%s8341_s7 + $0x8] sm:$0xff]  ;;  %v986_v15 = vld [vmem:[%s8341_s7 + $0x10] sm:$0xff]  ;;  %v781_v16 = vld [vmem:[%s746_s3 + $0x18] sm:$0xff]  ;;  %s8364_s7 = sld [smem:[#allocation19_spill]] }
  0xc2   : > { %v910_v17 = vpop.permute.xlu1 %909  ;;  %v5272_v18 = vpop.permute.xlu0 %5271  ;;  %v966_v41 = vsel %vm962_vm12, %v961_v30, %v900_v29  ;;  %v964_v45 = vsel %vm962_vm12, %v959_v42, %v898_v33  ;;  %v965_v47 = vsel %vm962_vm12, %v960_v43, %v899_v32  ;;  %v779_v12 = vld [vmem:[%s746_s3 + $0x8] sm:$0xff] }
  0xc3   : > { %v5274_v21 = vunpack.i.h.bf16 %v5272_v18  ;;  %v5273_v22 = vunpack.i.l.bf16 %v5272_v18 }
  0xc5   : > { %v914_v38 = vsel %vm913_vm11, %v5273_v22, %v5274_v21  ;;  %v915_v39 = vsel %vm913_vm11, %v5274_v21, %v910_v17  ;;  %v968_v63 = vsel %vm8287_vm14, %v963_v62, %v5273_v22 }
  0xc6   : > { %v926_v34 = vpop.permute.xlu1 %925  ;;  %v5277_v31 = vpop.permute.xlu0 %5276  ;;  %v969_v50 = vsel %vm8287_vm14, %v964_v45, %v914_v38  ;;  %v970_v52 = vsel %vm8287_vm14, %v965_v47, %v915_v39 }
  0xc7   : > { %v5279_v36 = vunpack.i.h.bf16 %v5277_v31  ;;  %v5278_v37 = vunpack.i.l.bf16 %v5277_v31 }
  0xc9   : > { %v930_v44 = vsel %vm8304_vm13, %v5278_v37, %v5279_v36  ;;  %v931_v46 = vsel %vm8304_vm13, %v5279_v36, %v926_v34  ;;  %v972_v61 = vsel %vm937_vm2, %v5278_v37, 0.0  ;;  %v766_v36 = vld [vmem:[%s8350_s18] sm:$0x7] }
  0xca   : > { %v928_v48 = vpop.permute.xlu1 %927  ;;  %v912_v49 = vpop.permute.xlu0 %911  ;;  %v973_v51 = vsel %vm937_vm2, %v930_v44, 0.0  ;;  %v974_v53 = vsel %vm937_vm2, %v931_v46, 0.0  ;;  %v976_v0 = vpack.c.bf16 %v972_v61, %v968_v63 }
  0xcb   : > { %v932_v54 = vsel %vm8304_vm13, %v926_v34, %v928_v48  ;;  %v916_v55 = vsel %vm913_vm11, %v910_v17, %v912_v49  ;;  %v977_v56 = vpack.c.bf16 %v973_v51, %v969_v50  ;;  %v978_v57 = vpack.c.bf16 %v974_v53, %v970_v52  ;;  %v780_v17 = vld [vmem:[%s746_s3 + $0x10] sm:$0xff]  ;;  %s2685_s3 = sadd.s32 1, %s4942_s1 }
  0xcc   : > { %v975_v59 = vsel %vm937_vm2, %v932_v54, 0.0  ;;  %v971_v60 = vsel %vm8287_vm14, %v966_v41, %v916_v55  ;;  %vm1030_vm14 = vcmask 154624   ;;  %v5857_v48 = vrot.slane %v766_v36, %v5664_v5  ;;  %s6935_s27 = sld [smem:[#allocation5 + %s2685_s3]] }
  0xcd   : > { %1024 = vrot.lane.b32.xlu0 %v977_v56, %s8283_s24  ;;  %1026 = vrot.lane.b32.xlu1 %v978_v57, %s8283_s24  ;;  %v979_v6 = vpack.c.bf16 %v975_v59, %v971_v60  ;;  %v5865_v57 = vrot.slane %v766_v36, %v5661_v4  ;;  %s2684_s3 = sld [smem:[#allocation5 + %s4942_s1]] }
  0xd1   : > { %1022 = vrot.lane.b32.xlu0 %v976_v0, %s8283_s24  ;;  %1028 = vrot.lane.b32.xlu1 %v979_v6, %s8283_s24  ;;  %s8348_s24 = smov 92  }
  0xd5   : > { %990 = vperm.xlu0 %5280, %v984_v7   ;;  %995 = vperm.xlu1 %5281, %v985_v10  }
  0xd9   : > { %1153 = vperm.xlu0 %5280, %v779_v12   ;;  %1148 = vperm.xlu1 %5281, %v778_v13  }
  0xdd   : > { %1005 = vperm.xlu0 %5280, %v987_v14   ;;  %1000 = vperm.xlu1 %5281, %v986_v15  }
  0xe1   : > { %1163 = vperm.xlu0 %5280, %v781_v16   ;;  %1158 = vperm.xlu1 %5281, %v780_v17  }
  0xe5   : > { %5288 = vrot.lane.b32.xlu1 %v8289_v40, %s8302_s25  ;;  %5283 = vrot.lane.b32.xlu0 %v8289_v40, %s8344_s29 }
  0xe9   : > { %5298 = vrot.lane.b32.xlu1 %v8289_v40, %s8343_s17  ;;  %5293 = vrot.lane.b32.xlu0 %v8289_v40, %s8346_s4 }
  0xed   : > { %5308 = vrot.lane.b32.xlu1 %v8289_v40, %s8345_s0  ;;  %5303 = vrot.lane.b32.xlu0 %v8289_v40, %s8348_s24 }
  0xf1   : > { %5313 = vrot.lane.b32.xlu1 %v8289_v40, %s8347_s30 }
  0xf5   : > { %5318 = vrot.lane.b32.xlu1 %v8289_v40, %s8349_s23 }
 0x13f   : > { %v1025_v18 = vpop.permute.xlu0 %1024  ;;  %v1027_v19 = vpop.permute.xlu1 %1026 }
 0x140   : > { %v1032_v20 = vsel %vm1030_vm14, %v1025_v18, %v1027_v19 }
 0x141   : > { %1044 = vmatprep.subr.bf16.mxu0 %v1032_v20 }
 0x143   : > { %v1023_v21 = vpop.permute.xlu0 %1022  ;;  %v1029_v22 = vpop.permute.xlu1 %1028 }
 0x144   : > { %v1031_v23 = vsel %vm1030_vm14, %v1023_v21, %v1025_v18  ;;  %v1033_v24 = vsel %vm1030_vm14, %v1027_v19, %v1029_v22  ;;  %v5906_v22 = vrot.slane %v766_v36, %v5658_v3 }
 0x145   : > { %1045 = vmatpush1.bf16.msra.mxu0 %v1031_v23  ;;  %5089 = vmatprep.subr.bf16.mxu1 %v1033_v24 }
 0x146   : > { %5090 = vmatpush3.bf16.msra.mxu1 %v1033_v24 }
 0x148   : > { %4925 = vmatmul.mubr.msk.bf16.vlgmr.msra.gmra.mrb[0].mxu0 %vm1037_vm15, %v5762_v35 }
 0x149   : > { %5092 = vmatmul.mubr.msk.bf16.vlgmr.msra.gmra.mrb[0].mxu1 %vm1037_vm15, %v5443_v25  ;;  %1086 = vmatprep.mubr.bf16.mxu0 %v8289_v40 }
 0x150   : > { %4926 = vmatmul.mubr.msk.bf16.gmra.mrb[4].mxu0 %vm1037_vm15, %v5443_v25  ;;  %vm1742_vm15 = vcmask 261120  }
 0x154   : > { %v996_v26 = vpop.permute.xlu1 %995  ;;  %v991_v27 = vpop.permute.xlu0 %990 }
 0x158   : > { %v5840_v28 = vpop.permute.xlu1 %1148  ;;  %v5842_v29 = vpop.permute.xlu0 %1153 }
 0x15c   : > { %v5844_v30 = vpop.permute.xlu1 %1000  ;;  %v5846_v32 = vpop.permute.xlu0 %1005 }
 0x160   : > { %v5853_v45 = vpop.permute.xlu1 %1158  ;;  %v5859_v49 = vpop.permute.xlu0 %1163 }
 0x21b   : > { %v1078_v33 = vpop.f32.mrb[0].mxu0 }
 0x21c   : > { %v1079_v34 = vadd.f32 %v1078_v33, %v991_v27  ;;  %v1080_v31 = vpop.f32.mrb[1].mxu0  ;;  %v5093_v35 = vpop.f32.mrb[0].mxu1 }
 0x21d   : > { %v1140_v37 = vadd.f32 %v5093_v35, %v5844_v30  ;;  %v1082_v38 = vpop.f32.mrb[2].mxu0  ;;  %v1131_v39 = vpop.f32.mrb[1].mxu1  ;;  %v1081_v14 = vadd.f32 %v1080_v31, %v991_v27 }
 0x21e   : > { %v1166_v41 = vadd.f32 %v5840_v28, %v1079_v34  ;;  %v1083_v42 = vadd.f32 %v1082_v38, %v996_v26  ;;  %v1084_v43 = vpop.f32.mrb[3].mxu0  ;;  %v5094_v44 = vpop.f32.mrb[2].mxu1  ;;  %v1132_v15 = vadd.f32 %v1131_v39, %v991_v27 }
 0x21f   : > { %v1143_v46 = vadd.f32 %v5094_v44, %v5846_v32  ;;  %v1134_v47 = vpop.f32.mrb[3].mxu1  ;;  %v1174_v51 = vadd.f32 %v5853_v45, %v1140_v37  ;;  %v1085_v12 = vadd.f32 %v1084_v43, %v996_v26  ;;  %v1167_v18 = vadd.f32 %v5840_v28, %v1081_v14 }
 0x220   : > { %v1178_v50 = vmax.f32 %v1166_v41, 0.0  ;;  %v1169_v52 = vadd.f32 %v5842_v29, %v1083_v42  ;;  %v1135_v13 = vadd.f32 %v1134_v47, %v996_v26  ;;  %v1168_v19 = vadd.f32 %v5840_v28, %v1132_v15 }
 0x221   : > { %v1177_v53 = vadd.f32 %v5859_v49, %v1143_v46  ;;  %v1186_v59 = vmax.f32 %v1174_v51, 0.0  ;;  %v1170_v16 = vadd.f32 %v5842_v29, %v1085_v12  ;;  %v1179_v23 = vmax.f32 %v1167_v18, 0.0 }
 0x222   : > { %v1181_v54 = vmax.f32 %v1169_v52, 0.0  ;;  %v5868_v58 = vmul.f32 %v5857_v48, %v1178_v50  ;;  %v1171_v17 = vadd.f32 %v5842_v29, %v1135_v13  ;;  %v1180_v24 = vmax.f32 %v1168_v19, 0.0 }
 0x223   : > { %v1189_v55 = vmax.f32 %v1177_v53, 0.0  ;;  %v1088_v56 = vpop.f32.mrb[4].mxu0  ;;  %v5883_v7 = vmul.f32 %v5865_v57, %v1186_v59  ;;  %v1182_v20 = vmax.f32 %v1170_v16, 0.0  ;;  %v5917_v27 = vmul.f32 %v5906_v22, %v1179_v23  ;;  %v5990_v59 = vpop.permute.xlu0 %5283 }
 0x224   : > { %v5871_v60 = vmul.f32 %v5857_v48, %v1181_v54  ;;  %v5873_v61 = vpop.f32.mrb[5].mxu0  ;;  %v1183_v21 = vmax.f32 %v1171_v17, 0.0  ;;  %v5920_v33 = vmul.f32 %v5865_v57, %v1180_v24  ;;  %v1089_v36 = vadd.f32 %v1088_v56, %v5844_v30  ;;  %v5978_v54 = vpop.permute.xlu1 %5288 }
 0x225   : > { %v1092_v62 = vpop.f32.mrb[6].mxu0  ;;  %v5878_v0 = vmul.f32 %v5865_v57, %v1189_v55  ;;  %v5911_v25 = vmul.f32 %v5906_v22, %v1182_v20  ;;  %v1091_v47 = vadd.f32 %v5873_v61, %v5844_v30  ;;  %v5285_v16 = vunpack.i.l.bf16 %v5990_v59 }
 0x226   : > { %v1218_v63 = vpack.c.bf16 %v5871_v60, %v5868_v58  ;;  %v5880_v6 = vpop.f32.mrb[7].mxu0  ;;  %v5914_v26 = vmul.f32 %v5865_v57, %v1183_v21  ;;  %v1093_v35 = vadd.f32 %v1092_v62, %v5846_v32  ;;  %v1172_v38 = vadd.f32 %v5853_v45, %v1089_v36 }
 0x227   : > { %v1223_v10 = vpack.c.bf16 %v5878_v0, %v5883_v7  ;;  %v1219_v34 = vpack.c.bf16 %v5911_v25, %v5917_v27  ;;  %v1095_v46 = vadd.f32 %v5880_v6, %v5846_v32  ;;  %v1173_v51 = vadd.f32 %v5853_v45, %v1091_v47  ;;  %v5996_v62 = vpop.permute.xlu0 %5293 }
 0x228   : > { %1273 = vrot.lane.b32.xlu0 %v1218_v63, %s8302_s25  ;;  %1250 = vrot.lane.b32.xlu1 %v1218_v63, %s8344_s29  ;;  %v1220_v31 = vpack.c.bf16 %v5914_v26, %v5920_v33  ;;  %v1175_v37 = vadd.f32 %v5859_v49, %v1093_v35  ;;  %v1184_v41 = vmax.f32 %v1172_v38, 0.0  ;;  %v5984_v56 = vpop.permute.xlu1 %5298  ;;  %v5290_v35 = vunpack.i.l.bf16 %v5978_v54 }
 0x229   : > { %v1176_v50 = vadd.f32 %v5859_v49, %v1095_v46  ;;  %v1185_v53 = vmax.f32 %v1173_v51, 0.0 }
 0x22a   : > { %v1187_v39 = vmax.f32 %v1175_v37, 0.0  ;;  %v5952_v43 = vmul.f32 %v5857_v48, %v1184_v41 }
 0x22b   : > { %v1188_v52 = vmax.f32 %v1176_v50, 0.0  ;;  %v5974_v32 = vmul.f32 %v5906_v22, %v1185_v53  ;;  %v6002_v6 = vpop.permute.xlu0 %5303  ;;  %v5301_v53 = vunpack.i.h.bf16 %v5984_v56 }
 0x22c   : > { %1285 = vrot.lane.b32.xlu0 %v1223_v10, %s8302_s25  ;;  %1262 = vrot.lane.b32.xlu1 %v1223_v10, %s8344_s29  ;;  %v5949_v42 = vmul.f32 %v5857_v48, %v1187_v39  ;;  %v5992_v61 = vpop.permute.xlu1 %5308  ;;  %v5295_v39 = vunpack.i.l.bf16 %v5996_v62 }
 0x22d   : > { %v5971_v30 = vmul.f32 %v5906_v22, %v1188_v52 }
 0x22e   : > { %v1221_v44 = vpack.c.bf16 %v5949_v42, %v5952_v43 }
 0x22f   : > { %8352 = vst [vmem:[#allocation16_spill] sm:$0xff] %v5971_v30  ;;  %v1222_v55 = vpack.c.bf16 %v5971_v30, %v5974_v32  ;;  %v5296_v30 = vunpack.i.h.bf16 %v5996_v62  ;;  %v5305_v62 = vunpack.i.l.bf16 %v6002_v6 }
 0x230   : > { %1317 = vrot.lane.b32.xlu0 %v1218_v63, %s8351_s28  ;;  %1296 = vrot.lane.b32.xlu1 %v1218_v63, %s8346_s4 }
 0x234   : > { %1336 = vrot.lane.b32.xlu0 %v1218_v63, %s8343_s17  ;;  %1308 = vrot.lane.b32.xlu1 %v1223_v10, %s8346_s4 }
 0x238   : > { %1348 = vrot.lane.b32.xlu0 %v1223_v10, %s8343_s17  ;;  %1327 = vrot.lane.b32.xlu1 %v1223_v10, %s8351_s28 }
 0x23c   : > { %1382 = vrot.lane.b32.xlu0 %v1218_v63, %s8345_s0  ;;  %1359 = vrot.lane.b32.xlu1 %v1218_v63, %s8348_s24 }
 0x240   : > { %1394 = vrot.lane.b32.xlu0 %v1223_v10, %s8345_s0  ;;  %1371 = vrot.lane.b32.xlu1 %v1223_v10, %s8348_s24 }
 0x244   : > { %1417 = vrot.lane.b32.xlu0 %v1223_v10, %s8349_s23  ;;  %1492 = vrot.lane.b32.xlu1 %v1218_v63, %s8347_s30 }
 0x248   : > { %1504 = vrot.lane.b32.xlu0 %v1223_v10, %s8347_s30  ;;  %1405 = vrot.lane.b32.xlu1 %v1218_v63, %s8349_s23  ;;  %v5998_v63 = vpop.permute.xlu1 %5313 }
 0x24c   : > { %1252 = vrot.lane.b32.xlu0 %v1219_v34, %s8344_s29  ;;  %1254 = vrot.lane.b32.xlu1 %v1220_v31, %s8344_s29  ;;  %v6004_v10 = vpop.permute.xlu1 %5318 }
 0x250   : > { %1277 = vrot.lane.b32.xlu0 %v1220_v31, %s8302_s25  ;;  %1275 = vrot.lane.b32.xlu1 %v1219_v34, %s8302_s25 }
 0x254   : > { %1298 = vrot.lane.b32.xlu0 %v1219_v34, %s8346_s4  ;;  %1300 = vrot.lane.b32.xlu1 %v1220_v31, %s8346_s4 }
 0x258   : > { %1321 = vrot.lane.b32.xlu0 %v1220_v31, %s8351_s28  ;;  %1319 = vrot.lane.b32.xlu1 %v1219_v34, %s8351_s28 }
 0x25c   : > { %1340 = vrot.lane.b32.xlu0 %v1220_v31, %s8343_s17  ;;  %1338 = vrot.lane.b32.xlu1 %v1219_v34, %s8343_s17 }
 0x260   : > { %1361 = vrot.lane.b32.xlu0 %v1219_v34, %s8348_s24  ;;  %1363 = vrot.lane.b32.xlu1 %v1220_v31, %s8348_s24 }
 0x264   : > { %1386 = vrot.lane.b32.xlu0 %v1220_v31, %s8345_s0  ;;  %1384 = vrot.lane.b32.xlu1 %v1219_v34, %s8345_s0 }
 0x268   : > { %1494 = vrot.lane.b32.xlu0 %v1219_v34, %s8347_s30  ;;  %1409 = vrot.lane.b32.xlu1 %v1220_v31, %s8349_s23 }
 0x26c   : > { %1407 = vrot.lane.b32.xlu0 %v1219_v34, %s8349_s23  ;;  %1496 = vrot.lane.b32.xlu1 %v1220_v31, %s8347_s30 }
 0x270   : > { %1281 = vrot.lane.b32.xlu0 %v1221_v44, %s8302_s25  ;;  %1258 = vrot.lane.b32.xlu1 %v1221_v44, %s8344_s29 }
 0x274   : > { %1344 = vrot.lane.b32.xlu0 %v1221_v44, %s8343_s17  ;;  %1304 = vrot.lane.b32.xlu1 %v1221_v44, %s8346_s4 }
 0x278   : > { %1390 = vrot.lane.b32.xlu0 %v1221_v44, %s8345_s0  ;;  %1323 = vrot.lane.b32.xlu1 %v1221_v44, %s8351_s28 }
 0x27c   : > { %1500 = vrot.lane.b32.xlu0 %v1221_v44, %s8347_s30  ;;  %1367 = vrot.lane.b32.xlu1 %v1221_v44, %s8348_s24 }
 0x280   : > { %1413 = vrot.lane.b32.xlu0 %v1221_v44, %s8349_s23  ;;  %1283 = vrot.lane.b32.xlu1 %v1222_v55, %s8302_s25  ;;  %s8356_s25 = smov 126  }
 0x284   : > { %1260 = vrot.lane.b32.xlu0 %v1222_v55, %s8344_s29  ;;  %1346 = vrot.lane.b32.xlu1 %v1222_v55, %s8343_s17 }
 0x288   : > { %1306 = vrot.lane.b32.xlu0 %v1222_v55, %s8346_s4  ;;  %1392 = vrot.lane.b32.xlu1 %v1222_v55, %s8345_s0 }
 0x28c   : > { %1325 = vrot.lane.b32.xlu0 %v1222_v55, %s8351_s28  ;;  %1502 = vrot.lane.b32.xlu1 %v1222_v55, %s8347_s30 }
 0x290   : > { %1369 = vrot.lane.b32.xlu0 %v1222_v55, %s8348_s24  ;;  %1415 = vrot.lane.b32.xlu1 %v1222_v55, %s8349_s23 }
 0x29a   : > { %v1274_v12 = vpop.permute.xlu0 %1273  ;;  %v1251_v13 = vpop.permute.xlu1 %1250 }
 0x29b   : > { %v1265_v19 = vsel %vm816_vm0, %v5285_v16, %v1251_v13  ;;  %v1288_v38 = vsel %vm832_vm1, %v5290_v35, %v1274_v12 }
 0x29e   : > { %v6006_v14 = vpop.permute.xlu0 %1285  ;;  %v6008_v15 = vpop.permute.xlu1 %1262 }
 0x29f   : > { %1520 = vrot.lane.b32.xlu0 %v6008_v15, %s8347_s30 }
 0x2a2   : > { %v1318_v17 = vpop.permute.xlu0 %1317  ;;  %v1297_v18 = vpop.permute.xlu1 %1296 }
 0x2a3   : > { %1554 = vrot.lane.b32.xlu1 %v1318_v17, %s8347_s30  ;;  %1506 = vrot.lane.b32.xlu0 %v1265_v19, %s8347_s30  ;;  %v1311_v46 = vsel %vm848_vm3, %v5295_v39, %v1297_v18 }
 0x2a6   : > { %v6016_v20 = vpop.permute.xlu0 %1336  ;;  %v6018_v21 = vpop.permute.xlu1 %1308 }
 0x2aa   : > { %v6020_v23 = vpop.permute.xlu0 %1348  ;;  %v6022_v24 = vpop.permute.xlu1 %1327 }
 0x2ab   : > { %1568 = vrot.lane.b32.xlu1 %v6022_v24, %s8347_s30  ;;  %v1358_v19 = vsel %vm8307_vm8, %v6020_v23, %v5301_v53 }
 0x2ae   : > { %v6026_v34 = vpop.permute.xlu0 %1382  ;;  %v6028_v31 = vpop.permute.xlu1 %1359 }
 0x2af   : > { %1570 = vrot.lane.b32.xlu1 %v6016_v20, %s8347_s30 }
 0x2b2   : > { %v6033_v36 = vpop.permute.xlu0 %1394  ;;  %v6035_v37 = vpop.permute.xlu1 %1371 }
 0x2b3   : > { %1522 = vrot.lane.b32.xlu1 %v1288_v38, %s8347_s30 }
 0x2b6   : > { %v6040_v41 = vpop.permute.xlu0 %1417  ;;  %v1493_v44 = vpop.permute.xlu1 %1492 }
 0x2b7   : > { %1538 = vrot.lane.b32.xlu1 %v1311_v46, %s8347_s30 }
 0x2ba   : > { %v6044_v47 = vpop.permute.xlu0 %1504  ;;  %v6046_v50 = vpop.permute.xlu1 %1405 }
 0x2be   : > { %v1253_v51 = vpop.permute.xlu0 %1252  ;;  %v1255_v52 = vpop.permute.xlu1 %1254 }
 0x2bf   : > { %1512 = vrot.lane.b32.xlu1 %v1255_v52, %s8347_s30  ;;  %v1267_v39 = vsel %vm816_vm0, %v1253_v51, %v1255_v52  ;;  %v1266_v53 = vsel %vm816_vm0, %v1251_v13, %v1253_v51 }
 0x2c2   : > { %v6050_v55 = vpop.permute.xlu0 %1277  ;;  %v1276_v16 = vpop.permute.xlu1 %1275 }
 0x2c3   : > { %1584 = vrot.lane.b32.xlu1 %v1358_v19, %s8347_s30  ;;  %v1289_v40 = vsel %vm832_vm1, %v1274_v12, %v1276_v16  ;;  %v1290_v12 = vsel %vm832_vm1, %v1276_v16, %v6050_v55  ;;  %v5315_v16 = vunpack.i.l.bf16 %v5998_v63 }
 0x2c6   : > { %v1299_v35 = vpop.permute.xlu0 %1298  ;;  %v6055_v38 = vpop.permute.xlu1 %1300 }
 0x2c7   : > { %1510 = vrot.lane.b32.xlu1 %v1267_v39, %s8347_s30  ;;  %v1312_v19 = vsel %vm848_vm3, %v1297_v18, %v1299_v35  ;;  %v1313_v18 = vsel %vm848_vm3, %v1299_v35, %v6055_v38 }
 0x2ca   : > { %v1322_v46 = vpop.permute.xlu0 %1321  ;;  %v1320_v1 = vpop.permute.xlu1 %1319 }
 0x2cb   : > { %1560 = vrot.lane.b32.xlu0 %v1322_v46, %s8347_s30  ;;  %1524 = vrot.lane.b32.xlu1 %v1289_v40, %s8347_s30  ;;  %v1330_v5 = vsel %vm8308_vm7, %v1318_v17, %v1320_v1 }
 0x2ce   : > { %v1341_v4 = vpop.permute.xlu0 %1340  ;;  %v1339_v3 = vpop.permute.xlu1 %1338 }
 0x2cf   : > { %1508 = vrot.lane.b32.xlu0 %v1266_v53, %s8347_s30  ;;  %1540 = vrot.lane.b32.xlu1 %v1312_v19, %s8347_s30  ;;  %v1354_v51 = vsel %vm8307_vm8, %v1339_v3, %v1341_v4 }
 0x2d2   : > { %v1362_v52 = vpop.permute.xlu0 %1361  ;;  %v6066_v39 = vpop.permute.xlu1 %1363 }
 0x2d3   : > { %1526 = vrot.lane.b32.xlu0 %v1290_v12, %s8347_s30  ;;  %1556 = vrot.lane.b32.xlu1 %v1330_v5, %s8347_s30  ;;  %v1331_v5 = vsel %vm8308_vm7, %v1320_v1, %v1322_v46  ;;  %v1377_v19 = vsel %vm897_vm10, %v1362_v52, %v6066_v39  ;;  %v1634_v12 = vsel %vm1030_vm14, %v5315_v16, %v1493_v44  ;;  %v5300_v46 = vunpack.i.l.bf16 %v5984_v56 }
 0x2d4   : > { %v1353_v1 = vsel %vm8307_vm8, %v6016_v20, %v1339_v3  ;;  %v1376_v16 = vsel %vm897_vm10, %v6028_v31, %v1362_v52 }
 0x2d5   : > { %v1355_v11 = vsel %vm8307_vm8, %v1341_v4, %v5300_v46  ;;  %v5286_v4 = vunpack.i.h.bf16 %v5990_v59  ;;  %v5291_v46 = vunpack.i.h.bf16 %v5978_v54  ;;  %v5316_v54 = vunpack.i.h.bf16 %v5998_v63 }
 0x2d6   : > { %v6073_v40 = vpop.permute.xlu0 %1386  ;;  %v6075_v13 = vpop.permute.xlu1 %1384 }
 0x2d7   : > { %1542 = vrot.lane.b32.xlu0 %v1313_v18, %s8347_s30  ;;  %1574 = vrot.lane.b32.xlu1 %v1354_v51, %s8347_s30 }
 0x2da   : > { %v6083_v17 = vpop.permute.xlu0 %1494  ;;  %v6085_v53 = vpop.permute.xlu1 %1409 }
 0x2db   : > { %1558 = vrot.lane.b32.xlu0 %v1331_v5, %s8347_s30  ;;  %1590 = vrot.lane.b32.xlu1 %v1377_v19, %s8347_s30  ;;  %v1635_v35 = vsel %vm1030_vm14, %v1493_v44, %v6083_v17 }
 0x2dc   : > { %1749 = vmatprep.subr.bf16.mxu0 %v1635_v35 }
 0x2dd   : > { %1750 = vmatpush1.bf16.msra.mxu0 %v1634_v12 }
 0x2de   : > { %v6095_v18 = vpop.permute.xlu0 %1407  ;;  %v6097_v51 = vpop.permute.xlu1 %1496 }
 0x2df   : > { %1572 = vrot.lane.b32.xlu0 %v1353_v1, %s8347_s30 }
 0x2e2   : > { %v1282_v5 = vpop.permute.xlu0 %1281  ;;  %v1259_v19 = vpop.permute.xlu1 %1258 }
 0x2e3   : > { %1576 = vrot.lane.b32.xlu0 %v1355_v11, %s8347_s30  ;;  %v1268_v52 = vsel %vm816_vm0, %v5286_v4, %v1259_v19  ;;  %v1291_v8 = vsel %vm832_vm1, %v5291_v46, %v1282_v5 }
 0x2e6   : > { %v6105_v35 = vpop.permute.xlu0 %1344  ;;  %v1305_v44 = vpop.permute.xlu1 %1304 }
 0x2e7   : > { %1588 = vrot.lane.b32.xlu0 %v1376_v16, %s8347_s30  ;;  %v1314_v4 = vsel %vm848_vm3, %v5296_v30, %v1305_v44 }
 0x2ea   : > { %v6110_v12 = vpop.permute.xlu0 %1390  ;;  %v1324_v3 = vpop.permute.xlu1 %1323 }
 0x2eb   : > { %1562 = vrot.lane.b32.xlu0 %v1324_v3, %s8347_s30 }
 0x2ee   : > { %v1501_v56 = vpop.permute.xlu0 %1500  ;;  %v6113_v20 = vpop.permute.xlu1 %1367 }
 0x2ef   : > { %1578 = vrot.lane.b32.xlu0 %v6105_v35, %s8347_s30  ;;  %v1637_v63 = vsel %vm1030_vm14, %v5316_v54, %v1501_v56 }
 0x2f2   : > { %v6118_v11 = vpop.permute.xlu0 %1413  ;;  %v1284_v1 = vpop.permute.xlu1 %1283 }
 0x2f3   : > { %1514 = vrot.lane.b32.xlu0 %v1268_v52, %s8347_s30  ;;  %v1293_v30 = vsel %vm832_vm1, %v1284_v1, %v6006_v14 }
 0x2f6   : > { %v1261_v16 = vpop.permute.xlu0 %1260  ;;  %v1347_v9 = vpop.permute.xlu1 %1346 }
 0x2f7   : > { %1530 = vrot.lane.b32.xlu0 %v1291_v8, %s8347_s30  ;;  %v1269_v2 = vsel %vm816_vm0, %v1259_v19, %v1261_v16  ;;  %v1270_v8 = vsel %vm816_vm0, %v1261_v16, %v6008_v15  ;;  %v1292_v19 = vsel %vm832_vm1, %v1282_v5, %v1284_v1  ;;  %v1400_v1 = vsel %vm913_vm11, %v6075_v13, %v6073_v40 }
 0x2f8   : > { %1516 = vrot.lane.b32.xlu1 %v1269_v2, %s8347_s30 }
 0x2fa   : > { %v6128_v59 = vpop.permute.xlu1 %1392  ;;  %v1307_v15 = vpop.permute.xlu0 %1306 }
 0x2fb   : > { %1546 = vrot.lane.b32.xlu0 %v1314_v4, %s8347_s30  ;;  %v1316_v46 = vsel %vm848_vm3, %v1307_v15, %v6018_v21 }
 0x2fc   : > { %1586 = vrot.lane.b32.xlu1 %v6028_v31, %s8347_s30  ;;  %v1378_v31 = vsel %vm897_vm10, %v6066_v39, %v5305_v62 }
 0x2fe   : > { %v6135_v52 = vpop.permute.xlu1 %1502  ;;  %v1326_v16 = vpop.permute.xlu0 %1325 }
 0x2ff   : > { %1518 = vrot.lane.b32.xlu0 %v1270_v8, %s8347_s30  ;;  %v1638_v2 = vsel %vm1030_vm14, %v1501_v56, %v6135_v52  ;;  %v5306_v56 = vunpack.i.h.bf16 %v6002_v6  ;;  %v1332_v5 = vsel %vm8308_vm7, %v1324_v3, %v1326_v16  ;;  %v1399_v6 = vsel %vm913_vm11, %v6026_v34, %v6075_v13 }
 0x300   : > { %1751 = vmatprep.subr.bf16.mxu0 %v1638_v2  ;;  %1534 = vrot.lane.b32.xlu1 %v1293_v30, %s8347_s30  ;;  %v1356_v3 = vsel %vm8307_vm8, %v6105_v35, %v1347_v9  ;;  %v5310_v2 = vunpack.i.l.bf16 %v5992_v61  ;;  %v1403_v30 = vsel %vm913_vm11, %v6128_v59, %v6033_v36 }
 0x301   : > { %1752 = vmatpush1.bf16.msra.mxu0 %v1637_v63  ;;  %v1381_v39 = vsel %vm897_vm10, %v6035_v37, %v5306_v56  ;;  %v5321_v56 = vunpack.i.h.bf16 %v6004_v10 }
 0x302   : > { %v1416_v4 = vpop.permute.xlu1 %1415  ;;  %v1370_v8 = vpop.permute.xlu0 %1369 }
 0x303   : > { %1592 = vrot.lane.b32.xlu0 %v1378_v31, %s8347_s30  ;;  %v1379_v35 = vsel %vm897_vm10, %v6113_v20, %v1370_v8  ;;  %v5320_v31 = vunpack.i.l.bf16 %v6004_v10  ;;  %v1437_v10 = vld [vmem:[%s8354_s9 + $0x8] sm:$0xff] }
 0x304   : > { %1528 = vrot.lane.b32.xlu1 %v6050_v55, %s8347_s30  ;;  %v1315_v55 = vsel %vm848_vm3, %v1305_v44, %v1307_v15  ;;  %v1333_v44 = vsel %vm8308_vm7, %v1326_v16, %v6022_v24  ;;  %v1357_v24 = vsel %vm8307_vm8, %v1347_v9, %v6020_v23  ;;  %v1380_v23 = vsel %vm897_vm10, %v1370_v8, %v6035_v37 }
 0x305   : > { %v1427_v16 = vsel %vm8304_vm13, %v6040_v41, %v5321_v56  ;;  %v1636_v8 = vsel %vm1030_vm14, %v6083_v17, %v6097_v51 }
 0x307   : > { %1532 = vrot.lane.b32.xlu0 %v1292_v19, %s8347_s30  ;;  %v1436_v19 = vld [vmem:[%s8354_s9] sm:$0xff] }
 0x308   : > { %1550 = vrot.lane.b32.xlu1 %v1316_v46, %s8347_s30  ;;  %v1426_v46 = vsel %vm8304_vm13, %v1416_v4, %v6040_v41  ;;  %v1439_v41 = vld [vmem:[%s8354_s9 + $0x18] sm:$0xff] }
 0x30b   : > { %1594 = vrot.lane.b32.xlu0 %v6113_v20, %s8347_s30 }
 0x30c   : > { %1600 = vrot.lane.b32.xlu1 %v1381_v39, %s8347_s30 }
 0x30f   : > { %1548 = vrot.lane.b32.xlu0 %v1315_v55, %s8347_s30 }
 0x310   : > { %1564 = vrot.lane.b32.xlu1 %v1332_v5, %s8347_s30 }
 0x313   : > { %1604 = vrot.lane.b32.xlu0 %v1399_v6, %s8347_s30 }
 0x314   : > { %1606 = vrot.lane.b32.xlu1 %v1400_v1, %s8347_s30 }
 0x315   : > { %v6181_v54 = vpop.permute.xlu1 %1554 }
 0x317   : > { %1566 = vrot.lane.b32.xlu0 %v1333_v44, %s8347_s30 }
 0x318   : > { %1580 = vrot.lane.b32.xlu1 %v1356_v3, %s8347_s30 }
 0x31b   : > { %1536 = vrot.lane.b32.xlu0 %v6006_v14, %s8347_s30  ;;  %v1401_v14 = vsel %vm913_vm11, %v6073_v40, %v5310_v2  ;;  %v1402_v40 = vsel %vm913_vm11, %v6110_v12, %v6128_v59  ;;  %v1425_v59 = vsel %vm8304_vm13, %v6118_v11, %v1416_v4 }
 0x31c   : > { %1602 = vrot.lane.b32.xlu1 %v6026_v34, %s8347_s30  ;;  %v5446_v34 = vld [vmem:[%s8353_s8 + $0x4] ss:$12 sps:$4 sm:$0xff]  }
 0x31d   : > { %v6189_v13 = vpop.permute.xlu1 %1568  ;;  %1781 = vmatprep.mubr.bf16.mxu0 %v5446_v34  ;;  %1887 = vmatprep.mubr.bf16.mxu1 %v5446_v34 }
 0x31f   : > { %1582 = vrot.lane.b32.xlu0 %v1357_v24, %s8347_s30 }
 0x320   : > { %1596 = vrot.lane.b32.xlu1 %v1379_v35, %s8347_s30 }
 0x321   : > { %v6201_v9 = vpop.permute.xlu1 %1570 }
 0x323   : > { %1608 = vrot.lane.b32.xlu0 %v1401_v14, %s8347_s30 }
 0x324   : > { %1544 = vrot.lane.b32.xlu1 %v6055_v38, %s8347_s30  ;;  %v5311_v38 = vunpack.i.h.bf16 %v5992_v61  ;;  %v1422_v61 = vsel %vm8304_vm13, %v6046_v50, %v6095_v18 }
 0x325   : > { %v6214_v20 = vpop.permute.xlu1 %1522 }
 0x326   : > { %v1404_v37 = vsel %vm913_vm11, %v6033_v36, %v5311_v38  ;;  %v1423_v36 = vsel %vm8304_vm13, %v6095_v18, %v6085_v53 }
 0x327   : > { %1598 = vrot.lane.b32.xlu0 %v1380_v23, %s8347_s30 }
 0x328   : > { %1612 = vrot.lane.b32.xlu1 %v1402_v40, %s8347_s30 }
 0x329   : > { %v6229_v62 = vpop.permute.xlu1 %1538 }
 0x32b   : > { %1610 = vrot.lane.b32.xlu0 %v6110_v12, %s8347_s30  ;;  %v6231_v12 = vpop.permute.xlu0 %1520 }
 0x32c   : > { %1616 = vrot.lane.b32.xlu1 %v1404_v37, %s8347_s30 }
 0x32f   : > { %1614 = vrot.lane.b32.xlu0 %v1403_v30, %s8347_s30  ;;  %v1507_v15 = vpop.permute.xlu0 %1506 }
 0x330   : > { %1620 = vrot.lane.b32.xlu1 %v1422_v61, %s8347_s30 }
 0x331   : > { %v6237_v63 = vpop.permute.xlu1 %1512 }
 0x333   : > { %1552 = vrot.lane.b32.xlu0 %v6018_v21, %s8347_s30  ;;  %v1424_v21 = vsel %vm8304_vm13, %v6085_v53, %v5320_v31 }
 0x334   : > { %1618 = vrot.lane.b32.xlu1 %v6046_v50, %s8347_s30 }
 0x335   : > { %v6249_v50 = vpop.permute.xlu1 %1584 }
 0x337   : > { %1622 = vrot.lane.b32.xlu0 %v1423_v36, %s8347_s30 }
 0x338   : > { %1628 = vrot.lane.b32.xlu1 %v1425_v59, %s8347_s30 }
 0x339   : > { %v6261_v53 = vpop.permute.xlu1 %1510 }
 0x33b   : > { %1624 = vrot.lane.b32.xlu0 %v1424_v21, %s8347_s30 }
 0x33c   : > { %1626 = vrot.lane.b32.xlu1 %v6118_v11, %s8347_s30  ;;  %v1438_v11 = vld [vmem:[%s8354_s9 + $0x10] sm:$0xff]  ;;  %s756_s9 = scalar_lea.vmem %s8268_s19, %s5180_s26 }
 0x33d   : > { %v1561_v18 = vpop.permute.xlu0 %1560  ;;  %v1525_v4 = vpop.permute.xlu1 %1524 }
 0x33e   : > { %v1646_v56 = vsel %vm1030_vm14, %v6214_v20, %v1525_v4 }
 0x33f   : > { %1630 = vrot.lane.b32.xlu0 %v1426_v46, %s8347_s30 }
 0x340   : > { %1442 = vperm.xlu1 %5281, %v1436_v19  }
 0x341   : > { %v1509_v39 = vpop.permute.xlu0 %1508  ;;  %v1541_v35 = vpop.permute.xlu1 %1540 }
 0x342   : > { %v1641_v55 = vsel %vm1030_vm14, %v1509_v39, %v6261_v53  ;;  %v1640_v5 = vsel %vm1030_vm14, %v1507_v15, %v1509_v39  ;;  %v1652_v20 = vsel %vm1030_vm14, %v6229_v62, %v1541_v35 }
 0x343   : > { %1632 = vrot.lane.b32.xlu0 %v1427_v16, %s8347_s30  ;;  %1753 = vmatprep.subr.bf16.mxu0 %v1641_v55 }
 0x344   : > { %1452 = vperm.xlu1 %5281, %v1438_v11   ;;  %1754 = vmatpush1.bf16.msra.mxu0 %v1640_v5 }
 0x345   : > { %v6275_v6 = vpop.permute.xlu0 %1526  ;;  %v1557_v23 = vpop.permute.xlu1 %1556 }
 0x347   : > { %1447 = vperm.xlu0 %5280, %v1437_v10  }
 0x349   : > { %v6280_v1 = vpop.permute.xlu0 %1542  ;;  %v1575_v40 = vpop.permute.xlu1 %1574 }
 0x34a   : > { %v1653_v5 = vsel %vm1030_vm14, %v1541_v35, %v6280_v1 }
 0x34b   : > { %1457 = vperm.xlu0 %5280, %v1439_v41  }
 0x34d   : > { %v1559_v44 = vpop.permute.xlu0 %1558  ;;  %v6292_v30 = vpop.permute.xlu1 %1590 }
 0x34e   : > { %v1660_v3 = vsel %vm1030_vm14, %v1559_v44, %v1561_v18  ;;  %v1647_v18 = vsel %vm1030_vm14, %v1525_v4, %v6275_v6 }
 0x34f   : > { %4971 = vmatprep.subr.bf16.mxu1 %v1660_v3 }
 0x350   : > { %4972 = vmatpush3.bf16.msra.mxu1 %v1636_v8 }
 0x351   : > { %v6286_v24 = vpop.permute.xlu0 %1572 }
 0x355   : > { %v1577_v2 = vpop.permute.xlu0 %1576 }
 0x359   : > { %v6288_v14 = vpop.permute.xlu0 %1588 }
 0x35d   : > { %v1563_v34 = vpop.permute.xlu0 %1562 }
 0x361   : > { %v6290_v38 = vpop.permute.xlu0 %1578 }
 0x365   : > { %v1515_v37 = vpop.permute.xlu0 %1514 }
 0x369   : > { %v1531_v61 = vpop.permute.xlu0 %1530 }
 0x36a   : > { %v1517_v36 = vpop.permute.xlu1 %1516 }
 0x36b   : > { %v1643_v21 = vsel %vm1030_vm14, %v1515_v37, %v1517_v36 }
 0x36d   : > { %v1547_v59 = vpop.permute.xlu0 %1546 }
 0x36e   : > { %v6294_v17 = vpop.permute.xlu1 %1586 }
 0x371   : > { %v6296_v51 = vpop.permute.xlu0 %1518 }
 0x372   : > { %v6298_v31 = vpop.permute.xlu1 %1534  ;;  %v1644_v15 = vsel %vm1030_vm14, %v1517_v36, %v6296_v51 }
 0x373   : > { %1755 = vmatprep.subr.bf16.mxu0 %v1644_v15 }
 0x374   : > { %1756 = vmatpush1.bf16.msra.mxu0 %v1643_v21  ;;  %v1658_v21 = vsel %vm1030_vm14, %v6181_v54, %v1557_v23  ;;  %v1665_v54 = vsel %vm1030_vm14, %v6286_v24, %v1575_v40 }
 0x375   : > { %v1593_v19 = vpop.permute.xlu0 %1592  ;;  %1757 = vmatprep.subr.bf16.mxu0 %v1647_v18 }
 0x376   : > { %v6305_v46 = vpop.permute.xlu1 %1528 }
 0x378   : > { %1758 = vmatpush1.bf16.msra.mxu0 %v1646_v56 }
 0x379   : > { %v1533_v39 = vpop.permute.xlu0 %1532 }
 0x37a   : > { %v6309_v11 = vpop.permute.xlu1 %1550  ;;  %v1650_v16 = vsel %vm1030_vm14, %v1533_v39, %v6298_v31  ;;  %v1649_v55 = vsel %vm1030_vm14, %v1531_v61, %v1533_v39  ;;  %v1659_v61 = vsel %vm1030_vm14, %v1557_v23, %v1559_v44  ;;  %v1639_v44 = vsel %vm1030_vm14, %v6135_v52, %v6044_v47 }
 0x37b   : > { %1759 = vmatprep.subr.bf16.mxu0 %v1650_v16  ;;  %v1666_v23 = vsel %vm1030_vm14, %v1575_v40, %v1577_v2 }
 0x37c   : > { %1760 = vmatpush1.bf16.msra.mxu0 %v1649_v55 }
 0x37d   : > { %v6316_v10 = vpop.permute.xlu0 %1594  ;;  %1761 = vmatprep.subr.bf16.mxu0 %v1653_v5 }
 0x37e   : > { %v1601_v41 = vpop.permute.xlu1 %1600 }
 0x380   : > { %1762 = vmatpush1.bf16.msra.mxu0 %v1652_v20 }
 0x381   : > { %v1549_v4 = vpop.permute.xlu0 %1548 }
 0x382   : > { %v1565_v3 = vpop.permute.xlu1 %1564  ;;  %v1656_v8 = vsel %vm1030_vm14, %v1549_v4, %v6309_v11  ;;  %v1655_v37 = vsel %vm1030_vm14, %v1547_v59, %v1549_v4 }
 0x383   : > { %1763 = vmatprep.subr.bf16.mxu0 %v1656_v8  ;;  %v1661_v59 = vsel %vm1030_vm14, %v1563_v34, %v1565_v3  ;;  %v1642_v34 = vsel %vm1030_vm14, %v6261_v53, %v6237_v63  ;;  %v1671_v63 = vsel %vm1030_vm14, %v6288_v14, %v6292_v30  ;;  %v1672_v53 = vsel %vm1030_vm14, %v6292_v30, %v1593_v19 }
 0x384   : > { %1764 = vmatpush1.bf16.msra.mxu0 %v1655_v37 }
 0x385   : > { %v1605_v36 = vpop.permute.xlu0 %1604  ;;  %1765 = vmatprep.subr.bf16.mxu0 %v1659_v61 }
 0x386   : > { %v1607_v15 = vpop.permute.xlu1 %1606 }
 0x388   : > { %1766 = vmatpush1.bf16.msra.mxu0 %v1658_v21 }
 0x389   : > { %v1567_v62 = vpop.permute.xlu0 %1566 }
 0x38a   : > { %v1581_v35 = vpop.permute.xlu1 %1580  ;;  %v1662_v18 = vsel %vm1030_vm14, %v1565_v3, %v1567_v62  ;;  %v1663_v56 = vsel %vm1030_vm14, %v1567_v62, %v6189_v13  ;;  %v1664_v13 = vsel %vm1030_vm14, %v6201_v9, %v6286_v24  ;;  %v1645_v9 = vsel %vm1030_vm14, %v6296_v51, %v6231_v12 }
 0x38b   : > { %1767 = vmatprep.subr.bf16.mxu0 %v1662_v18  ;;  %4973 = vmatprep.subr.bf16.mxu1 %v1663_v56  ;;  %v1667_v40 = vsel %vm1030_vm14, %v6290_v38, %v1581_v35  ;;  %v1670_v38 = vsel %vm1030_vm14, %v6294_v17, %v6288_v14  ;;  %v1648_v12 = vsel %vm1030_vm14, %v6275_v6, %v6305_v46 }
 0x38c   : > { %1768 = vmatpush1.bf16.msra.mxu0 %v1661_v59  ;;  %4974 = vmatpush3.bf16.msra.mxu1 %v1639_v44  ;;  %v1677_v6 = vsel %vm1030_vm14, %v1605_v36, %v1607_v15  ;;  %v5449_v44 = vld [vmem:[%s8353_s8 + $0x18] ss:$12 sps:$4 sm:$0xff]  }
 0x38d   : > { %v1537_v39 = vpop.permute.xlu0 %1536  ;;  %1769 = vmatprep.subr.bf16.mxu0 %v1665_v54  ;;  %4975 = vmatprep.subr.bf16.mxu1 %v1666_v23 }
 0x38e   : > { %v1603_v16 = vpop.permute.xlu1 %1602  ;;  %v1651_v19 = vsel %vm1030_vm14, %v6298_v31, %v1537_v39  ;;  %v8355_v39 = vmov 0  }
 0x38f   : > { %5323 = vrot.lane.b32.xlu0 %v8355_v39, %s8344_s29  ;;  %5328 = vrot.lane.b32.xlu1 %v8355_v39, %s8356_s25 }
 0x390   : > { %1770 = vmatpush1.bf16.msra.mxu0 %v1664_v13  ;;  %4976 = vmatpush3.bf16.msra.mxu1 %v1642_v34  ;;  %v5450_v13 = vld [vmem:[%s8353_s8 + $0x8] ss:$12 sps:$4 sm:$0xff]  }
 0x391   : > { %v1583_v47 = vpop.permute.xlu0 %1582 }
 0x392   : > { %v1597_v52 = vpop.permute.xlu1 %1596  ;;  %v1668_v55 = vsel %vm1030_vm14, %v1581_v35, %v1583_v47  ;;  %v1669_v2 = vsel %vm1030_vm14, %v1583_v47, %v6249_v50 }
 0x393   : > { %1771 = vmatprep.subr.bf16.mxu0 %v1668_v55  ;;  %4977 = vmatprep.subr.bf16.mxu1 %v1669_v2  ;;  %v1673_v14 = vsel %vm1030_vm14, %v6316_v10, %v1597_v52  ;;  %v5451_v2 = vld [vmem:[%s8353_s8 + $0x20] ss:$12 sps:$4 sm:$0xff]  }
 0x394   : > { %1772 = vmatpush1.bf16.msra.mxu0 %v1667_v40  ;;  %4978 = vmatpush3.bf16.msra.mxu1 %v1645_v9 }
 0x395   : > { %v1609_v24 = vpop.permute.xlu0 %1608  ;;  %1773 = vmatprep.subr.bf16.mxu0 %v1671_v63  ;;  %4979 = vmatprep.subr.bf16.mxu1 %v1672_v53 }
 0x396   : > { %v1545_v50 = vpop.permute.xlu1 %1544  ;;  %v1678_v17 = vsel %vm1030_vm14, %v1607_v15, %v1609_v24  ;;  %v5444_v15 = vld [vmem:[%s8353_s8] ss:$12 sps:$4 sm:$0xff]   ;;  %5333 = vrot.lane.b32.xlu0 %v8355_v39, %s8346_s4  ;;  %5343 = vrot.lane.b32.xlu1 %v8355_v39, %s8348_s24 }
 0x397   : > { %v1654_v31 = vsel %vm1030_vm14, %v6280_v1, %v1545_v50  ;;  %v5447_v1 = vld [vmem:[%s8353_s8 + $0x1c] ss:$12 sps:$4 sm:$0xff]   ;;  %s737_s8 = scalar_lea.vmem %s8364_s7, %s5655_s22  ;;  %s8382_s7 = sld [smem:[#allocation22_spill]] }
 0x398   : > { %1774 = vmatpush1.bf16.msra.mxu0 %v1670_v38  ;;  %4980 = vmatpush3.bf16.msra.mxu1 %v1648_v12 }
 0x399   : > { %v1599_v51 = vpop.permute.xlu0 %1598 }
 0x39a   : > { %v1613_v5 = vpop.permute.xlu1 %1612  ;;  %v1674_v20 = vsel %vm1030_vm14, %v1597_v52, %v1599_v51  ;;  %v1675_v30 = vsel %vm1030_vm14, %v1599_v51, %v1601_v41  ;;  %v1676_v41 = vsel %vm1030_vm14, %v1603_v16, %v1605_v36  ;;  %5338 = vrot.lane.b32.xlu0 %v8355_v39, %s8343_s17  ;;  %5353 = vrot.lane.b32.xlu1 %v8355_v39, %s8345_s0 }
 0x39b   : > { %1775 = vmatprep.subr.bf16.mxu0 %v1674_v20  ;;  %4981 = vmatprep.subr.bf16.mxu1 %v1675_v30 }
 0x39c   : > { %1776 = vmatpush1.bf16.msra.mxu0 %v1673_v14  ;;  %4982 = vmatpush3.bf16.msra.mxu1 %v1651_v19 }
 0x39d   : > { %v1611_v46 = vpop.permute.xlu0 %1610  ;;  %1777 = vmatprep.subr.bf16.mxu0 %v1677_v6  ;;  %4983 = vmatprep.subr.bf16.mxu1 %v1678_v17 }
 0x39e   : > { %v1617_v4 = vpop.permute.xlu1 %1616  ;;  %v1679_v61 = vsel %vm1030_vm14, %v1611_v46, %v1613_v5  ;;  %5348 = vrot.lane.b32.xlu0 %v8355_v39, %s8347_s30 }
 0x3a0   : > { %1778 = vmatpush1.bf16.msra.mxu0 %v1676_v41  ;;  %4984 = vmatpush3.bf16.msra.mxu1 %v1654_v31 }
 0x3a1   : > { %v1615_v3 = vpop.permute.xlu0 %1614 }
 0x3a2   : > { %v1621_v8 = vpop.permute.xlu1 %1620  ;;  %v1680_v10 = vsel %vm1030_vm14, %v1613_v5, %v1615_v3  ;;  %v1681_v37 = vsel %vm1030_vm14, %v1615_v3, %v1617_v4  ;;  %5358 = vrot.lane.b32.xlu0 %v8355_v39, %s8349_s23 }
 0x3a3   : > { %1779 = vmatprep.subr.bf16.mxu0 %v1680_v10  ;;  %4985 = vmatprep.subr.bf16.mxu1 %v1681_v37 }
 0x3a4   : > { %1780 = vmatpush1.bf16.msra.mxu0 %v1679_v61 }
 0x3a5   : > { %v1553_v36 = vpop.permute.xlu0 %1552 }
 0x3a6   : > { %v1657_v21 = vsel %vm1030_vm14, %v6309_v11, %v1553_v36  ;;  %v1619_v62 = vpop.permute.xlu1 %1618 }
 0x3a7   : > { %1782 = vmatmul.mubr.bf16.vlgmr.msra.gmra.mrb[8].mxu0 %v5444_v15  ;;  %4986 = vmatpush3.bf16.msra.mxu1 %v1657_v21  ;;  %v1682_v59 = vsel %vm1030_vm14, %v1619_v62, %v1621_v8 }
 0x3a8   : > { %1791 = vmatprep.mubr.bf16.mxu0 %v5447_v1 }
 0x3a9   : > { %v1623_v35 = vpop.permute.xlu0 %1622 }
 0x3aa   : > { %1888 = vmatmul.mubr.bf16.vlgmr.msra.gmra.mrb[4].mxu1 %v5444_v15  ;;  %v1629_v18 = vpop.permute.xlu1 %1628  ;;  %v1683_v56 = vsel %vm1030_vm14, %v1621_v8, %v1623_v35 }
 0x3ab   : > { %1802 = vmatprep.subr.bf16.mxu0 %v1683_v56  ;;  %1895 = vmatprep.mubr.bf16.mxu1 %v5447_v1 }
 0x3ac   : > { %1803 = vmatpush1.bf16.msra.mxu0 %v1682_v59 }
 0x3ad   : > { %v1625_v54 = vpop.permute.xlu0 %1624 }
 0x3ae   : > { %v1684_v11 = vsel %vm1030_vm14, %v1623_v35, %v1625_v54  ;;  %v1627_v23 = vpop.permute.xlu1 %1626 }
 0x3af   : > { %1792 = vmatmul.mubr.bf16.gmra.mrb[12].mxu0 %v5449_v44  ;;  %5095 = vmatprep.subr.bf16.mxu1 %v1684_v11  ;;  %v1685_v47 = vsel %vm1030_vm14, %v1627_v23, %v1629_v18 }
 0x3b0   : > { %5096 = vmatpush3.bf16.msra.mxu1 %v1684_v11  ;;  %1834 = vmatprep.mubr.bf16.mxu0 %v8355_v39 }
 0x3b1   : > { %v1631_v16 = vpop.permute.xlu0 %1630 }
 0x3b2   : > { %1896 = vmatmul.mubr.bf16.gmra.mrb[8].mxu1 %v5449_v44  ;;  %v1686_v34 = vsel %vm1030_vm14, %v1629_v18, %v1631_v16 }
 0x3b3   : > { %1804 = vmatprep.subr.bf16.mxu0 %v1686_v34  ;;  %5099 = vmatprep.mubr.msk.bf16.mxu1 %vm1742_vm15, %v5450_v13 }
 0x3b4   : > { %1805 = vmatpush1.bf16.msra.mxu0 %v1685_v47 }
 0x3b5   : > { %v1633_v52 = vpop.permute.xlu0 %1632 }
 0x3b6   : > { %v1687_v55 = vsel %vm1030_vm14, %v1631_v16, %v1633_v52 }
 0x3b7   : > { %4935 = vmatmul.mubr.msk.bf16.vlgmr.msra.gmra.mrb[8].mxu0 %vm1742_vm15, %v5450_v13  ;;  %5097 = vmatprep.subr.bf16.mxu1 %v1687_v55 }
 0x3b8   : > { %5098 = vmatpush3.bf16.msra.mxu1 %v1687_v55  ;;  %1844 = vmatprep.mubr.bf16.mxu0 %v8355_v39 }
 0x3bb   : > { %5100 = vmatmul.mubr.msk.bf16.vlgmr.msra.gmra.mrb[12].mxu1 %vm1742_vm15, %v5451_v2 }
 0x3bf   : > { %4936 = vmatmul.mubr.msk.bf16.gmra.mrb[12].mxu0 %vm1742_vm15, %v5451_v2  ;;  %v1443_v12 = vpop.permute.xlu1 %1442 }
 0x3c3   : > { %v1453_v4 = vpop.permute.xlu1 %1452 }
 0x3c6   : > { %v1448_v30 = vpop.permute.xlu0 %1447 }
 0x3ca   : > { %v1458_v61 = vpop.permute.xlu0 %1457 }
 0x47d   : > { %v4987_v40 = vpop.f32.mrb[4].mxu1 }
 0x47e   : > { %v4988_v9 = vpop.f32.mrb[5].mxu1 }
 0x47f   : > { %v4989_v63 = vadd.f32 %v4988_v9, %v4987_v40  ;;  %v4990_v53 = vpop.f32.mrb[6].mxu1 }
 0x480   : > { %v4991_v24 = vpop.f32.mrb[7].mxu1 }
 0x481   : > { %v4992_v50 = vadd.f32 %v4991_v24, %v4990_v53  ;;  %v1890_v21 = vadd.f32 %v4989_v63, %v1443_v12 }
 0x483   : > { %v1893_v16 = vadd.f32 %v4992_v50, %v1448_v30 }
 0x485   : > { %v4993_v38 = vpop.f32.mrb[8].mxu1 }
 0x486   : > { %v4994_v51 = vpop.f32.mrb[9].mxu1 }
 0x487   : > { %v4995_v5 = vadd.f32 %v4994_v51, %v4993_v38  ;;  %v4996_v20 = vpop.f32.mrb[10].mxu1 }
 0x488   : > { %v4997_v19 = vpop.f32.mrb[11].mxu1 }
 0x489   : > { %v4998_v14 = vadd.f32 %v4997_v19, %v4996_v20  ;;  %v1898_v37 = vadd.f32 %v4995_v5, %v1453_v4 }
 0x48a   : > { %v1836_v6 = vpop.f32.mrb[8].mxu0 }
 0x48b   : > { %v5135_v17 = vadd.f32 %v1836_v6, %v1443_v12  ;;  %v1838_v46 = vpop.f32.mrb[9].mxu0  ;;  %v1901_v59 = vadd.f32 %v4998_v14, %v1458_v61 }
 0x48c   : > { %v5136_v41 = vadd.f32 %v1838_v46, %v1443_v12  ;;  %v1840_v31 = vpop.f32.mrb[10].mxu0 }
 0x48d   : > { %v1953_v3 = vadd.f32 %v5135_v17, %v5840_v28  ;;  %v5137_v8 = vadd.f32 %v1840_v31, %v1448_v30  ;;  %v1842_v10 = vpop.f32.mrb[11].mxu0 }
 0x48e   : > { %v1954_v15 = vadd.f32 %v5136_v41, %v5840_v28  ;;  %v5138_v1 = vadd.f32 %v1842_v10, %v1448_v30  ;;  %v5101_v36 = vpop.f32.mrb[12].mxu1 }
 0x48f   : > { %v1965_v62 = vmax.f32 %v1953_v3, 0.0  ;;  %v1956_v35 = vadd.f32 %v5137_v8, %v5842_v29  ;;  %v1947_v18 = vadd.f32 %v5101_v36, %v1898_v37  ;;  %v1938_v56 = vpop.f32.mrb[13].mxu1 }
 0x490   : > { %v1966_v44 = vmax.f32 %v1954_v15, 0.0  ;;  %v1957_v54 = vadd.f32 %v5138_v1, %v5842_v29  ;;  %v1939_v11 = vadd.f32 %v1938_v56, %v1890_v21  ;;  %v5102_v23 = vpop.f32.mrb[14].mxu1 }
 0x491   : > { %v1977_v13 = vmul.f32 %v1965_v62, %v5857_v48  ;;  %v1968_v34 = vmax.f32 %v1956_v35, 0.0  ;;  %v1961_v47 = vadd.f32 %v1947_v18, %v5853_v45  ;;  %v1950_v52 = vadd.f32 %v5102_v23, %v1901_v59  ;;  %v1941_v55 = vpop.f32.mrb[15].mxu1 }
 0x492   : > { %v1978_v2 = vmul.f32 %v1966_v44, %v5906_v22  ;;  %v1969_v40 = vmax.f32 %v1957_v54, 0.0  ;;  %v1955_v9 = vadd.f32 %v1939_v11, %v5840_v28  ;;  %v1942_v63 = vadd.f32 %v1941_v55, %v1893_v16  ;;  %v1846_v53 = vpop.f32.mrb[12].mxu0  ;;  %v8357_v16 = vld [vmem:[#allocation16_spill] sm:$0xff] }
 0x493   : > { %v1989_v24 = vadd.f32 %v1977_v13, %v5868_v58  ;;  %v1980_v38 = vmul.f32 %v1968_v34, %v5857_v48  ;;  %v1973_v12 = vmax.f32 %v1961_v47, 0.0  ;;  %v1964_v50 = vadd.f32 %v1950_v52, %v5859_v49  ;;  %v1848_v51 = vpop.f32.mrb[13].mxu0  ;;  %v6521_v52 = vpop.permute.xlu1 %5328 }
 0x494   : > { %v1990_v5 = vadd.f32 %v1978_v2, %v5917_v27  ;;  %v1981_v20 = vmul.f32 %v1969_v40, %v5906_v22  ;;  %v1967_v30 = vmax.f32 %v1955_v9, 0.0  ;;  %v1958_v19 = vadd.f32 %v1942_v63, %v5842_v29  ;;  %v1850_v14 = vpop.f32.mrb[14].mxu0 }
 0x495   : > { %v1992_v28 = vadd.f32 %v1980_v38, %v5871_v60  ;;  %v1985_v6 = vmul.f32 %v1973_v12, %v5865_v57  ;;  %v1976_v17 = vmax.f32 %v1964_v50, 0.0  ;;  %v5139_v58 = vadd.f32 %v1846_v53, %v1453_v4  ;;  %v1852_v46 = vpop.f32.mrb[15].mxu0 }
 0x496   : > { %v1993_v41 = vadd.f32 %v1981_v20, %v5911_v25  ;;  %v1979_v31 = vmul.f32 %v1967_v30, %v5865_v57  ;;  %v1970_v3 = vmax.f32 %v1958_v19, 0.0  ;;  %v5140_v8 = vadd.f32 %v1848_v51, %v1453_v4 }
 0x497   : > { %v2001_v27 = vpack.c.bf16 %v1992_v28, %v1989_v24  ;;  %v1988_v10 = vmul.f32 %v1976_v17, %v5865_v57  ;;  %v1959_v37 = vadd.f32 %v5139_v58, %v5853_v45  ;;  %v1997_v60 = vadd.f32 %v1985_v6, %v5883_v7  ;;  %v6527_v2 = vpop.permute.xlu1 %5343 }
 0x498   : > { %v6440_v29 = vpack.c.bf16 %v1993_v41, %v1990_v5  ;;  %v1982_v15 = vmul.f32 %v1970_v3, %v5865_v57  ;;  %v1960_v1 = vadd.f32 %v5140_v8, %v5853_v45  ;;  %v5141_v21 = vadd.f32 %v1850_v14, %v1458_v61 }
 0x499   : > { %v2000_v36 = vadd.f32 %v1988_v10, %v5878_v0  ;;  %v1971_v25 = vmax.f32 %v1959_v37, 0.0  ;;  %v5142_v62 = vadd.f32 %v1852_v46, %v1458_v61  ;;  %v1991_v4 = vadd.f32 %v1979_v31, %v5920_v33 }
 0x49a   : > { %v1994_v35 = vadd.f32 %v1982_v15, %v5914_v26  ;;  %v1972_v18 = vmax.f32 %v1960_v1, 0.0  ;;  %v1962_v59 = vadd.f32 %v5141_v21, %v5859_v49 }
 0x49b   : > { %v2006_v56 = vpack.c.bf16 %v2000_v36, %v1997_v60  ;;  %v1963_v44 = vadd.f32 %v5142_v62, %v5859_v49  ;;  %v1983_v54 = vmul.f32 %v1971_v25, %v5857_v48  ;;  %v6533_v9 = vpop.permute.xlu1 %5353 }
 0x49c   : > { %v2003_v7 = vpack.c.bf16 %v1994_v35, %v1991_v4  ;;  %v1984_v45 = vmul.f32 %v1972_v18, %v5906_v22  ;;  %v1974_v11 = vmax.f32 %v1962_v59, 0.0 }
 0x49d   : > { %v1975_v0 = vmax.f32 %v1963_v44, 0.0  ;;  %2067 = vrot.lane.b32.xlu0 %v2006_v56, %s8356_s25  ;;  %2045 = vrot.lane.b32.xlu1 %v2006_v56, %s8344_s29  ;;  %v1995_v61 = vadd.f32 %v1983_v54, %v5952_v43 }
 0x49e   : > { %v1986_v33 = vmul.f32 %v1974_v11, %v5857_v48  ;;  %v1996_v23 = vadd.f32 %v1984_v45, %v5974_v32 }
 0x49f   : > { %v1987_v26 = vmul.f32 %v1975_v0, %v5906_v22 }
 0x4a0   : > { %v1998_v49 = vadd.f32 %v1986_v33, %v5949_v42  ;;  %v6511_v42 = vpop.permute.xlu0 %5323 }
 0x4a1   : > { %v1999_v13 = vadd.f32 %v1987_v26, %v8357_v16  ;;  %2149 = vrot.lane.b32.xlu0 %v2006_v56, %s8348_s24  ;;  %2089 = vrot.lane.b32.xlu1 %v2006_v56, %s8346_s4  ;;  %v5325_v21 = vunpack.i.l.bf16 %v6511_v42 }
 0x4a2   : > { %v2004_v34 = vpack.c.bf16 %v1998_v49, %v1995_v61 }
 0x4a3   : > { %v2005_v47 = vpack.c.bf16 %v1999_v13, %v1996_v23 }
 0x4a4   : > { %v6515_v43 = vpop.permute.xlu0 %5333 }
 0x4a5   : > { %2059 = vrot.lane.b32.xlu0 %v2003_v7, %s8356_s25  ;;  %2107 = vrot.lane.b32.xlu1 %v2006_v56, %s8351_s28  ;;  %v5335_v45 = vunpack.i.l.bf16 %v6515_v43 }
 0x4a8   : > { %v5339_v32 = vpop.permute.xlu0 %5338 }
 0x4a9   : > { %2101 = vrot.lane.b32.xlu0 %v2003_v7, %s8351_s28  ;;  %2127 = vrot.lane.b32.xlu1 %v2006_v56, %s8343_s17  ;;  %v5340_v20 = vunpack.i.l.bf16 %v5339_v32  ;;  %v5341_v31 = vunpack.i.h.bf16 %v5339_v32 }
 0x4ac   : > { %v6525_v55 = vpop.permute.xlu0 %5348 }
 0x4ad   : > { %2119 = vrot.lane.b32.xlu0 %v2003_v7, %s8343_s17  ;;  %2171 = vrot.lane.b32.xlu1 %v2006_v56, %s8345_s0  ;;  %v5350_v61 = vunpack.i.l.bf16 %v6525_v55 }
 0x4b0   : > { %v6531_v40 = vpop.permute.xlu0 %5358 }
 0x4b1   : > { %2163 = vrot.lane.b32.xlu0 %v2003_v7, %s8345_s0  ;;  %2193 = vrot.lane.b32.xlu1 %v2006_v56, %s8349_s23 }
 0x4b5   : > { %2185 = vrot.lane.b32.xlu0 %v2003_v7, %s8349_s23  ;;  %2250 = vrot.lane.b32.xlu1 %v2006_v56, %s8347_s30  ;;  %v5330_v56 = vunpack.i.l.bf16 %v6521_v52 }
 0x4b9   : > { %2242 = vrot.lane.b32.xlu0 %v2003_v7, %s8347_s30  ;;  %2037 = vrot.lane.b32.xlu1 %v2003_v7, %s8344_s29 }
 0x4bd   : > { %2055 = vrot.lane.b32.xlu0 %v2001_v27, %s8356_s25  ;;  %2081 = vrot.lane.b32.xlu1 %v2003_v7, %s8346_s4 }
 0x4c1   : > { %2097 = vrot.lane.b32.xlu0 %v2001_v27, %s8351_s28  ;;  %2141 = vrot.lane.b32.xlu1 %v2003_v7, %s8348_s24 }
 0x4c5   : > { %2115 = vrot.lane.b32.xlu0 %v2001_v27, %s8343_s17  ;;  %2033 = vrot.lane.b32.xlu1 %v2001_v27, %s8344_s29 }
 0x4c9   : > { %2159 = vrot.lane.b32.xlu0 %v2001_v27, %s8345_s0  ;;  %2077 = vrot.lane.b32.xlu1 %v2001_v27, %s8346_s4 }
 0x4cd   : > { %2181 = vrot.lane.b32.xlu0 %v2001_v27, %s8349_s23  ;;  %2137 = vrot.lane.b32.xlu1 %v2001_v27, %s8348_s24 }
 0x4d1   : > { %2035 = vrot.lane.b32.xlu0 %v6440_v29, %s8344_s29  ;;  %2238 = vrot.lane.b32.xlu1 %v2001_v27, %s8347_s30 }
 0x4d5   : > { %2079 = vrot.lane.b32.xlu0 %v6440_v29, %s8346_s4  ;;  %2057 = vrot.lane.b32.xlu1 %v6440_v29, %s8356_s25 }
 0x4d9   : > { %2139 = vrot.lane.b32.xlu0 %v6440_v29, %s8348_s24  ;;  %2099 = vrot.lane.b32.xlu1 %v6440_v29, %s8351_s28 }
 0x4dd   : > { %2240 = vrot.lane.b32.xlu0 %v6440_v29, %s8347_s30  ;;  %2117 = vrot.lane.b32.xlu1 %v6440_v29, %s8343_s17 }
 0x4e1   : > { %2063 = vrot.lane.b32.xlu0 %v2004_v34, %s8356_s25  ;;  %2161 = vrot.lane.b32.xlu1 %v6440_v29, %s8345_s0 }
 0x4e5   : > { %2145 = vrot.lane.b32.xlu0 %v2004_v34, %s8348_s24  ;;  %2183 = vrot.lane.b32.xlu1 %v6440_v29, %s8349_s23 }
 0x4e9   : > { %2246 = vrot.lane.b32.xlu0 %v2004_v34, %s8347_s30  ;;  %2041 = vrot.lane.b32.xlu1 %v2004_v34, %s8344_s29 }
 0x4ed   : > { %2043 = vrot.lane.b32.xlu0 %v2005_v47, %s8344_s29  ;;  %2085 = vrot.lane.b32.xlu1 %v2004_v34, %s8346_s4 }
 0x4f1   : > { %2087 = vrot.lane.b32.xlu0 %v2005_v47, %s8346_s4  ;;  %2103 = vrot.lane.b32.xlu1 %v2004_v34, %s8351_s28 }
 0x4f5   : > { %2105 = vrot.lane.b32.xlu0 %v2005_v47, %s8351_s28  ;;  %2123 = vrot.lane.b32.xlu1 %v2004_v34, %s8343_s17 }
 0x4f9   : > { %2125 = vrot.lane.b32.xlu0 %v2005_v47, %s8343_s17  ;;  %2167 = vrot.lane.b32.xlu1 %v2004_v34, %s8345_s0 }
 0x4fd   : > { %2169 = vrot.lane.b32.xlu0 %v2005_v47, %s8345_s0  ;;  %2189 = vrot.lane.b32.xlu1 %v2004_v34, %s8349_s23 }
 0x501   : > { %2191 = vrot.lane.b32.xlu0 %v2005_v47, %s8349_s23  ;;  %2065 = vrot.lane.b32.xlu1 %v2005_v47, %s8356_s25 }
 0x505   : > { %2147 = vrot.lane.b32.xlu1 %v2005_v47, %s8348_s24 }
 0x509   : > { %2248 = vrot.lane.b32.xlu1 %v2005_v47, %s8347_s30 }
 0x50f   : > { %v6535_v63 = vpop.permute.xlu0 %2067  ;;  %v6537_v53 = vpop.permute.xlu1 %2045 }
 0x510   : > { %2266 = vrot.lane.b32.xlu1 %v6537_v53, %s8347_s30 }
 0x513   : > { %v6541_v24 = vpop.permute.xlu0 %2149  ;;  %v6543_v38 = vpop.permute.xlu1 %2089 }
 0x517   : > { %v6545_v12 = vpop.permute.xlu0 %2059  ;;  %v6547_v50 = vpop.permute.xlu1 %2107 }
 0x518   : > { %2314 = vrot.lane.b32.xlu0 %v6547_v50, %s8347_s30 }
 0x51b   : > { %v2102_v51 = vpop.permute.xlu0 %2101  ;;  %v6551_v5 = vpop.permute.xlu1 %2127 }
 0x51c   : > { %2306 = vrot.lane.b32.xlu1 %v2102_v51, %s8347_s30  ;;  %v2136_v27 = vsel %vm8307_vm8, %v6551_v5, %v5341_v31 }
 0x51f   : > { %v6554_v30 = vpop.permute.xlu0 %2119  ;;  %v6556_v19 = vpop.permute.xlu1 %2171 }
 0x520   : > { %v2133_v14 = vsel %vm8307_vm8, %v6554_v30, %v5340_v20 }
 0x521   : > { %2322 = vrot.lane.b32.xlu1 %v2133_v14, %s8347_s30 }
 0x523   : > { %v6561_v28 = vpop.permute.xlu0 %2163  ;;  %v6563_v6 = vpop.permute.xlu1 %2193 }
 0x527   : > { %v6565_v17 = vpop.permute.xlu0 %2185  ;;  %v6567_v58 = vpop.permute.xlu1 %2250 }
 0x52b   : > { %v6569_v46 = vpop.permute.xlu0 %2242  ;;  %v2038_v41 = vpop.permute.xlu1 %2037 }
 0x52c   : > { %2258 = vrot.lane.b32.xlu0 %v2038_v41, %s8347_s30 }
 0x52f   : > { %v2056_v3 = vpop.permute.xlu0 %2055  ;;  %v6572_v8 = vpop.permute.xlu1 %2081 }
 0x530   : > { %2330 = vrot.lane.b32.xlu0 %v2136_v27, %s8347_s30  ;;  %v2069_v7 = vsel %vm832_vm1, %v5330_v56, %v2056_v3 }
 0x533   : > { %v2098_v10 = vpop.permute.xlu0 %2097  ;;  %v6577_v37 = vpop.permute.xlu1 %2141 }
 0x534   : > { %2300 = vrot.lane.b32.xlu1 %v2098_v10, %s8347_s30 }
 0x537   : > { %v2116_v29 = vpop.permute.xlu0 %2115  ;;  %v2034_v60 = vpop.permute.xlu1 %2033 }
 0x538   : > { %2316 = vrot.lane.b32.xlu1 %v2116_v29, %s8347_s30  ;;  %v2047_v35 = vsel %vm816_vm0, %v5325_v21, %v2034_v60 }
 0x53b   : > { %v6581_v15 = vpop.permute.xlu0 %2159  ;;  %v2078_v1 = vpop.permute.xlu1 %2077 }
 0x53c   : > { %v2091_v33 = vsel %vm848_vm3, %v5335_v45, %v2078_v1 }
 0x53f   : > { %v6583_v36 = vpop.permute.xlu0 %2181  ;;  %v2138_v25 = vpop.permute.xlu1 %2137 }
 0x540   : > { %2332 = vrot.lane.b32.xlu1 %v2138_v25, %s8347_s30 }
 0x543   : > { %v2036_v62 = vpop.permute.xlu0 %2035  ;;  %v2239_v4 = vpop.permute.xlu1 %2238 }
 0x544   : > { %2252 = vrot.lane.b32.xlu1 %v2047_v35, %s8347_s30  ;;  %v2048_v18 = vsel %vm816_vm0, %v2034_v60, %v2036_v62  ;;  %v2049_v16 = vsel %vm816_vm0, %v2036_v62, %v2038_v41  ;;  %v2380_v47 = vsel %vm1030_vm14, %v5350_v61, %v2239_v4  ;;  %v5351_v61 = vunpack.i.h.bf16 %v6525_v55 }
 0x545   : > { %2254 = vrot.lane.b32.xlu0 %v2048_v18, %s8347_s30 }
 0x547   : > { %v2080_v59 = vpop.permute.xlu0 %2079  ;;  %v2058_v44 = vpop.permute.xlu1 %2057 }
 0x548   : > { %2268 = vrot.lane.b32.xlu1 %v2069_v7, %s8347_s30  ;;  %v2071_v54 = vsel %vm832_vm1, %v2058_v44, %v6545_v12  ;;  %v2093_v26 = vsel %vm848_vm3, %v2080_v59, %v6572_v8  ;;  %v2070_v14 = vsel %vm832_vm1, %v2056_v3, %v2058_v44  ;;  %v2092_v31 = vsel %vm848_vm3, %v2078_v1, %v2080_v59 }
 0x549   : > { %2272 = vrot.lane.b32.xlu0 %v2071_v54, %s8347_s30  ;;  %v5326_v44 = vunpack.i.h.bf16 %v6511_v42  ;;  %v5331_v54 = vunpack.i.h.bf16 %v6521_v52 }
 0x54b   : > { %v2140_v11 = vpop.permute.xlu0 %2139  ;;  %v2100_v0 = vpop.permute.xlu1 %2099 }
 0x54c   : > { %2284 = vrot.lane.b32.xlu1 %v2091_v33, %s8347_s30  ;;  %v2110_v34 = vsel %vm8308_vm7, %v2100_v0, %v2102_v51  ;;  %v2154_v60 = vsel %vm897_vm10, %v2140_v11, %v6577_v37  ;;  %v2109_v21 = vsel %vm8308_vm7, %v2098_v10, %v2100_v0  ;;  %v2153_v35 = vsel %vm897_vm10, %v2138_v25, %v2140_v11 }
 0x54d   : > { %2288 = vrot.lane.b32.xlu0 %v2093_v26, %s8347_s30  ;;  %v5336_v0 = vunpack.i.h.bf16 %v6515_v43 }
 0x54f   : > { %v6604_v23 = vpop.permute.xlu0 %2240  ;;  %v2118_v49 = vpop.permute.xlu1 %2117 }
 0x550   : > { %2256 = vrot.lane.b32.xlu1 %v2049_v16, %s8347_s30  ;;  %v2381_v13 = vsel %vm1030_vm14, %v2239_v4, %v6604_v23  ;;  %v2132_v41 = vsel %vm8307_vm8, %v2118_v49, %v6554_v30  ;;  %v2131_v4 = vsel %vm8307_vm8, %v2116_v29, %v2118_v49  ;;  %v5345_v29 = vunpack.i.l.bf16 %v6527_v2 }
 0x551   : > { %2491 = vmatprep.subr.bf16.mxu1 %v2381_v13  ;;  %2304 = vrot.lane.b32.xlu0 %v2110_v34, %s8347_s30 }
 0x552   : > { %2492 = vmatpush1.bf16.msra.mxu1 %v2380_v47  ;;  %v2155_v25 = vsel %vm897_vm10, %v6577_v37, %v5345_v29 }
 0x553   : > { %v6613_v32 = vpop.permute.xlu0 %2063  ;;  %v6615_v20 = vpop.permute.xlu1 %2161 }
 0x554   : > { %2270 = vrot.lane.b32.xlu1 %v2070_v14, %s8347_s30  ;;  %v2072_v11 = vsel %vm832_vm1, %v5331_v54, %v6613_v32  ;;  %v2175_v52 = vsel %vm913_vm11, %v6581_v15, %v6615_v20 }
 0x555   : > { %2320 = vrot.lane.b32.xlu0 %v2132_v41, %s8347_s30  ;;  %v2176_v41 = vsel %vm913_vm11, %v6615_v20, %v6561_v28 }
 0x557   : > { %v6622_v51 = vpop.permute.xlu1 %2183  ;;  %v6625_v27 = vpop.permute.xlu0 %2145 }
 0x558   : > { %2286 = vrot.lane.b32.xlu1 %v2092_v31, %s8347_s30  ;;  %v5355_v31 = vunpack.i.l.bf16 %v6533_v9 }
 0x559   : > { %2336 = vrot.lane.b32.xlu0 %v2154_v60, %s8347_s30 }
 0x55b   : > { %v2042_v3 = vpop.permute.xlu1 %2041  ;;  %v2247_v30 = vpop.permute.xlu0 %2246 }
 0x55c   : > { %2302 = vrot.lane.b32.xlu1 %v2109_v21, %s8347_s30  ;;  %v2050_v7 = vsel %vm816_vm0, %v5326_v44, %v2042_v3  ;;  %v2383_v34 = vsel %vm1030_vm14, %v5351_v61, %v2247_v30  ;;  %v5356_v21 = vunpack.i.h.bf16 %v6533_v9 }
 0x55f   : > { %v2086_v62 = vpop.permute.xlu1 %2085  ;;  %v2044_v18 = vpop.permute.xlu0 %2043 }
 0x560   : > { %2318 = vrot.lane.b32.xlu1 %v2131_v4, %s8347_s30  ;;  %v2052_v10 = vsel %vm816_vm0, %v2044_v18, %v6537_v53  ;;  %v2094_v33 = vsel %vm848_vm3, %v5336_v0, %v2086_v62  ;;  %v2051_v43 = vsel %vm816_vm0, %v2042_v3, %v2044_v18  ;;  %v6744_v18 = vld.sshfl [vmem:[%s8360_s10] sm:$0x13 pattern:$0x75316420] }
 0x561   : > { %v2218_v29 = vcombine.high %v6744_v18, %v6744_v18 }
 0x563   : > { %v6635_v1 = vpop.permute.xlu1 %2103  ;;  %v2088_v26 = vpop.permute.xlu0 %2087 }
 0x564   : > { %2308 = vrot.lane.b32.xlu0 %v6635_v1, %s8347_s30  ;;  %2334 = vrot.lane.b32.xlu1 %v2153_v35, %s8347_s30  ;;  %v2096_v13 = vsel %vm848_vm3, %v2088_v26, %v6543_v38 }
 0x567   : > { %v6641_v56 = vpop.permute.xlu1 %2123  ;;  %v2106_v55 = vpop.permute.xlu0 %2105 }
 0x568   : > { %2324 = vrot.lane.b32.xlu0 %v6641_v56, %s8347_s30  ;;  %2264 = vrot.lane.b32.xlu1 %v2052_v10, %s8347_s30  ;;  %v2112_v14 = vsel %vm8308_vm7, %v2106_v55, %v6547_v50  ;;  %v5346_v50 = vunpack.i.h.bf16 %v6527_v2  ;;  %v2111_v60 = vsel %vm8308_vm7, %v6635_v1, %v2106_v55 }
 0x56a   : > { %v2158_v20 = vsel %vm897_vm10, %v6541_v24, %v5346_v50 }
 0x56b   : > { %v6649_v59 = vpop.permute.xlu1 %2167 }
 0x56c   : > { %2340 = vrot.lane.b32.xlu0 %v6625_v27, %s8347_s30  ;;  %2338 = vrot.lane.b32.xlu1 %v2155_v25, %s8347_s30 }
 0x56f   : > { %v6657_v53 = vpop.permute.xlu1 %2189 }
 0x570   : > { %2260 = vrot.lane.b32.xlu0 %v2050_v7, %s8347_s30 }
 0x573   : > { %v2066_v45 = vpop.permute.xlu1 %2065 }
 0x574   : > { %2276 = vrot.lane.b32.xlu0 %v2072_v11, %s8347_s30  ;;  %v2074_v37 = vsel %vm832_vm1, %v2066_v45, %v6535_v63  ;;  %v2073_v47 = vsel %vm832_vm1, %v6613_v32, %v2066_v45 }
 0x575   : > { %2280 = vrot.lane.b32.xlu1 %v2074_v37, %s8347_s30  ;;  %v2198_v37 = vsel %vm8304_vm13, %v6622_v51, %v6565_v17 }
 0x577   : > { %v6669_v42 = vpop.permute.xlu1 %2147 }
 0x578   : > { %2292 = vrot.lane.b32.xlu0 %v2094_v33, %s8347_s30  ;;  %v2157_v2 = vsel %vm897_vm10, %v6669_v42, %v6541_v24  ;;  %v8358_v24 = vld [vmem:[#allocation9_spill] sm:$0xff]  ;;  %v2156_v25 = vsel %vm897_vm10, %v6625_v27, %v6669_v42 }
 0x579   : > { %2350 = vrot.lane.b32.xlu1 %v2175_v52, %s8347_s30 }
 0x57b   : > { %v6678_v49 = vpop.permute.xlu1 %2248 }
 0x57c   : > { %2262 = vrot.lane.b32.xlu0 %v2051_v43, %s8347_s30  ;;  %v2384_v16 = vsel %vm1030_vm14, %v2247_v30, %v6678_v49 }
 0x57d   : > { %2493 = vmatprep.subr.bf16.mxu1 %v2384_v16  ;;  %2296 = vrot.lane.b32.xlu1 %v2096_v13, %s8347_s30 }
 0x57e   : > { %2494 = vmatpush1.bf16.msra.mxu1 %v2383_v34 }
 0x580   : > { %2274 = vrot.lane.b32.xlu0 %v6545_v12, %s8347_s30  ;;  %v2126_v12 = vpop.permute.xlu0 %2125 }
 0x581   : > { %2348 = vrot.lane.b32.xlu1 %v6581_v15, %s8347_s30  ;;  %v2095_v15 = vsel %vm848_vm3, %v2086_v62, %v2088_v26  ;;  %v2135_v32 = vsel %vm8307_vm8, %v2126_v12, %v6551_v5  ;;  %v5502_v5 = vmov 1966171168   ;;  %v2134_v1 = vsel %vm8307_vm8, %v6641_v56, %v2126_v12 }
 0x582   : > { %v2220_v3 = vunpack.c.l.s4 %v5502_v5  ;;  %v6730_v4 = vpop.permute.xlu1 %2266  ;;  %v2197_v56 = vsel %vm8304_vm13, %v6583_v36, %v6622_v51  ;;  %v5361_v51 = vunpack.i.h.bf16 %v6531_v40 }
 0x584   : > { %2278 = vrot.lane.b32.xlu0 %v2073_v47, %s8347_s30  ;;  %v2221_v30 = vunpack.c.0.s8 %v2220_v3  ;;  %v2170_v62 = vpop.permute.xlu0 %2169  ;;  %v2202_v16 = vsel %vm8304_vm13, %v6563_v6, %v5361_v51 }
 0x585   : > { %2312 = vrot.lane.b32.xlu1 %v2112_v14, %s8347_s30  ;;  %v2179_v9 = vsel %vm913_vm11, %v2170_v62, %v6556_v19  ;;  %v2178_v27 = vsel %vm913_vm11, %v6649_v59, %v2170_v62 }
 0x586   : > { %v6735_v35 = vsub.s32 %v2221_v30, %v8358_v24 }
 0x588   : > { %2352 = vrot.lane.b32.xlu0 %v2176_v41, %s8347_s30  ;;  %8359 = vst [vmem:[#allocation16_spill] sm:$0xff] %v6735_v35  ;;  %v2192_v7 = vpop.permute.xlu0 %2191 }
 0x589   : > { %2282 = vrot.lane.b32.xlu1 %v6535_v63, %s8347_s30  ;;  %v2177_v63 = vsel %vm913_vm11, %v6561_v28, %v5355_v31  ;;  %v2180_v28 = vsel %vm913_vm11, %v6556_v19, %v5356_v21  ;;  %v2232_v19 = vrot.slane %v2218_v29, %v6735_v35  ;;  %v2200_v54 = vsel %vm8304_vm13, %v6657_v53, %v2192_v7 }
 0x58a   : > { %v2201_v26 = vsel %vm8304_vm13, %v2192_v7, %v6563_v6  ;;  %v2382_v6 = vsel %vm1030_vm14, %v6604_v23, %v6569_v46 }
 0x58b   : > { %2605 = vmatprep.mubr.bf16.mxu0 %v2232_v19  ;;  %2523 = vmatprep.mubr.bf16.mxu1 %v2232_v19 }
 0x58c   : > { %2294 = vrot.lane.b32.xlu0 %v2095_v15, %s8347_s30  ;;  %v6769_v45 = vpop.permute.xlu0 %2314 }
 0x58d   : > { %2328 = vrot.lane.b32.xlu1 %v2135_v32, %s8347_s30 }
 0x58e   : > { %v2307_v10 = vpop.permute.xlu1 %2306 }
 0x590   : > { %2346 = vrot.lane.b32.xlu0 %v2158_v20, %s8347_s30 }
 0x591   : > { %2354 = vrot.lane.b32.xlu1 %v2177_v63, %s8347_s30 }
 0x593   : > { %v6758_v44 = vpop.permute.xlu1 %2322 }
 0x594   : > { %2310 = vrot.lane.b32.xlu0 %v2111_v60, %s8347_s30 }
 0x595   : > { %2344 = vrot.lane.b32.xlu1 %v2157_v2, %s8347_s30 }
 0x598   : > { %2356 = vrot.lane.b32.xlu0 %v6649_v59, %s8347_s30  ;;  %v5360_v59 = vunpack.i.l.bf16 %v6531_v40 }
 0x599   : > { %2362 = vrot.lane.b32.xlu1 %v2180_v28, %s8347_s30 }
 0x59c   : > { %2326 = vrot.lane.b32.xlu0 %v2134_v1, %s8347_s30 }
 0x59d   : > { %2360 = vrot.lane.b32.xlu1 %v2179_v9, %s8347_s30 }
 0x59e   : > { %v6775_v11 = vpop.permute.xlu0 %2258 }
 0x5a0   : > { %2290 = vrot.lane.b32.xlu0 %v6572_v8, %s8347_s30 }
 0x5a1   : > { %2366 = vrot.lane.b32.xlu1 %v2197_v56, %s8347_s30 }
 0x5a2   : > { %v6791_v42 = vpop.permute.xlu0 %2330 }
 0x5a4   : > { %2342 = vrot.lane.b32.xlu0 %v2156_v25, %s8347_s30 }
 0x5a5   : > { %2364 = vrot.lane.b32.xlu1 %v6583_v36, %s8347_s30 }
 0x5a6   : > { %v6763_v8 = vpop.permute.xlu1 %2300 }
 0x5a8   : > { %2298 = vrot.lane.b32.xlu0 %v6543_v38, %s8347_s30  ;;  %v2204_v38 = vld [vmem:[%s8361_s11] sm:$0x3]  ;;  %s8365_s11 = sld [smem:[#allocation20_spill]] }
 0x5a9   : > { %2374 = vrot.lane.b32.xlu1 %v2200_v54, %s8347_s30 }
 0x5aa   : > { %v6779_v36 = vpop.permute.xlu1 %2316 }
 0x5ac   : > { %2358 = vrot.lane.b32.xlu0 %v2178_v27, %s8347_s30 }
 0x5ad   : > { %2372 = vrot.lane.b32.xlu1 %v6657_v53, %s8347_s30  ;;  %v2199_v53 = vsel %vm8304_vm13, %v6565_v17, %v5360_v59  ;;  %vm8306_vm13 = vmmov 0  }
 0x5ae   : > { %s741_s18 = scalar_lea.vmem %s8365_s11, %s5655_s22 }
 0x5b0   : > { %2368 = vrot.lane.b32.xlu0 %v2198_v37, %s8347_s30 }
 0x5b1   : > { %2207 = vperm.xlu1 %5281, %v2204_v38  }
 0x5b2   : > { %v6789_v0 = vpop.permute.xlu1 %2332 }
 0x5b4   : > { %2370 = vrot.lane.b32.xlu0 %v2199_v53, %s8347_s30  ;;  %v2385_v53 = vsel %vm1030_vm14, %v6678_v49, %v6567_v58 }
 0x5b6   : > { %v2253_v33 = vpop.permute.xlu1 %2252 }
 0x5b7   : > { %v2255_v52 = vpop.permute.xlu0 %2254 }
 0x5b8   : > { %2376 = vrot.lane.b32.xlu0 %v2201_v26, %s8347_s30  ;;  %v2386_v14 = vsel %vm1030_vm14, %v2253_v33, %v2255_v52 }
 0x5ba   : > { %v2269_v61 = vpop.permute.xlu1 %2268 }
 0x5bb   : > { %v6800_v43 = vpop.permute.xlu0 %2272 }
 0x5bc   : > { %2378 = vrot.lane.b32.xlu0 %v2202_v16, %s8347_s30 }
 0x5be   : > { %v2285_v17 = vpop.permute.xlu1 %2284 }
 0x5bf   : > { %v6805_v13 = vpop.permute.xlu0 %2288 }
 0x5c2   : > { %v2257_v34 = vpop.permute.xlu1 %2256 }
 0x5c3   : > { %v6807_v55 = vpop.permute.xlu0 %2304  ;;  %v2387_v47 = vsel %vm1030_vm14, %v2255_v52, %v2257_v34  ;;  %v2388_v51 = vsel %vm1030_vm14, %v2257_v34, %v6775_v11 }
 0x5c4   : > { %2495 = vmatprep.subr.bf16.mxu1 %v2387_v47  ;;  %v2406_v40 = vsel %vm1030_vm14, %v6807_v55, %v2307_v10 }
 0x5c5   : > { %2496 = vmatpush1.bf16.msra.mxu1 %v2386_v14  ;;  %5003 = vmatprep.subr.bf16.mxu0 %v2406_v40 }
 0x5c6   : > { %5004 = vmatpush3.bf16.msra.mxu0 %v2382_v6  ;;  %v2271_v41 = vpop.permute.xlu1 %2270 }
 0x5c7   : > { %v6816_v15 = vpop.permute.xlu0 %2320  ;;  %v2393_v29 = vsel %vm1030_vm14, %v2271_v41, %v6800_v43  ;;  %v2392_v25 = vsel %vm1030_vm14, %v2269_v61, %v2271_v41 }
 0x5c8   : > { %v2412_v52 = vsel %vm1030_vm14, %v6816_v15, %v6758_v44 }
 0x5ca   : > { %v2287_v12 = vpop.permute.xlu1 %2286 }
 0x5cb   : > { %v6820_v50 = vpop.permute.xlu0 %2336  ;;  %v2399_v59 = vsel %vm1030_vm14, %v2287_v12, %v6805_v13 }
 0x5ce   : > { %v6818_v32 = vpop.permute.xlu1 %2302 }
 0x5d2   : > { %v6822_v31 = vpop.permute.xlu1 %2318 }
 0x5d6   : > { %v6824_v20 = vpop.permute.xlu0 %2308  ;;  %v6826_v63 = vpop.permute.xlu1 %2334 }
 0x5da   : > { %v6828_v60 = vpop.permute.xlu0 %2324  ;;  %v2265_v5 = vpop.permute.xlu1 %2264 }
 0x5db   : > { %v2391_v11 = vsel %vm1030_vm14, %v2265_v5, %v6730_v4 }
 0x5de   : > { %v6830_v3 = vpop.permute.xlu0 %2340  ;;  %v2339_v23 = vpop.permute.xlu1 %2338 }
 0x5df   : > { %v2418_v47 = vsel %vm1030_vm14, %v6820_v50, %v2339_v23 }
 0x5e2   : > { %v2261_v46 = vpop.permute.xlu0 %2260 }
 0x5e6   : > { %v2277_v2 = vpop.permute.xlu0 %2276 }
 0x5e7   : > { %v2281_v21 = vpop.permute.xlu1 %2280 }
 0x5ea   : > { %v2293_v30 = vpop.permute.xlu0 %2292 }
 0x5eb   : > { %v6832_v28 = vpop.permute.xlu1 %2350 }
 0x5ee   : > { %v2263_v62 = vpop.permute.xlu0 %2262 }
 0x5ef   : > { %v6834_v1 = vpop.permute.xlu1 %2296  ;;  %v2390_v9 = vsel %vm1030_vm14, %v2263_v62, %v2265_v5  ;;  %v2389_v10 = vsel %vm1030_vm14, %v2261_v46, %v2263_v62 }
 0x5f0   : > { %2497 = vmatprep.subr.bf16.mxu1 %v2390_v9 }
 0x5f1   : > { %2498 = vmatpush1.bf16.msra.mxu1 %v2389_v10 }
 0x5f2   : > { %v2275_v56 = vpop.permute.xlu0 %2274  ;;  %2499 = vmatprep.subr.bf16.mxu1 %v2393_v29 }
 0x5f3   : > { %v6840_v19 = vpop.permute.xlu1 %2348  ;;  %v2394_v40 = vsel %vm1030_vm14, %v6800_v43, %v2275_v56 }
 0x5f5   : > { %2500 = vmatpush1.bf16.msra.mxu1 %v2392_v25  ;;  %v2422_v25 = vsel %vm1030_vm14, %v6840_v19, %v6832_v28 }
 0x5f6   : > { %v2279_v7 = vpop.permute.xlu0 %2278 }
 0x5f7   : > { %v2313_v54 = vpop.permute.xlu1 %2312  ;;  %v2396_v27 = vsel %vm1030_vm14, %v2279_v7, %v2281_v21  ;;  %v2395_v38 = vsel %vm1030_vm14, %v2277_v2, %v2279_v7  ;;  %v8309_v7 = vmov 0.0  }
 0x5f8   : > { %2501 = vmatprep.subr.bf16.mxu1 %v2396_v27  ;;  %v2409_v37 = vsel %vm1030_vm14, %v2313_v54, %v6769_v45  ;;  %v2398_v45 = vsel %vm1030_vm14, %v2285_v17, %v2287_v12  ;;  %v2405_v17 = vsel %vm1030_vm14, %v6818_v32, %v6807_v55 }
 0x5f9   : > { %2502 = vmatpush1.bf16.msra.mxu1 %v2395_v38  ;;  %5005 = vmatprep.subr.bf16.mxu0 %v2409_v37 }
 0x5fa   : > { %v6852_v33 = vpop.permute.xlu0 %2352  ;;  %2503 = vmatprep.subr.bf16.mxu1 %v2399_v59  ;;  %5006 = vmatpush3.bf16.msra.mxu0 %v2385_v53 }
 0x5fb   : > { %5007 = vmatprep.subr.bf16.mxu0 %v2412_v52  ;;  %v2283_v26 = vpop.permute.xlu1 %2282 }
 0x5fc   : > { %v2397_v5 = vsel %vm1030_vm14, %v2281_v21, %v2283_v26 }
 0x5fd   : > { %2504 = vmatpush1.bf16.msra.mxu1 %v2398_v45 }
 0x5fe   : > { %v2295_v61 = vpop.permute.xlu0 %2294  ;;  %5008 = vmatpush3.bf16.msra.mxu0 %v2388_v51 }
 0x5ff   : > { %v2329_v16 = vpop.permute.xlu1 %2328  ;;  %v2402_v58 = vsel %vm1030_vm14, %v2295_v61, %v6834_v1  ;;  %v2401_v49 = vsel %vm1030_vm14, %v2293_v30, %v2295_v61  ;;  %v2417_v30 = vsel %vm1030_vm14, %v6826_v63, %v6820_v50 }
 0x600   : > { %2505 = vmatprep.subr.bf16.mxu1 %v2402_v58  ;;  %v2415_v44 = vsel %vm1030_vm14, %v2329_v16, %v6791_v42  ;;  %v2404_v42 = vsel %vm1030_vm14, %v6763_v8, %v6818_v32  ;;  %v2411_v8 = vsel %vm1030_vm14, %v6822_v31, %v6816_v15 }
 0x601   : > { %2506 = vmatpush1.bf16.msra.mxu1 %v2401_v49  ;;  %5009 = vmatprep.subr.bf16.mxu0 %v2415_v44 }
 0x602   : > { %v2347_v34 = vpop.permute.xlu0 %2346  ;;  %2507 = vmatprep.subr.bf16.mxu1 %v2405_v17  ;;  %5010 = vmatpush3.bf16.msra.mxu0 %v2391_v11  ;;  %v5505_v11 = vmov 1983009808  }
 0x603   : > { %5011 = vmatprep.subr.bf16.mxu0 %v2418_v47  ;;  %v2355_v14 = vpop.permute.xlu1 %2354 }
 0x604   : > { %v2424_v32 = vsel %vm1030_vm14, %v6852_v33, %v2355_v14 }
 0x605   : > { %2508 = vmatpush1.bf16.msra.mxu1 %v2404_v42 }
 0x606   : > { %v2311_v55 = vpop.permute.xlu0 %2310  ;;  %5012 = vmatpush3.bf16.msra.mxu0 %v2394_v40 }
 0x607   : > { %v2345_v6 = vpop.permute.xlu1 %2344  ;;  %v2408_v4 = vsel %vm1030_vm14, %v2311_v55, %v2313_v54  ;;  %v2407_v41 = vsel %vm1030_vm14, %v6824_v20, %v2311_v55  ;;  %v2410_v20 = vsel %vm1030_vm14, %v6779_v36, %v6822_v31  ;;  %v2416_v36 = vsel %vm1030_vm14, %v6789_v0, %v6826_v63 }
 0x608   : > { %2509 = vmatprep.subr.bf16.mxu1 %v2408_v4  ;;  %v2421_v12 = vsel %vm1030_vm14, %v2345_v6, %v2347_v34  ;;  %v2225_v63 = vrot.slane %v6744_v18, %v6735_v35  ;;  %v2667_v34 = vunpack.c.l.s4 %v5505_v11 }
 0x609   : > { %2510 = vmatpush1.bf16.msra.mxu1 %v2407_v41  ;;  %5013 = vmatprep.subr.bf16.mxu0 %v2421_v12 }
 0x60a   : > { %v2357_v43 = vpop.permute.xlu0 %2356  ;;  %2511 = vmatprep.subr.bf16.mxu1 %v2411_v8  ;;  %5014 = vmatpush3.bf16.msra.mxu0 %v2397_v5  ;;  %v2233_v45 = vcombine.high %v2225_v63, %v2225_v63  ;;  %v2668_v12 = vunpack.c.0.s8 %v2667_v34 }
 0x60b   : > { %5015 = vmatprep.subr.bf16.mxu0 %v2424_v32  ;;  %v2363_v46 = vpop.permute.xlu1 %2362 }
 0x60d   : > { %2512 = vmatpush1.bf16.msra.mxu1 %v2410_v20  ;;  %v8362_v20 = vld [vmem:[#allocation13_spill] sm:$0xff] }
 0x60e   : > { %v2327_v23 = vpop.permute.xlu0 %2326 }
 0x60f   : > { %v2414_v2 = vsel %vm1030_vm14, %v2327_v23, %v2329_v16  ;;  %v2413_v21 = vsel %vm1030_vm14, %v6828_v60, %v2327_v23  ;;  %v2361_v15 = vpop.permute.xlu1 %2360 }
 0x610   : > { %2513 = vmatprep.subr.bf16.mxu1 %v2414_v2  ;;  %v2427_v31 = vsel %vm1030_vm14, %v2361_v15, %v2363_v46 }
 0x611   : > { %2514 = vmatpush1.bf16.msra.mxu1 %v2413_v21  ;;  %v8363_v21 = vld [vmem:[#allocation14_spill] sm:$0xff] }
 0x612   : > { %v2291_v62 = vpop.permute.xlu0 %2290  ;;  %2515 = vmatprep.subr.bf16.mxu1 %v2417_v30 }
 0x613   : > { %v2400_v9 = vsel %vm1030_vm14, %v6805_v13, %v2291_v62  ;;  %v2367_v10 = vpop.permute.xlu1 %2366  ;;  %v2423_v13 = vsel %vm1030_vm14, %v6832_v28, %v6852_v33 }
 0x614   : > { %5016 = vmatpush3.bf16.msra.mxu0 %v2400_v9 }
 0x615   : > { %2516 = vmatpush1.bf16.msra.mxu1 %v2416_v36  ;;  %5017 = vmatprep.subr.bf16.mxu0 %v2427_v31  ;;  %v2671_v36 = vsub.s32 %v2668_v12, %v8358_v24 }
 0x616   : > { %v2343_v60 = vpop.permute.xlu0 %2342 }
 0x617   : > { %v2420_v29 = vsel %vm1030_vm14, %v2343_v60, %v2345_v6  ;;  %v2419_v50 = vsel %vm1030_vm14, %v6830_v3, %v2343_v60  ;;  %v2365_v3 = vpop.permute.xlu1 %2364 }
 0x618   : > { %2517 = vmatprep.subr.bf16.mxu1 %v2420_v29  ;;  %v2428_v19 = vsel %vm1030_vm14, %v2365_v3, %v2367_v10 }
 0x619   : > { %2518 = vmatpush1.bf16.msra.mxu1 %v2419_v50 }
 0x61a   : > { %v2299_v56 = vpop.permute.xlu0 %2298  ;;  %2519 = vmatprep.subr.bf16.mxu1 %v2423_v13  ;;  %v2687_v13 = vld [vmem:[%s737_s8] sm:$0x1f]  ;;  %s5181_s8 = smul.u32 3, %s5649_s5 }
 0x61b   : > { %v2403_v0 = vsel %vm1030_vm14, %v6834_v1, %v2299_v56  ;;  %v2375_v28 = vpop.permute.xlu1 %2374  ;;  %v2688_v56 = vld [vmem:[%s741_s18] sm:$0x1f] }
 0x61c   : > { %5018 = vmatpush3.bf16.msra.mxu0 %v2403_v0  ;;  %s764_s18 = scalar_lea.vmem %s8270_s21, %s5181_s8 }
 0x61d   : > { %2520 = vmatpush1.bf16.msra.mxu1 %v2422_v25  ;;  %5103 = vmatprep.subr.bf16.mxu0 %v8309_v7 }
 0x61e   : > { %v2359_v54 = vpop.permute.xlu0 %2358 }
 0x61f   : > { %2606 = vmatmul.mubr.bf16.vlgmr.msra.gmra.mrb[16].mxu0 %v2225_v63  ;;  %v2426_v27 = vsel %vm1030_vm14, %v2359_v54, %v2361_v15  ;;  %v2425_v38 = vsel %vm1030_vm14, %v2357_v43, %v2359_v54  ;;  %v2373_v53 = vpop.permute.xlu1 %2372  ;;  %v2690_v54 = vrot.slane %v2687_v13, 1 }
 0x620   : > { %2521 = vmatprep.subr.bf16.mxu1 %v2426_v27  ;;  %5107 = vmatprep.mubr.msk.bf16.mxu0 %vm8306_vm13, %v8309_v7  ;;  %v2431_v26 = vsel %vm1030_vm14, %v2373_v53, %v2375_v28 }
 0x621   : > { %2522 = vmatpush1.bf16.msra.mxu1 %v2425_v38  ;;  %v2724_v38 = vrot.slane %v2688_v56, 1 }
 0x622   : > { %v2369_v18 = vpop.permute.xlu0 %2368 }
 0x623   : > { %v2429_v1 = vsel %vm1030_vm14, %v2367_v10, %v2369_v18  ;;  %v8366_v10 = vld [vmem:[#allocation15_spill] sm:$0xff] }
 0x624   : > { %2524 = vmatmul.mubr.bf16.vlgmr.msra.gmra.mrb[16].mxu1 %v2225_v63  ;;  %2532 = vmatprep.subr.bf16.mxu1 %v2429_v1 }
 0x625   : > { %2533 = vmatpush1.bf16.msra.mxu1 %v2428_v19  ;;  %2564 = vmatprep.mubr.bf16.mxu1 %v8355_v39  ;;  %v2720_v19 = vstv %s2684_s3 }
 0x626   : > { %v2371_v37 = vpop.permute.xlu0 %2370 }
 0x627   : > { %v2430_v59 = vsel %vm1030_vm14, %v2369_v18, %v2371_v37 }
 0x628   : > { %5104 = vmatpush3.bf16.msra.mxu0 %v2430_v59 }
 0x629   : > { %5105 = vmatprep.subr.bf16.mxu0 %v8309_v7 }
 0x62a   : > { %v2377_v33 = vpop.permute.xlu0 %2376 }
 0x62b   : > { %v2432_v52 = vsel %vm1030_vm14, %v2375_v28, %v2377_v33  ;;  %v2722_v28 = vstv %s6935_s27 }
 0x62c   : > { %2534 = vmatprep.subr.bf16.mxu1 %v2432_v52  ;;  %v2726_v59 = vmul.f32 %v2724_v38, %v2722_v28  ;;  %v8368_v52 = vmov 0 }
 0x62d   : > { %2535 = vmatpush1.bf16.msra.mxu1 %v2431_v26 }
 0x62e   : > { %v2379_v51 = vpop.permute.xlu0 %2378 }
 0x62f   : > { %v2433_v61 = vsel %vm1030_vm14, %v2377_v33, %v2379_v51  ;;  %v8367_v33 = vlaneseq }
 0x630   : > { %4940 = vmatmul.mubr.msk.bf16.vlgmr.msra.gmra.mrb[16].mxu1 %vm1742_vm15, %v2233_v45  ;;  %5106 = vmatpush3.bf16.msra.mxu0 %v2433_v61  ;;  %v2208_v47 = vpop.permute.xlu1 %2207  ;;  %v8372_v61 = vld [vmem:[#allocation10_spill] sm:$0xff] }
 0x631   : > { %vm6967_vm13 = vcmp.lt.s32.totalorder %v8367_v33, 384 }
 0x632   : > { %v8369_v52 = vsel %vm6967_vm13, 4294967295, %v8368_v52 }
 0x633   : > { %5108 = vmatmul.mubr.msk.bf16.vlgmr.msra.gmra.mrb[20].mxu0 %vm1742_vm15, %v2233_v45  ;;  %8370 = vst [vmem:[#allocation9_spill] sm:$0xff] %v8369_v52  ;;  %v8371_v45 = vld [vmem:[#allocation12_spill] sm:$0xff] }
 0x634   : > { %3147 = vmatprep.mubr.bf16.mxu0 %v8355_v39 }
 0x6f2   : > { %v5019_v16 = vpop.f32.mrb[16].mxu0 }
 0x6f3   : > { %v5020_v58 = vpop.f32.mrb[17].mxu0 }
 0x6f4   : > { %v5021_v49 = vadd.f32 %v5020_v58, %v5019_v16  ;;  %v5022_v44 = vpop.f32.mrb[18].mxu0  ;;  %v8373_v58 = vld [vmem:[#allocation11_spill] sm:$0xff] }
 0x6f5   : > { %v5023_v17 = vpop.f32.mrb[19].mxu0 }
 0x6f6   : > { %v2608_v4 = vadd.f32 %v5021_v49, %v2208_v47 }
 0x703   : > { %v2566_v14 = vpop.f32.mrb[16].mxu1 }
 0x704   : > { %v5143_v42 = vadd.f32 %v2566_v14, %v2208_v47  ;;  %v2568_v40 = vpop.f32.mrb[17].mxu1 }
 0x705   : > { %v5144_v55 = vadd.f32 %v2568_v40, %v2208_v47  ;;  %v2570_v6 = vpop.f32.mrb[18].mxu1 }
 0x706   : > { %v2653_v41 = vmul.f32 %v5143_v42, %v5857_v48  ;;  %v2571_v5 = vpop.f32.mrb[19].mxu1  ;;  %v2647_v8 = vpop.f32.mrb[20].mxu0 }
 0x707   : > { %v2654_v43 = vmul.f32 %v5144_v55, %v5906_v22  ;;  %v2648_v32 = vadd.f32 %v2647_v8, %v2608_v4  ;;  %v5109_v46 = vpop.f32.mrb[21].mxu0 }
 0x708   : > { %v2656_v23 = vadd.f32 %v2653_v41, %v8362_v20  ;;  %v2650_v2 = vpop.f32.mrb[22].mxu0 }
 0x709   : > { %v2657_v15 = vadd.f32 %v2654_v43, %v8363_v21  ;;  %v2655_v30 = vmul.f32 %v2648_v32, %v5865_v57  ;;  %v5110_v62 = vpop.f32.mrb[23].mxu0 }
 0x70a   : > { %v2659_v9 = vsel %vm937_vm2, %v2653_v41, %v2656_v23 }
 0x70b   : > { %v2660_v31 = vsel %vm937_vm2, %v2654_v43, %v2657_v15  ;;  %v2695_v60 = vcombine.low %v2656_v23, %v2657_v15  ;;  %v2658_v29 = vadd.f32 %v2655_v30, %v8366_v10 }
 0x70c   : > { %v2665_v50 = vcombine.low %v2659_v9, %v2660_v31 }
 0x70d   : > { %v2702_v0 = vrot.slane %v2695_v60, %v6735_v35  ;;  %v2661_v63 = vsel %vm937_vm2, %v2655_v30, %v2658_v29  ;;  %v2709_v25 = vrot.slane %v2658_v29, %v6735_v35 }
 0x70e   : > { %v2672_v24 = vrot.slane %v2665_v50, %v2671_v36  ;;  %v2679_v3 = vrot.slane %v2661_v63, %v2671_v36 }
 0x70f   : > { %v2710_v27 = vcombine.high %v2702_v0, %v2709_v25 }
 0x710   : > { %v2680_v18 = vcombine.low %v2672_v24, %v2679_v3 }
 0x711   : > { %v2717_v1 = vrot.slane %v2710_v27, %v6735_v35 }
 0x712   : > { %2682 = vst [vmem:[%s756_s9] sm:$0x3f] %v2680_v18  ;;  %s751_s9 = scalar_lea.vmem %s8382_s7, %s8381_s2 }
 0x713   : > { %v2719_v37 = vsub.f32 %v2690_v54, %v2717_v1 }
 0x715   : > { %v2721_v53 = vmul.f32 %v2720_v19, %v2719_v37 }
 0x717   : > { %v2727_v26 = vadd.f32 %v2726_v59, %v2721_v53 }
 0x719   : > { %v2737_v51 = vrot.slane %v2727_v26, %v8371_v45  ;;  %v2741_v16 = vrot.slane %v2727_v26, %v8372_v61  ;;  %v2745_v49 = vrot.slane %v2727_v26, %v8373_v58  ;;  %2732 = vst.msk [vmem:[%s764_s18] sm:$0x7] %vm6967_vm13, %v2727_v26 }
 0x71b   : > { %v2749_v44 = vsel %vm937_vm2, %v2737_v51, %v2656_v23  ;;  %v2750_v17 = vsel %vm937_vm2, %v2741_v16, %v2657_v15  ;;  %v2751_v11 = vsel %vm937_vm2, %v2745_v49, %v2658_v29 }
 0x71c   : > { %v2754_v34 = vpack.c.bf16 %v2751_v11, %v2751_v11  ;;  %v4943_v47 = vpack.c.bf16 %v2750_v17, %v2749_v44 }
 0x71e   : > { %v2765_v14 = vrot.slane %v4943_v47, %v6735_v35  ;;  %v2772_v42 = vrot.slane %v2754_v34, %v6735_v35 }
 0x720   : > { %v2773_v40 = vcombine.low %v2765_v14, %v2772_v42 }
 0x722   : > { %4944 = vst.sshfl [vmem:[#allocation3 + $0x1] sm:$0x15 pattern:$0x73625140] %v2773_v40 }
 0x729   : > { %v2783_v55 = vld [vmem:[#allocation3] sm:$0x1f] }
 0x72a   : > { %v2791_v6 = vrot.slane %v2783_v55, %v6735_v35  ;;  %v2809_v4 = vcombine.low %v2783_v55, %v2783_v55  ;;  %v2907_v60 = vcombine.high %v2783_v55, %v2783_v55 }
 0x72c   : > { %v6983_v41 = vrot.slane %v2791_v6, %v6735_v35  ;;  %v2816_v12 = vrot.slane %v2809_v4, %v6735_v35  ;;  %v2845_v8 = vcombine.low %v2791_v6, %v2791_v6  ;;  %v2792_v46 = vcombine.high %v2791_v6, %v2791_v6 }
 0x72d   : > { %v2914_v10 = vrot.slane %v2907_v60, %v6735_v35 }
 0x72e   : > { %2888 = vrot.lane.b32.xlu1 %v6983_v41, %s8351_s28  ;;  %2856 = vrot.lane.b32.xlu0 %v6983_v41, %s8356_s25  ;;  %v2824_v5 = vrot.slane %v2816_v12, %v6735_v35  ;;  %v2852_v43 = vrot.slane %v2845_v8, %v6735_v35  ;;  %v6997_v32 = vcombine.high %v6983_v41, %v6983_v41 }
 0x72f   : > { %v7005_v20 = vrot.slane %v2792_v46, %v6735_v35  ;;  %v2894_v21 = vcombine.low %v6983_v41, %v6983_v41  ;;  %v2865_v15 = vcombine.low %v2816_v12, %v2816_v12  ;;  %v2817_v30 = vcombine.high %v2816_v12, %v2816_v12 }
 0x730   : > { %v2832_v23 = vcombine.high %v2824_v5, %v2824_v5  ;;  %v2853_v2 = vcombine.high %v2852_v43, %v2852_v43  ;;  %v2936_v36 = vcombine.low %v2824_v5, %v2824_v5  ;;  %v2915_v13 = vcombine.low %v2914_v10, %v2914_v10 }
 0x731   : > { %v2872_v62 = vrot.slane %v2865_v15, %v6735_v35  ;;  %v2831_v9 = vrot.slane %v2817_v30, %v6735_v35  ;;  %v2885_v31 = vcombine.low %v7005_v20, %v7005_v20  ;;  %v2935_v25 = vcombine.low %v2852_v43, %v2852_v43 }
 0x732   : > { %2834 = vrot.lane.b32.xlu1 %v2824_v5, %s8344_s29  ;;  %2928 = vrot.lane.b32.xlu0 %v6983_v41, %s8348_s24  ;;  %v2922_v0 = vrot.slane %v2915_v13, %v6735_v35  ;;  %v2808_v24 = vcombine.high %v7005_v20, %v7005_v20  ;;  %v2954_v3 = vrot.slane %v2914_v10, %v6735_v35 }
 0x733   : > { %v2873_v29 = vcombine.high %v2872_v62, %v2872_v62  ;;  %v2833_v50 = vcombine.high %v2831_v9, %v2831_v9  ;;  %v2895_v56 = vcombine.low %v2831_v9, %v2831_v9 }
 0x734   : > { %v2923_v63 = vcombine.low %v2922_v0, %v2922_v0 }
 0x736   : > { %2854 = vrot.lane.b32.xlu1 %v2852_v43, %s8356_s25  ;;  %2860 = vrot.lane.b32.xlu0 %v6997_v32, %s8356_s25 }
 0x73a   : > { %2926 = vrot.lane.b32.xlu1 %v2852_v43, %s8348_s24  ;;  %2876 = vrot.lane.b32.xlu0 %v2824_v5, %s8346_s4 }
 0x73e   : > { %2941 = vrot.lane.b32.xlu1 %v2824_v5, %s8345_s0  ;;  %2890 = vrot.lane.b32.xlu0 %v7005_v20, %s8351_s28 }
 0x742   : > { %2838 = vrot.lane.b32.xlu1 %v2832_v23, %s8344_s29  ;;  %2898 = vrot.lane.b32.xlu0 %v2824_v5, %s8343_s17 }
 0x746   : > { %2858 = vrot.lane.b32.xlu1 %v2853_v2, %s8356_s25  ;;  %2924 = vrot.lane.b32.xlu0 %v2894_v21, %s8348_s24 }
 0x74a   : > { %2874 = vrot.lane.b32.xlu1 %v2872_v62, %s8346_s4  ;;  %2836 = vrot.lane.b32.xlu0 %v2831_v9, %s8344_s29 }
 0x74e   : > { %2900 = vrot.lane.b32.xlu1 %v2831_v9, %s8343_s17  ;;  %2880 = vrot.lane.b32.xlu0 %v2832_v23, %s8346_s4 }
 0x752   : > { %2937 = vrot.lane.b32.xlu1 %v2936_v36, %s8345_s0  ;;  %2886 = vrot.lane.b32.xlu0 %v2885_v31, %s8351_s28 }
 0x756   : > { %2955 = vrot.lane.b32.xlu1 %v7005_v20, %s8349_s23  ;;  %2939 = vrot.lane.b32.xlu0 %v2872_v62, %s8345_s0 }
 0x75a   : > { %2878 = vrot.lane.b32.xlu1 %v2873_v29, %s8346_s4  ;;  %2840 = vrot.lane.b32.xlu0 %v2833_v50, %s8344_s29 }
 0x75e   : > { %2896 = vrot.lane.b32.xlu1 %v2895_v56, %s8343_s17  ;;  %2902 = vrot.lane.b32.xlu0 %v2894_v21, %s8343_s17 }
 0x762   : > { %2930 = vrot.lane.b32.xlu1 %v2923_v63, %s8348_s24  ;;  %2943 = vrot.lane.b32.xlu0 %v2935_v25, %s8345_s0 }
 0x766   : > { %2957 = vrot.lane.b32.xlu0 %v6997_v32, %s8349_s23  ;;  %2959 = vrot.lane.b32.xlu1 %v2808_v24, %s8349_s23 }
 0x76a   : > { %2961 = vrot.lane.b32.xlu0 %v2954_v3, %s8349_s23 }
 0x7a0   : > { %v2889_v54 = vpop.permute.xlu1 %2888  ;;  %v2857_v27 = vpop.permute.xlu0 %2856 }
 0x7a4   : > { %v2835_v38 = vpop.permute.xlu1 %2834  ;;  %v2929_v18 = vpop.permute.xlu0 %2928 }
 0x7a8   : > { %v2855_v28 = vpop.permute.xlu1 %2854  ;;  %v2861_v1 = vpop.permute.xlu0 %2860 }
 0x7ac   : > { %v7044_v19 = vpop.permute.xlu1 %2926  ;;  %v2877_v37 = vpop.permute.xlu0 %2876 }
 0x7b0   : > { %v7046_v59 = vpop.permute.xlu1 %2941  ;;  %v2891_v53 = vpop.permute.xlu0 %2890 }
 0x7b1   : > { %v2893_v30 = vsel %vm8308_vm7, %v2889_v54, %v2891_v53 }
 0x7b4   : > { %v2839_v33 = vpop.permute.xlu1 %2838  ;;  %v2899_v26 = vpop.permute.xlu0 %2898 }
 0x7b8   : > { %v2859_v51 = vpop.permute.xlu1 %2858  ;;  %v7048_v61 = vpop.permute.xlu0 %2924 }
 0x7b9   : > { %v2864_v4 = vsel %vm832_vm1, %v2859_v51, %v2861_v1  ;;  %v2863_v9 = vsel %vm832_vm1, %v2857_v27, %v2859_v51 }
 0x7bc   : > { %v2875_v16 = vpop.permute.xlu1 %2874  ;;  %v2837_v58 = vpop.permute.xlu0 %2836 }
 0x7bd   : > { %v2843_v40 = vsel %vm816_vm0, %v2837_v58, %v2839_v33  ;;  %v2842_v62 = vsel %vm816_vm0, %v2835_v38, %v2837_v58  ;;  %v2862_v38 = vsel %vm832_vm1, %v2855_v28, %v2857_v27 }
 0x7be   : > { %v2971_v23 = vsel %vm937_vm2, %v7005_v20, %v2843_v40  ;;  %v2968_v10 = vsel %vm937_vm2, %v6983_v41, %v2842_v62  ;;  %v784_v62 = vld [vmem:[%s751_s9 + $0x10] sm:$0xff] }
 0x7bf   : > { %v2981_v20 = vsel %vm942_vm4, %v2971_v23, %v2863_v9  ;;  %v3040_v23 = vld [vmem:[%s8262_s13 + $0x8] sm:$0xff] }
 0x7c0   : > { %v2901_v49 = vpop.permute.xlu1 %2900  ;;  %v2881_v44 = vpop.permute.xlu0 %2880 }
 0x7c1   : > { %v2905_v29 = vsel %vm8307_vm8, %v2899_v26, %v2901_v49 }
 0x7c4   : > { %v7050_v17 = vpop.permute.xlu1 %2937  ;;  %v2887_v11 = vpop.permute.xlu0 %2886 }
 0x7c5   : > { %v2892_v41 = vsel %vm8308_vm7, %v2887_v11, %v2889_v54  ;;  %v2882_v54 = vsel %vm848_vm3, %v2875_v16, %v2877_v37  ;;  %vm8375_vm7 = vcmask 736256  }
 0x7c8   : > { %v7052_v34 = vpop.permute.xlu1 %2955  ;;  %v2940_v47 = vpop.permute.xlu0 %2939 }
 0x7cc   : > { %v2879_v14 = vpop.permute.xlu1 %2878  ;;  %v2841_v42 = vpop.permute.xlu0 %2840 }
 0x7cd   : > { %v2844_v55 = vsel %vm816_vm0, %v2839_v33, %v2841_v42  ;;  %v2977_v6 = vsel %vm937_vm2, %v2808_v24, %v2841_v42  ;;  %v2884_v8 = vsel %vm848_vm3, %v2879_v14, %v2881_v44  ;;  %v2979_v33 = vsel %vm942_vm4, %v2968_v10, %v2862_v38 }
 0x7ce   : > { %v2974_v12 = vsel %vm937_vm2, %v6997_v32, %v2844_v55  ;;  %v2985_v5 = vsel %vm942_vm4, %v2977_v6, %v2861_v1  ;;  %v2883_v32 = vsel %vm848_vm3, %v2877_v37, %v2879_v14  ;;  %v2987_v14 = vsel %vm947_vm5, %v2979_v33, %v2882_v54  ;;  %v5454_v6 = vld [vmem:[%s8261_s12] sm:$0xff]  }
 0x7cf   : > { %v2983_v43 = vsel %vm942_vm4, %v2974_v12, %v2864_v4  ;;  %v2993_v46 = vsel %vm947_vm5, %v2985_v5, %v2881_v44  ;;  %v2989_v50 = vsel %vm947_vm5, %v2981_v20, %v2883_v32  ;;  %v2946_v42 = vsel %vm913_vm11, %v2940_v47, %v7046_v59  ;;  %5115 = vmatprep.mubr.msk.bf16.mxu1 %vm1742_vm15, %v5454_v6 }
 0x7d0   : > { %v2991_v2 = vsel %vm947_vm5, %v2983_v43, %v2884_v8  ;;  %v2897_v21 = vpop.permute.xlu1 %2896  ;;  %v2903_v15 = vpop.permute.xlu0 %2902  ;;  %v3001_v31 = vsel %vm952_vm6, %v2993_v46, %v2891_v53  ;;  %v2933_v53 = vsel %vm897_vm10, %v7044_v19, %v2929_v18  ;;  %v2995_v55 = vsel %vm952_vm6, %v2987_v14, %v2887_v11  ;;  %vm8377_vm5 = vmmov %vm8375_vm7 }
 0x7d1   : > { %v2906_v36 = vsel %vm8307_vm8, %v2901_v49, %v2903_v15  ;;  %v2999_v60 = vsel %vm952_vm6, %v2991_v2, %v2893_v30  ;;  %v2904_v13 = vsel %vm8307_vm8, %v2897_v21, %v2899_v26  ;;  %v2997_v26 = vsel %vm952_vm6, %v2989_v50, %v2892_v41  ;;  %v783_v2 = vld [vmem:[%s751_s9 + $0x8] sm:$0xff]  ;;  %v3041_v15 = vld [vmem:[%s8262_s13 + $0x10] sm:$0xff]  ;;  %v785_v30 = vld [vmem:[%s751_s9 + $0x18] sm:$0xff] }
 0x7d2   : > { %v3009_v63 = vsel %vm957_vm9, %v3001_v31, %v2906_v36  ;;  %v3007_v3 = vsel %vm957_vm9, %v2999_v60, %v2905_v29  ;;  %vm8374_vm8 = vcmask 1046528   ;;  %v3005_v58 = vsel %vm957_vm9, %v2997_v26, %v2904_v13 }
 0x7d3   : > { %v3015_v27 = vsel %vm962_vm12, %v3007_v3, %v2933_v53  ;;  %vm8376_vm4 = vmmov %vm8374_vm8 }
 0x7d4   : > { %v2931_v56 = vpop.permute.xlu1 %2930  ;;  %v2944_v0 = vpop.permute.xlu0 %2943  ;;  %v3023_v37 = vsel %vm8376_vm4, %v3015_v27, %v2946_v42  ;;  %vm8378_vm6 = vmmov %vm8376_vm4 }
 0x7d5   : > { %v2934_v25 = vsel %vm897_vm10, %v2929_v18, %v2931_v56  ;;  %v2947_v24 = vsel %vm913_vm11, %v7046_v59, %v2944_v0  ;;  %v2932_v18 = vsel %vm897_vm10, %v7048_v61, %v7044_v19  ;;  %v3003_v19 = vsel %vm957_vm9, %v2995_v55, %v2897_v21  ;;  %v782_v21 = vld [vmem:[%s751_s9] sm:$0xff] }
 0x7d6   : > { %v3017_v1 = vsel %vm962_vm12, %v3009_v63, %v2934_v25  ;;  %v3013_v16 = vsel %vm962_vm12, %v3005_v58, %v2932_v18  ;;  %v2945_v59 = vsel %vm913_vm11, %v7050_v17, %v2940_v47  ;;  %v3011_v8 = vsel %vm962_vm12, %v3003_v19, %v7048_v61  ;;  %v5455_v63 = vld [vmem:[%s8261_s12 + $0x8] sm:$0xff]  }
 0x7d7   : > { %v3025_v51 = vsel %vm8374_vm8, %v3017_v1, %v2947_v24  ;;  %v3021_v12 = vsel %vm8378_vm6, %v3013_v16, %v2945_v59  ;;  %vm8380_vm8 = vmmov %vm8376_vm4  ;;  %v3028_v61 = vsel %vm937_vm2, %v7052_v34, 0  ;;  %vm8386_vm9 = vcmask 891904  }
 0x7d8   : > { %v2958_v49 = vpop.permute.xlu0 %2957  ;;  %3087 = vrot.lane.b32.xlu0 %v3025_v51, %s8347_s30  ;;  %v2960_v44 = vpop.permute.xlu1 %2959  ;;  %v3019_v46 = vsel %vm8380_vm8, %v3011_v8, %v7050_v17  ;;  %v3039_v17 = vld [vmem:[%s8262_s13] sm:$0xff]  ;;  %vm8388_vm4 = vmmov %vm8386_vm9 }
 0x7d9   : > { %v2963_v28 = vsel %vm8375_vm7, %v7052_v34, %v2958_v49  ;;  %v2964_v4 = vsel %vm8377_vm5, %v2958_v49, %v2960_v44  ;;  %vm8379_vm7 = vmmov %vm8377_vm5  ;;  %v3042_v34 = vld [vmem:[%s8262_s13 + $0x18] sm:$0xff] }
 0x7da   : > { %v3030_v40 = vsel %vm937_vm2, %v2963_v28, 0  ;;  %v3032_v5 = vsel %vm937_vm2, %v2964_v4, 0  ;;  %vm8392_vm8 = vmmov %vm8388_vm4 }
 0x7db   : > { %3091 = vrot.lane.b32.xlu1 %v3030_v40, %s8347_s30 }
 0x7dc   : > { %3085 = vrot.lane.b32.xlu0 %v3023_v37, %s8347_s30  ;;  %v2962_v11 = vpop.permute.xlu0 %2961 }
 0x7dd   : > { %v2965_v43 = vsel %vm8379_vm7, %v2960_v44, %v2962_v11  ;;  %vm8391_vm7 = vmmov %vm8388_vm4 }
 0x7de   : > { %v3034_v47 = vsel %vm937_vm2, %v2965_v43, 0  ;;  %vm8385_vm2 = vcmask 883712  }
 0x7df   : > { %3083 = vrot.lane.b32.xlu1 %v3021_v12, %s8347_s30  ;;  %vm8387_vm12 = vmmov %vm8385_vm2 }
 0x7e0   : > { %3093 = vrot.lane.b32.xlu0 %v3032_v5, %s8347_s30  ;;  %vm8389_vm5 = vmmov %vm8385_vm2 }
 0x7e1   : > { %vm8390_vm6 = vmmov %vm8385_vm2 }
 0x7e3   : > { %3081 = vrot.lane.b32.xlu1 %v3019_v46, %s8347_s30 }
 0x7e4   : > { %3095 = vrot.lane.b32.xlu0 %v3034_v47, %s8347_s30 }
 0x7e7   : > { %3089 = vrot.lane.b32.xlu1 %v3028_v61, %s8347_s30 }
 0x7e8   : > { %3050 = vperm.xlu0 %5280, %v3040_v23  }
 0x7eb   : > { %3045 = vperm.xlu1 %5281, %v3039_v17  }
 0x7ec   : > { %3224 = vperm.xlu0 %5280, %v783_v2  }
 0x7ef   : > { %3219 = vperm.xlu1 %5281, %v782_v21  }
 0x7f0   : > { %3060 = vperm.xlu0 %5280, %v3042_v34  }
 0x7f3   : > { %3055 = vperm.xlu1 %5281, %v3041_v15  }
 0x7f4   : > { %3234 = vperm.xlu0 %5280, %v785_v30  }
 0x7f7   : > { %3229 = vperm.xlu1 %5281, %v784_v62  }
 0x7f8   : > { %5363 = vrot.lane.b32.xlu0 %v8355_v39, %s8344_s29 }
 0x7fb   : > { %5368 = vrot.lane.b32.xlu1 %v8355_v39, %s8356_s25 }
 0x7fc   : > { %5373 = vrot.lane.b32.xlu0 %v8355_v39, %s8346_s4 }
 0x7ff   : > { %5378 = vrot.lane.b32.xlu1 %v8355_v39, %s8343_s17 }
 0x800   : > { %5383 = vrot.lane.b32.xlu0 %v8355_v39, %s8348_s24 }
 0x803   : > { %5388 = vrot.lane.b32.xlu1 %v8355_v39, %s8345_s0 }
 0x807   : > { %5393 = vrot.lane.b32.xlu1 %v8355_v39, %s8347_s30 }
 0x80b   : > { %5398 = vrot.lane.b32.xlu1 %v8355_v39, %s8349_s23 }
 0x84a   : > { %v3088_v32 = vpop.permute.xlu0 %3087 }
 0x84d   : > { %v3092_v9 = vpop.permute.xlu1 %3091 }
 0x84e   : > { %v3086_v36 = vpop.permute.xlu0 %3085 }
 0x84f   : > { %v3099_v31 = vsel %vm1030_vm14, %v3086_v36, %v3088_v32 }
 0x850   : > { %5111 = vmatprep.subr.bf16.mxu1 %v3099_v31 }
 0x851   : > { %v3084_v60 = vpop.permute.xlu1 %3083  ;;  %5112 = vmatpush3.bf16.msra.mxu1 %v3099_v31 }
 0x852   : > { %v3094_v20 = vpop.permute.xlu0 %3093  ;;  %v3098_v10 = vsel %vm1030_vm14, %v3084_v60, %v3086_v36 }
 0x853   : > { %3115 = vmatprep.subr.bf16.mxu0 %v3098_v10  ;;  %v3101_v56 = vsel %vm1030_vm14, %v3092_v9, %v3094_v20 }
 0x855   : > { %v3082_v29 = vpop.permute.xlu1 %3081 }
 0x856   : > { %v3097_v50 = vsel %vm1030_vm14, %v3082_v29, %v3084_v60  ;;  %v3096_v13 = vpop.permute.xlu0 %3095 }
 0x857   : > { %3116 = vmatpush1.bf16.msra.mxu0 %v3097_v50  ;;  %v3102_v0 = vsel %vm1030_vm14, %v3094_v20, %v3096_v13 }
 0x858   : > { %3117 = vmatprep.subr.bf16.mxu0 %v3101_v56  ;;  %5113 = vmatprep.subr.bf16.mxu1 %v3102_v0 }
 0x859   : > { %v3090_v25 = vpop.permute.xlu1 %3089  ;;  %5114 = vmatpush3.bf16.msra.mxu1 %v3102_v0 }
 0x85a   : > { %v3100_v24 = vsel %vm1030_vm14, %v3090_v25, %v3092_v9 }
 0x85b   : > { %3118 = vmatpush1.bf16.msra.mxu0 %v3100_v24 }
 0x85c   : > { %5116 = vmatmul.mubr.msk.bf16.vlgmr.msra.gmra.mrb[20].mxu1 %vm1742_vm15, %v5455_v63 }
 0x85e   : > { %4947 = vmatmul.mubr.msk.bf16.vlgmr.msra.gmra.mrb[24].mxu0 %vm1742_vm15, %v5454_v6 }
 0x85f   : > { %3157 = vmatprep.mubr.bf16.mxu0 %v8355_v39 }
 0x866   : > { %4948 = vmatmul.mubr.msk.bf16.gmra.mrb[28].mxu0 %vm1742_vm15, %v5455_v63 }
 0x867   : > { %v3051_v3 = vpop.permute.xlu0 %3050 }
 0x86a   : > { %v3046_v38 = vpop.permute.xlu1 %3045 }
 0x86b   : > { %v7180_v41 = vpop.permute.xlu0 %3224 }
 0x86e   : > { %v7182_v1 = vpop.permute.xlu1 %3219 }
 0x86f   : > { %v7184_v53 = vpop.permute.xlu0 %3060 }
 0x872   : > { %v7186_v33 = vpop.permute.xlu1 %3055 }
 0x873   : > { %v7190_v14 = vpop.permute.xlu0 %3234 }
 0x876   : > { %v7194_v6 = vpop.permute.xlu1 %3229 }
 0x92f   : > { %v5117_v26 = vpop.f32.mrb[20].mxu1 }
 0x930   : > { %v3202_v51 = vpop.f32.mrb[21].mxu1  ;;  %v3211_v27 = vadd.f32 %v5117_v26, %v7186_v33 }
 0x931   : > { %v3149_v58 = vpop.f32.mrb[24].mxu0  ;;  %v5118_v49 = vpop.f32.mrb[22].mxu1  ;;  %v3203_v62 = vadd.f32 %v3202_v51, %v3046_v38 }
 0x932   : > { %v3150_v54 = vadd.f32 %v3149_v58, %v3046_v38  ;;  %v3214_v28 = vadd.f32 %v5118_v49, %v7184_v53  ;;  %v3151_v44 = vpop.f32.mrb[25].mxu0  ;;  %v3205_v18 = vpop.f32.mrb[23].mxu1  ;;  %v3245_v19 = vadd.f32 %v7194_v6, %v3211_v27 }
 0x933   : > { %v3153_v42 = vpop.f32.mrb[26].mxu0  ;;  %v3206_v15 = vadd.f32 %v3205_v18, %v3051_v3  ;;  %v3152_v32 = vadd.f32 %v3151_v44, %v3046_v38  ;;  %v3239_v31 = vadd.f32 %v7182_v1, %v3203_v62 }
 0x934   : > { %v3237_v40 = vadd.f32 %v7182_v1, %v3150_v54  ;;  %v3248_v55 = vadd.f32 %v7190_v14, %v3214_v28  ;;  %v3154_v37 = vadd.f32 %v3153_v42, %v3051_v3  ;;  %v3155_v16 = vpop.f32.mrb[27].mxu0  ;;  %v3257_v8 = vmax.f32 %v3245_v19, 0.0 }
 0x935   : > { %v3156_v30 = vadd.f32 %v3155_v16, %v3051_v3  ;;  %v3242_v9 = vadd.f32 %v7180_v41, %v3206_v15  ;;  %v3238_v60 = vadd.f32 %v7182_v1, %v3152_v32  ;;  %v3251_v29 = vmax.f32 %v3239_v31, 0.0  ;;  %v7306_v16 = vpop.permute.xlu1 %5368 }
 0x936   : > { %v3249_v4 = vmax.f32 %v3237_v40, 0.0  ;;  %v3240_v59 = vadd.f32 %v7180_v41, %v3154_v37  ;;  %v3260_v11 = vmax.f32 %v3248_v55, 0.0  ;;  %v7214_v21 = vmul.f32 %v3257_v8, %v5865_v57 }
 0x937   : > { %v3241_v36 = vadd.f32 %v7180_v41, %v3156_v30  ;;  %v3254_v20 = vmax.f32 %v3242_v9, 0.0  ;;  %v3250_v50 = vmax.f32 %v3238_v60, 0.0  ;;  %v7245_v0 = vmul.f32 %v3251_v29, %v5865_v57 }
 0x938   : > { %v3252_v12 = vmax.f32 %v3240_v59, 0.0  ;;  %v7199_v43 = vmul.f32 %v3249_v4, %v5857_v48  ;;  %v7207_v61 = vmul.f32 %v3260_v11, %v5865_v57  ;;  %v7320_v11 = vpop.permute.xlu0 %5363  ;;  %v5370_v29 = vunpack.i.l.bf16 %v7306_v16 }
 0x939   : > { %v3159_v5 = vpop.f32.mrb[28].mxu0  ;;  %v3253_v10 = vmax.f32 %v3241_v36, 0.0  ;;  %v7239_v13 = vmul.f32 %v3254_v20, %v5865_v57  ;;  %v7248_v63 = vmul.f32 %v3250_v50, %v5906_v22  ;;  %v7312_v4 = vpop.permute.xlu1 %5378  ;;  %v5365_v15 = vunpack.i.l.bf16 %v7320_v11 }
 0x93a   : > { %v7202_v46 = vmul.f32 %v3252_v12, %v5857_v48  ;;  %v7204_v47 = vpop.f32.mrb[29].mxu0  ;;  %v3278_v34 = vpack.c.bf16 %v7207_v61, %v7214_v21  ;;  %v3160_v38 = vadd.f32 %v3159_v5, %v7186_v33 }
 0x93b   : > { %v3163_v23 = vpop.f32.mrb[30].mxu0  ;;  %v7242_v56 = vmul.f32 %v3253_v10, %v5906_v22  ;;  %v3275_v25 = vpack.c.bf16 %v7239_v13, %v7245_v0  ;;  %v3162_v18 = vadd.f32 %v7204_v47, %v7186_v33 }
 0x93c   : > { %v3273_v17 = vpack.c.bf16 %v7202_v46, %v7199_v43  ;;  %v7211_v2 = vpop.f32.mrb[31].mxu0  ;;  %v3164_v3 = vadd.f32 %v3163_v23, %v7184_v53  ;;  %v3243_v51 = vadd.f32 %v7194_v6, %v3160_v38  ;;  %v7326_v5 = vpop.permute.xlu0 %5373 }
 0x93d   : > { %v3274_v24 = vpack.c.bf16 %v7242_v56, %v7248_v63  ;;  %v3166_v44 = vadd.f32 %v7211_v2, %v7184_v53  ;;  %v3244_v40 = vadd.f32 %v7194_v6, %v3162_v18  ;;  %v7318_v59 = vpop.permute.xlu1 %5388  ;;  %v5381_v18 = vunpack.i.h.bf16 %v7312_v4 }
 0x93e   : > { %3327 = vrot.lane.b32.xlu0 %v3273_v17, %s8356_s25  ;;  %3305 = vrot.lane.b32.xlu1 %v3273_v17, %s8344_s29  ;;  %v3246_v26 = vadd.f32 %v7190_v14, %v3164_v3  ;;  %v3255_v49 = vmax.f32 %v3243_v51, 0.0  ;;  %v5375_v3 = vunpack.i.l.bf16 %v7326_v5 }
 0x93f   : > { %v3247_v42 = vadd.f32 %v7190_v14, %v3166_v44  ;;  %v3256_v37 = vmax.f32 %v3244_v40, 0.0 }
 0x940   : > { %v3258_v58 = vmax.f32 %v3246_v26, 0.0  ;;  %v7280_v54 = vmul.f32 %v3255_v49, %v5857_v48  ;;  %v7332_v47 = vpop.permute.xlu0 %5383 }
 0x941   : > { %v3259_v55 = vmax.f32 %v3247_v42, 0.0  ;;  %v7302_v33 = vmul.f32 %v3256_v37, %v5906_v22  ;;  %v7324_v12 = vpop.permute.xlu1 %5393 }
 0x942   : > { %3339 = vrot.lane.b32.xlu0 %v3278_v34, %s8356_s25  ;;  %3317 = vrot.lane.b32.xlu1 %v3278_v34, %s8344_s29  ;;  %v7277_v27 = vmul.f32 %v3258_v58, %v5857_v48 }
 0x943   : > { %v7299_v53 = vmul.f32 %v3259_v55, %v5906_v22 }
 0x944   : > { %8383 = vst [vmem:[#allocation13_spill] sm:$0xff] %v7277_v27  ;;  %v3276_v28 = vpack.c.bf16 %v7277_v27, %v7280_v54  ;;  %v5376_v27 = vunpack.i.h.bf16 %v7326_v5  ;;  %v5385_v5 = vunpack.i.l.bf16 %v7332_v47 }
 0x945   : > { %8384 = vst [vmem:[#allocation14_spill] sm:$0xff] %v7299_v53  ;;  %v3277_v19 = vpack.c.bf16 %v7299_v53, %v7302_v33  ;;  %v7330_v8 = vpop.permute.xlu1 %5398 }
 0x946   : > { %3369 = vrot.lane.b32.xlu0 %v3273_v17, %s8351_s28  ;;  %3349 = vrot.lane.b32.xlu1 %v3273_v17, %s8346_s4 }
 0x94a   : > { %3387 = vrot.lane.b32.xlu0 %v3273_v17, %s8343_s17  ;;  %3361 = vrot.lane.b32.xlu1 %v3278_v34, %s8346_s4 }
 0x94e   : > { %3399 = vrot.lane.b32.xlu0 %v3278_v34, %s8343_s17  ;;  %3379 = vrot.lane.b32.xlu1 %v3278_v34, %s8351_s28 }
 0x952   : > { %3431 = vrot.lane.b32.xlu0 %v3273_v17, %s8345_s0  ;;  %3409 = vrot.lane.b32.xlu1 %v3273_v17, %s8348_s24 }
 0x956   : > { %3443 = vrot.lane.b32.xlu0 %v3278_v34, %s8345_s0  ;;  %3421 = vrot.lane.b32.xlu1 %v3278_v34, %s8348_s24 }
 0x95a   : > { %3465 = vrot.lane.b32.xlu0 %v3278_v34, %s8349_s23  ;;  %3539 = vrot.lane.b32.xlu1 %v3273_v17, %s8347_s30 }
 0x95e   : > { %3551 = vrot.lane.b32.xlu0 %v3278_v34, %s8347_s30  ;;  %3453 = vrot.lane.b32.xlu1 %v3273_v17, %s8349_s23 }
 0x962   : > { %3307 = vrot.lane.b32.xlu0 %v3274_v24, %s8344_s29  ;;  %3309 = vrot.lane.b32.xlu1 %v3275_v25, %s8344_s29 }
 0x966   : > { %3331 = vrot.lane.b32.xlu0 %v3275_v25, %s8356_s25  ;;  %3329 = vrot.lane.b32.xlu1 %v3274_v24, %s8356_s25 }
 0x96a   : > { %3351 = vrot.lane.b32.xlu0 %v3274_v24, %s8346_s4  ;;  %3353 = vrot.lane.b32.xlu1 %v3275_v25, %s8346_s4 }
 0x96e   : > { %3373 = vrot.lane.b32.xlu0 %v3275_v25, %s8351_s28  ;;  %3371 = vrot.lane.b32.xlu1 %v3274_v24, %s8351_s28 }
 0x972   : > { %3391 = vrot.lane.b32.xlu0 %v3275_v25, %s8343_s17  ;;  %3389 = vrot.lane.b32.xlu1 %v3274_v24, %s8343_s17 }
 0x976   : > { %3411 = vrot.lane.b32.xlu0 %v3274_v24, %s8348_s24  ;;  %3413 = vrot.lane.b32.xlu1 %v3275_v25, %s8348_s24 }
 0x97a   : > { %3435 = vrot.lane.b32.xlu0 %v3275_v25, %s8345_s0  ;;  %3433 = vrot.lane.b32.xlu1 %v3274_v24, %s8345_s0 }
 0x97e   : > { %3541 = vrot.lane.b32.xlu0 %v3274_v24, %s8347_s30  ;;  %3457 = vrot.lane.b32.xlu1 %v3275_v25, %s8349_s23 }
 0x982   : > { %3455 = vrot.lane.b32.xlu0 %v3274_v24, %s8349_s23  ;;  %3543 = vrot.lane.b32.xlu1 %v3275_v25, %s8347_s30 }
 0x986   : > { %3335 = vrot.lane.b32.xlu0 %v3276_v28, %s8356_s25  ;;  %3313 = vrot.lane.b32.xlu1 %v3276_v28, %s8344_s29 }
 0x98a   : > { %3395 = vrot.lane.b32.xlu0 %v3276_v28, %s8343_s17  ;;  %3357 = vrot.lane.b32.xlu1 %v3276_v28, %s8346_s4 }
 0x98e   : > { %3439 = vrot.lane.b32.xlu0 %v3276_v28, %s8345_s0  ;;  %3375 = vrot.lane.b32.xlu1 %v3276_v28, %s8351_s28 }
 0x992   : > { %3547 = vrot.lane.b32.xlu0 %v3276_v28, %s8347_s30  ;;  %3417 = vrot.lane.b32.xlu1 %v3276_v28, %s8348_s24 }
 0x996   : > { %3461 = vrot.lane.b32.xlu0 %v3276_v28, %s8349_s23  ;;  %3337 = vrot.lane.b32.xlu1 %v3277_v19, %s8356_s25 }
 0x99a   : > { %3315 = vrot.lane.b32.xlu0 %v3277_v19, %s8344_s29  ;;  %3397 = vrot.lane.b32.xlu1 %v3277_v19, %s8343_s17 }
 0x99e   : > { %3359 = vrot.lane.b32.xlu0 %v3277_v19, %s8346_s4  ;;  %3441 = vrot.lane.b32.xlu1 %v3277_v19, %s8345_s0 }
 0x9a2   : > { %3377 = vrot.lane.b32.xlu0 %v3277_v19, %s8351_s28  ;;  %3549 = vrot.lane.b32.xlu1 %v3277_v19, %s8347_s30 }
 0x9a6   : > { %3419 = vrot.lane.b32.xlu0 %v3277_v19, %s8348_s24  ;;  %3463 = vrot.lane.b32.xlu1 %v3277_v19, %s8349_s23 }
 0x9b0   : > { %v3306_v23 = vpop.permute.xlu1 %3305  ;;  %v3328_v17 = vpop.permute.xlu0 %3327 }
 0x9b1   : > { %v3319_v32 = vsel %vm816_vm0, %v5365_v15, %v3306_v23  ;;  %v3341_v24 = vsel %vm832_vm1, %v5370_v29, %v3328_v17 }
 0x9b4   : > { %v7334_v2 = vpop.permute.xlu1 %3317  ;;  %v7336_v34 = vpop.permute.xlu0 %3339 }
 0x9b5   : > { %3567 = vrot.lane.b32.xlu0 %v7334_v2, %s8347_s30 }
 0x9b8   : > { %v3350_v30 = vpop.permute.xlu1 %3349  ;;  %v3370_v62 = vpop.permute.xlu0 %3369 }
 0x9b9   : > { %3601 = vrot.lane.b32.xlu1 %v3370_v62, %s8347_s30  ;;  %3553 = vrot.lane.b32.xlu0 %v3319_v32, %s8347_s30  ;;  %v3363_v51 = vsel %vm848_vm3, %v5375_v3, %v3350_v30 }
 0x9bc   : > { %v7344_v9 = vpop.permute.xlu1 %3361  ;;  %v7346_v36 = vpop.permute.xlu0 %3387 }
 0x9c0   : > { %v7348_v31 = vpop.permute.xlu1 %3379  ;;  %v7350_v60 = vpop.permute.xlu0 %3399 }
 0x9c1   : > { %3615 = vrot.lane.b32.xlu1 %v7348_v31, %s8347_s30  ;;  %v3408_v55 = vsel %vm8385_vm2, %v7350_v60, %v5381_v18 }
 0x9c4   : > { %v7354_v20 = vpop.permute.xlu1 %3409  ;;  %v7356_v10 = vpop.permute.xlu0 %3431 }
 0x9c5   : > { %3617 = vrot.lane.b32.xlu1 %v7346_v36, %s8347_s30 }
 0x9c8   : > { %v7361_v50 = vpop.permute.xlu1 %3421  ;;  %v7363_v25 = vpop.permute.xlu0 %3443 }
 0x9c9   : > { %3569 = vrot.lane.b32.xlu1 %v3341_v24, %s8347_s30 }
 0x9cc   : > { %v3540_v38 = vpop.permute.xlu1 %3539  ;;  %v7368_v26 = vpop.permute.xlu0 %3465 }
 0x9cd   : > { %3585 = vrot.lane.b32.xlu1 %v3363_v51, %s8347_s30 }
 0x9d0   : > { %v7372_v58 = vpop.permute.xlu1 %3453  ;;  %v7374_v49 = vpop.permute.xlu0 %3551 }
 0x9d4   : > { %v3310_v28 = vpop.permute.xlu1 %3309  ;;  %v3308_v44 = vpop.permute.xlu0 %3307 }
 0x9d5   : > { %3559 = vrot.lane.b32.xlu1 %v3310_v28, %s8347_s30  ;;  %v3321_v15 = vsel %vm816_vm0, %v3308_v44, %v3310_v28 }
 0x9d8   : > { %v3330_v42 = vpop.permute.xlu1 %3329  ;;  %v7378_v40 = vpop.permute.xlu0 %3331 }
 0x9d9   : > { %3631 = vrot.lane.b32.xlu1 %v3408_v55, %s8347_s30  ;;  %v3342_v24 = vsel %vm832_vm1, %v3328_v17, %v3330_v42  ;;  %v3320_v55 = vsel %vm816_vm0, %v3306_v23, %v3308_v44  ;;  %v3343_v17 = vsel %vm832_vm1, %v3330_v42, %v7378_v40 }
 0x9dc   : > { %v7383_v37 = vpop.permute.xlu1 %3353  ;;  %v3352_v19 = vpop.permute.xlu0 %3351 }
 0x9dd   : > { %3557 = vrot.lane.b32.xlu1 %v3321_v15, %s8347_s30  ;;  %v3364_v18 = vsel %vm848_vm3, %v3350_v30, %v3352_v19  ;;  %v3365_v44 = vsel %vm848_vm3, %v3352_v19, %v7383_v37 }
 0x9e0   : > { %v3372_v32 = vpop.permute.xlu1 %3371  ;;  %v3374_v29 = vpop.permute.xlu0 %3373 }
 0x9e1   : > { %3571 = vrot.lane.b32.xlu1 %v3342_v24, %s8347_s30  ;;  %3607 = vrot.lane.b32.xlu0 %v3374_v29, %s8347_s30  ;;  %v3381_v7 = vsel %vm8386_vm9, %v3370_v62, %v3372_v32  ;;  %v5395_v62 = vunpack.i.l.bf16 %v7324_v12  ;;  %vm8393_vm9 = vmmov %vm8385_vm2 }
 0x9e4   : > { %v3390_v3 = vpop.permute.xlu1 %3389  ;;  %v3392_v51 = vpop.permute.xlu0 %3391 }
 0x9e5   : > { %3587 = vrot.lane.b32.xlu1 %v3364_v18, %s8347_s30  ;;  %3555 = vrot.lane.b32.xlu0 %v3320_v55, %s8347_s30  ;;  %v3404_v23 = vsel %vm8387_vm12, %v3390_v3, %v3392_v51  ;;  %v3382_v55 = vsel %vm8388_vm4, %v3372_v32, %v3374_v29  ;;  %v3403_v52 = vsel %vm8389_vm5, %v7346_v36, %v3390_v3  ;;  %v5380_v32 = vunpack.i.l.bf16 %v7312_v4 }
 0x9e6   : > { %v5366_v36 = vunpack.i.h.bf16 %v7320_v11  ;;  %vm8394_vm12 = vcmask 736256  }
 0x9e7   : > { %vm8395_vm4 = vmmov %vm8394_vm12 }
 0x9e8   : > { %v7394_v28 = vpop.permute.xlu1 %3413  ;;  %v3412_v15 = vpop.permute.xlu0 %3411  ;;  %vm8396_vm5 = vmmov %vm8395_vm4 }
 0x9e9   : > { %3603 = vrot.lane.b32.xlu1 %v3381_v7, %s8347_s30  ;;  %3573 = vrot.lane.b32.xlu0 %v3343_v17, %s8347_s30  ;;  %v3426_v18 = vsel %vm897_vm10, %v3412_v15, %v7394_v28  ;;  %v3681_v17 = vsel %vm1030_vm14, %v5395_v62, %v3540_v38  ;;  %v3425_v62 = vsel %vm897_vm10, %v7354_v20, %v3412_v15  ;;  %v5371_v15 = vunpack.i.h.bf16 %v7306_v16 }
 0x9ea   : > { %v5396_v16 = vunpack.i.h.bf16 %v7324_v12 }
 0x9ec   : > { %v7401_v24 = vpop.permute.xlu1 %3433  ;;  %v7403_v30 = vpop.permute.xlu0 %3435 }
 0x9ed   : > { %3621 = vrot.lane.b32.xlu1 %v3404_v23, %s8347_s30  ;;  %3589 = vrot.lane.b32.xlu0 %v3365_v44, %s8347_s30 }
 0x9f0   : > { %v7411_v42 = vpop.permute.xlu1 %3457  ;;  %v7413_v7 = vpop.permute.xlu0 %3541 }
 0x9f1   : > { %3637 = vrot.lane.b32.xlu1 %v3426_v18, %s8347_s30  ;;  %3605 = vrot.lane.b32.xlu0 %v3382_v55, %s8347_s30  ;;  %v3682_v19 = vsel %vm1030_vm14, %v3540_v38, %v7413_v7  ;;  %v3405_v55 = vsel %vm8390_vm6, %v3392_v51, %v5380_v32  ;;  %vm8397_vm6 = vmmov %vm8395_vm4 }
 0x9f2   : > { %3795 = vmatprep.subr.bf16.mxu0 %v3682_v19 }
 0x9f3   : > { %3796 = vmatpush1.bf16.msra.mxu0 %v3681_v17 }
 0x9f4   : > { %v7423_v23 = vpop.permute.xlu1 %3543  ;;  %v7425_v44 = vpop.permute.xlu0 %3455 }
 0x9f5   : > { %3619 = vrot.lane.b32.xlu0 %v3403_v52, %s8347_s30 }
 0x9f8   : > { %v3314_v29 = vpop.permute.xlu1 %3313  ;;  %v3336_v18 = vpop.permute.xlu0 %3335 }
 0x9f9   : > { %3623 = vrot.lane.b32.xlu0 %v3405_v55, %s8347_s30  ;;  %v3322_v32 = vsel %vm816_vm0, %v5366_v36, %v3314_v29  ;;  %v3344_v35 = vsel %vm832_vm1, %v5371_v15, %v3336_v18 }
 0x9fc   : > { %v3358_v19 = vpop.permute.xlu1 %3357  ;;  %v3396_v38 = vpop.permute.xlu0 %3395 }
 0x9fd   : > { %3635 = vrot.lane.b32.xlu0 %v3425_v62, %s8347_s30  ;;  %v3366_v36 = vsel %vm848_vm3, %v5376_v27, %v3358_v19 }
 0xa00   : > { %v3376_v17 = vpop.permute.xlu1 %3375  ;;  %v7436_v45 = vpop.permute.xlu0 %3439 }
 0xa01   : > { %3609 = vrot.lane.b32.xlu0 %v3376_v17, %s8347_s30 }
 0xa04   : > { %v7439_v52 = vpop.permute.xlu1 %3417  ;;  %v3548_v4 = vpop.permute.xlu0 %3547 }
 0xa05   : > { %3625 = vrot.lane.b32.xlu0 %v3396_v38, %s8347_s30  ;;  %v3684_v12 = vsel %vm1030_vm14, %v5396_v16, %v3548_v4 }
 0xa08   : > { %v3338_v3 = vpop.permute.xlu1 %3337  ;;  %v7443_v51 = vpop.permute.xlu0 %3461 }
 0xa09   : > { %3561 = vrot.lane.b32.xlu0 %v3322_v32, %s8347_s30  ;;  %v3346_v27 = vsel %vm832_vm1, %v3338_v3, %v7336_v34 }
 0xa0c   : > { %v3398_v55 = vpop.permute.xlu1 %3397  ;;  %v3316_v62 = vpop.permute.xlu0 %3315 }
 0xa0d   : > { %3577 = vrot.lane.b32.xlu0 %v3344_v35, %s8347_s30  ;;  %v3323_v53 = vsel %vm816_vm0, %v3314_v29, %v3316_v62  ;;  %v3324_v35 = vsel %vm816_vm0, %v3316_v62, %v7334_v2  ;;  %v3345_v29 = vsel %vm832_vm1, %v3336_v18, %v3338_v3  ;;  %v3448_v3 = vsel %vm913_vm11, %v7401_v24, %v7403_v30 }
 0xa0e   : > { %3563 = vrot.lane.b32.xlu1 %v3323_v53, %s8347_s30 }
 0xa10   : > { %v7453_v11 = vpop.permute.xlu1 %3441  ;;  %v3360_v2 = vpop.permute.xlu0 %3359 }
 0xa11   : > { %3593 = vrot.lane.b32.xlu0 %v3366_v36, %s8347_s30  ;;  %v3368_v15 = vsel %vm848_vm3, %v3360_v2, %v7344_v9 }
 0xa12   : > { %3633 = vrot.lane.b32.xlu1 %v7354_v20, %s8347_s30  ;;  %v3427_v20 = vsel %vm897_vm10, %v7394_v28, %v5385_v5 }
 0xa14   : > { %v7460_v32 = vpop.permute.xlu1 %3549  ;;  %v3378_v62 = vpop.permute.xlu0 %3377 }
 0xa15   : > { %3565 = vrot.lane.b32.xlu0 %v3324_v35, %s8347_s30  ;;  %v3685_v53 = vsel %vm1030_vm14, %v3548_v4, %v7460_v32  ;;  %v5386_v4 = vunpack.i.h.bf16 %v7332_v47  ;;  %v3383_v18 = vsel %vm8391_vm7, %v3376_v17, %v3378_v62  ;;  %v3447_v47 = vsel %vm913_vm11, %v7356_v10, %v7401_v24  ;;  %vm8398_vm7 = vmmov %vm8395_vm4 }
 0xa16   : > { %3797 = vmatprep.subr.bf16.mxu0 %v3685_v53  ;;  %3581 = vrot.lane.b32.xlu1 %v3346_v27, %s8347_s30  ;;  %v3406_v17 = vsel %vm8385_vm2, %v3396_v38, %v3398_v55  ;;  %v3407_v24 = vsel %vm8393_vm9, %v3398_v55, %v7350_v60  ;;  %v5390_v53 = vunpack.i.l.bf16 %v7318_v59  ;;  %v3451_v27 = vsel %vm913_vm11, %v7453_v11, %v7363_v25  ;;  %vm8402_vm9 = vmmov %vm8385_vm2 }
 0xa17   : > { %3798 = vmatpush1.bf16.msra.mxu0 %v3684_v12  ;;  %v3430_v28 = vsel %vm897_vm10, %v7361_v50, %v5386_v4  ;;  %v5401_v4 = vunpack.i.h.bf16 %v7330_v8 }
 0xa18   : > { %v3464_v36 = vpop.permute.xlu1 %3463  ;;  %v3420_v35 = vpop.permute.xlu0 %3419 }
 0xa19   : > { %3639 = vrot.lane.b32.xlu0 %v3427_v20, %s8347_s30  ;;  %v3428_v38 = vsel %vm897_vm10, %v7439_v52, %v3420_v35  ;;  %v5400_v20 = vunpack.i.l.bf16 %v7330_v8  ;;  %v3484_v8 = vld [vmem:[%s8264_s15 + $0x8] sm:$0xff] }
 0xa1a   : > { %3575 = vrot.lane.b32.xlu1 %v7378_v40, %s8347_s30  ;;  %v3367_v40 = vsel %vm848_vm3, %v3358_v19, %v3360_v2  ;;  %v3384_v19 = vsel %vm8392_vm8, %v3378_v62, %v7348_v31  ;;  %vm8399_vm8 = vmmov %vm8395_vm4 }
 0xa1b   : > { %v3474_v62 = vsel %vm8399_vm8, %v7368_v26, %v5401_v4 }
 0xa1d   : > { %3579 = vrot.lane.b32.xlu0 %v3345_v29, %s8347_s30  ;;  %v3483_v29 = vld [vmem:[%s8264_s15] sm:$0xff] }
 0xa1e   : > { %3597 = vrot.lane.b32.xlu1 %v3368_v15, %s8347_s30  ;;  %v3473_v15 = vsel %vm8398_vm7, %v3464_v36, %v7368_v26  ;;  %v3486_v26 = vld [vmem:[%s8264_s15 + $0x18] sm:$0xff] }
 0xa21   : > { %3641 = vrot.lane.b32.xlu0 %v7439_v52, %s8347_s30  ;;  %v5458_v52 = vld [vmem:[%s8263_s14 + $0x4] ss:$12 sps:$4 sm:$0xff]  }
 0xa22   : > { %3647 = vrot.lane.b32.xlu1 %v3430_v28, %s8347_s30  ;;  %3827 = vmatprep.mubr.bf16.mxu0 %v5458_v52 }
 0xa23   : > { %3933 = vmatprep.mubr.bf16.mxu1 %v5458_v52 }
 0xa25   : > { %3595 = vrot.lane.b32.xlu0 %v3367_v40, %s8347_s30 }
 0xa26   : > { %3611 = vrot.lane.b32.xlu1 %v3383_v18, %s8347_s30 }
 0xa29   : > { %3651 = vrot.lane.b32.xlu0 %v3447_v47, %s8347_s30 }
 0xa2a   : > { %3653 = vrot.lane.b32.xlu1 %v3448_v3, %s8347_s30 }
 0xa2b   : > { %v7505_v16 = vpop.permute.xlu1 %3601 }
 0xa2d   : > { %3613 = vrot.lane.b32.xlu0 %v3384_v19, %s8347_s30 }
 0xa2e   : > { %3627 = vrot.lane.b32.xlu1 %v3406_v17, %s8347_s30 }
 0xa31   : > { %3583 = vrot.lane.b32.xlu0 %v7336_v34, %s8347_s30  ;;  %v3449_v34 = vsel %vm913_vm11, %v7403_v30, %v5390_v53  ;;  %v3450_v30 = vsel %vm913_vm11, %v7436_v45, %v7453_v11  ;;  %v3472_v11 = vsel %vm8396_vm5, %v7443_v51, %v3464_v36 }
 0xa32   : > { %3649 = vrot.lane.b32.xlu1 %v7356_v10, %s8347_s30  ;;  %v3429_v10 = vsel %vm897_vm10, %v3420_v35, %v7361_v50  ;;  %v3683_v35 = vsel %vm1030_vm14, %v7413_v7, %v7423_v23 }
 0xa33   : > { %v7513_v31 = vpop.permute.xlu1 %3615 }
 0xa35   : > { %3629 = vrot.lane.b32.xlu0 %v3407_v24, %s8347_s30 }
 0xa36   : > { %3643 = vrot.lane.b32.xlu1 %v3428_v38, %s8347_s30 }
 0xa37   : > { %v7525_v60 = vpop.permute.xlu1 %3617 }
 0xa39   : > { %3655 = vrot.lane.b32.xlu0 %v3449_v34, %s8347_s30 }
 0xa3a   : > { %3591 = vrot.lane.b32.xlu1 %v7383_v37, %s8347_s30  ;;  %v5391_v37 = vunpack.i.h.bf16 %v7318_v59  ;;  %v3469_v59 = vsel %vm8394_vm12, %v7372_v58, %v7425_v44  ;;  %vm8403_vm12 = vcmask 891904  }
 0xa3b   : > { %v7538_v55 = vpop.permute.xlu1 %3569  ;;  %vm8405_vm5 = vmmov %vm8403_vm12 }
 0xa3c   : > { %v3452_v50 = vsel %vm913_vm11, %v7363_v25, %v5391_v37  ;;  %v3470_v25 = vsel %vm8395_vm4, %v7425_v44, %v7411_v42  ;;  %vm8404_vm4 = vmmov %vm8385_vm2 }
 0xa3d   : > { %3645 = vrot.lane.b32.xlu0 %v3429_v10, %s8347_s30 }
 0xa3e   : > { %3659 = vrot.lane.b32.xlu1 %v3450_v30, %s8347_s30 }
 0xa3f   : > { %v7553_v5 = vpop.permute.xlu1 %3585 }
 0xa41   : > { %3657 = vrot.lane.b32.xlu0 %v7436_v45, %s8347_s30  ;;  %v7555_v45 = vpop.permute.xlu0 %3567 }
 0xa42   : > { %3663 = vrot.lane.b32.xlu1 %v3452_v50, %s8347_s30 }
 0xa45   : > { %3661 = vrot.lane.b32.xlu0 %v3451_v27, %s8347_s30  ;;  %v3554_v2 = vpop.permute.xlu0 %3553 }
 0xa46   : > { %3667 = vrot.lane.b32.xlu1 %v3469_v59, %s8347_s30 }
 0xa47   : > { %v7561_v12 = vpop.permute.xlu1 %3559 }
 0xa49   : > { %3599 = vrot.lane.b32.xlu0 %v7344_v9, %s8347_s30  ;;  %v3471_v9 = vsel %vm8397_vm6, %v7411_v42, %v5400_v20  ;;  %vm8406_vm6 = vmmov %vm8385_vm2 }
 0xa4a   : > { %3665 = vrot.lane.b32.xlu1 %v7372_v58, %s8347_s30 }
 0xa4b   : > { %v7573_v58 = vpop.permute.xlu1 %3631 }
 0xa4d   : > { %3669 = vrot.lane.b32.xlu0 %v3470_v25, %s8347_s30 }
 0xa4e   : > { %3675 = vrot.lane.b32.xlu1 %v3472_v11, %s8347_s30 }
 0xa4f   : > { %v7585_v42 = vpop.permute.xlu1 %3557 }
 0xa51   : > { %3671 = vrot.lane.b32.xlu0 %v3471_v9, %s8347_s30 }
 0xa52   : > { %3673 = vrot.lane.b32.xlu1 %v7443_v51, %s8347_s30  ;;  %v3485_v51 = vld [vmem:[%s8264_s15 + $0x10] sm:$0xff] }
 0xa53   : > { %v3608_v44 = vpop.permute.xlu0 %3607  ;;  %v3572_v36 = vpop.permute.xlu1 %3571 }
 0xa54   : > { %v3693_v4 = vsel %vm1030_vm14, %v7538_v55, %v3572_v36 }
 0xa55   : > { %3677 = vrot.lane.b32.xlu0 %v3473_v15, %s8347_s30 }
 0xa56   : > { %3489 = vperm.xlu1 %5281, %v3483_v29  }
 0xa57   : > { %v3556_v28 = vpop.permute.xlu0 %3555  ;;  %v3588_v38 = vpop.permute.xlu1 %3587 }
 0xa58   : > { %v3688_v40 = vsel %vm1030_vm14, %v3556_v28, %v7585_v42  ;;  %v3687_v18 = vsel %vm1030_vm14, %v3554_v2, %v3556_v28  ;;  %v3699_v55 = vsel %vm1030_vm14, %v7553_v5, %v3588_v38 }
 0xa59   : > { %3679 = vrot.lane.b32.xlu0 %v3474_v62, %s8347_s30  ;;  %3799 = vmatprep.subr.bf16.mxu0 %v3688_v40 }
 0xa5a   : > { %3499 = vperm.xlu1 %5281, %v3485_v51   ;;  %3800 = vmatpush1.bf16.msra.mxu0 %v3687_v18 }
 0xa5b   : > { %v7599_v47 = vpop.permute.xlu0 %3573  ;;  %v3604_v10 = vpop.permute.xlu1 %3603 }
 0xa5d   : > { %3494 = vperm.xlu0 %5280, %v3484_v8  }
 0xa5e   : > { %5408 = vrot.lane.b32.xlu1 %v8355_v39, %s8356_s25 }
 0xa5f   : > { %v7604_v3 = vpop.permute.xlu0 %3589  ;;  %v3622_v30 = vpop.permute.xlu1 %3621 }
 0xa60   : > { %v3700_v18 = vsel %vm1030_vm14, %v3588_v38, %v7604_v3 }
 0xa61   : > { %3504 = vperm.xlu0 %5280, %v3486_v26  }
 0xa62   : > { %5423 = vrot.lane.b32.xlu1 %v8355_v39, %s8348_s24 }
 0xa63   : > { %v3606_v19 = vpop.permute.xlu0 %3605  ;;  %v7616_v27 = vpop.permute.xlu1 %3637 }
 0xa64   : > { %v3707_v17 = vsel %vm1030_vm14, %v3606_v19, %v3608_v44  ;;  %v3694_v44 = vsel %vm1030_vm14, %v3572_v36, %v7599_v47 }
 0xa65   : > { %5032 = vmatprep.subr.bf16.mxu1 %v3707_v17  ;;  %5403 = vrot.lane.b32.xlu0 %v8355_v39, %s8344_s29 }
 0xa66   : > { %5033 = vmatpush3.bf16.msra.mxu1 %v3683_v35  ;;  %5433 = vrot.lane.b32.xlu1 %v8355_v39, %s8345_s0 }
 0xa67   : > { %v7610_v24 = vpop.permute.xlu0 %3619 }
 0xa69   : > { %5413 = vrot.lane.b32.xlu0 %v8355_v39, %s8346_s4 }
 0xa6b   : > { %v3624_v53 = vpop.permute.xlu0 %3623 }
 0xa6d   : > { %5418 = vrot.lane.b32.xlu0 %v8355_v39, %s8343_s17 }
 0xa6f   : > { %v7612_v34 = vpop.permute.xlu0 %3635 }
 0xa71   : > { %5428 = vrot.lane.b32.xlu0 %v8355_v39, %s8347_s30 }
 0xa73   : > { %v3610_v52 = vpop.permute.xlu0 %3609 }
 0xa75   : > { %5438 = vrot.lane.b32.xlu0 %v8355_v39, %s8349_s23 }
 0xa77   : > { %v7614_v37 = vpop.permute.xlu0 %3625 }
 0xa7b   : > { %v3562_v50 = vpop.permute.xlu0 %3561 }
 0xa7f   : > { %v3578_v59 = vpop.permute.xlu0 %3577 }
 0xa80   : > { %v3564_v25 = vpop.permute.xlu1 %3563 }
 0xa81   : > { %v3690_v9 = vsel %vm1030_vm14, %v3562_v50, %v3564_v25 }
 0xa83   : > { %v3594_v11 = vpop.permute.xlu0 %3593 }
 0xa84   : > { %v7618_v7 = vpop.permute.xlu1 %3633 }
 0xa87   : > { %v7620_v23 = vpop.permute.xlu0 %3565 }
 0xa88   : > { %v7622_v20 = vpop.permute.xlu1 %3581  ;;  %v3691_v2 = vsel %vm1030_vm14, %v3564_v25, %v7620_v23 }
 0xa89   : > { %3801 = vmatprep.subr.bf16.mxu0 %v3691_v2 }
 0xa8a   : > { %3802 = vmatpush1.bf16.msra.mxu0 %v3690_v9  ;;  %v3705_v9 = vsel %vm1030_vm14, %v7505_v16, %v3604_v10  ;;  %v3712_v16 = vsel %vm1030_vm14, %v7610_v24, %v3622_v30 }
 0xa8b   : > { %3803 = vmatprep.subr.bf16.mxu0 %v3694_v44  ;;  %v3640_v29 = vpop.permute.xlu0 %3639 }
 0xa8c   : > { %v7629_v15 = vpop.permute.xlu1 %3575 }
 0xa8e   : > { %3804 = vmatpush1.bf16.msra.mxu0 %v3693_v4 }
 0xa8f   : > { %v3580_v28 = vpop.permute.xlu0 %3579 }
 0xa90   : > { %v7633_v51 = vpop.permute.xlu1 %3597  ;;  %v3697_v62 = vsel %vm1030_vm14, %v3580_v28, %v7622_v20  ;;  %v3696_v40 = vsel %vm1030_vm14, %v3578_v59, %v3580_v28  ;;  %v3706_v59 = vsel %vm1030_vm14, %v3604_v10, %v3606_v19  ;;  %v3686_v19 = vsel %vm1030_vm14, %v7460_v32, %v7374_v49 }
 0xa91   : > { %3805 = vmatprep.subr.bf16.mxu0 %v3697_v62  ;;  %v3713_v10 = vsel %vm1030_vm14, %v3622_v30, %v3624_v53 }
 0xa92   : > { %3806 = vmatpush1.bf16.msra.mxu0 %v3696_v40 }
 0xa93   : > { %3807 = vmatprep.subr.bf16.mxu0 %v3700_v18  ;;  %v7640_v8 = vpop.permute.xlu0 %3641 }
 0xa94   : > { %v3648_v26 = vpop.permute.xlu1 %3647 }
 0xa96   : > { %3808 = vmatpush1.bf16.msra.mxu0 %v3699_v55 }
 0xa97   : > { %v3596_v36 = vpop.permute.xlu0 %3595 }
 0xa98   : > { %v3612_v17 = vpop.permute.xlu1 %3611  ;;  %v3703_v35 = vsel %vm1030_vm14, %v3596_v36, %v7633_v51  ;;  %v3702_v50 = vsel %vm1030_vm14, %v3594_v11, %v3596_v36 }
 0xa99   : > { %3809 = vmatprep.subr.bf16.mxu0 %v3703_v35  ;;  %v3708_v11 = vsel %vm1030_vm14, %v3610_v52, %v3612_v17  ;;  %v3689_v52 = vsel %vm1030_vm14, %v7585_v42, %v7561_v12  ;;  %v3718_v12 = vsel %vm1030_vm14, %v7612_v34, %v7616_v27  ;;  %v3719_v42 = vsel %vm1030_vm14, %v7616_v27, %v3640_v29 }
 0xa9a   : > { %3810 = vmatpush1.bf16.msra.mxu0 %v3702_v50 }
 0xa9b   : > { %3811 = vmatprep.subr.bf16.mxu0 %v3706_v59  ;;  %v3652_v25 = vpop.permute.xlu0 %3651 }
 0xa9c   : > { %v3654_v2 = vpop.permute.xlu1 %3653 }
 0xa9e   : > { %3812 = vmatpush1.bf16.msra.mxu0 %v3705_v9 }
 0xa9f   : > { %v3614_v5 = vpop.permute.xlu0 %3613 }
 0xaa0   : > { %v3628_v38 = vpop.permute.xlu1 %3627  ;;  %v3709_v44 = vsel %vm1030_vm14, %v3612_v17, %v3614_v5  ;;  %v3710_v4 = vsel %vm1030_vm14, %v3614_v5, %v7513_v31  ;;  %v3711_v31 = vsel %vm1030_vm14, %v7525_v60, %v7610_v24  ;;  %v3692_v60 = vsel %vm1030_vm14, %v7620_v23, %v7555_v45 }
 0xaa1   : > { %3813 = vmatprep.subr.bf16.mxu0 %v3709_v44  ;;  %5034 = vmatprep.subr.bf16.mxu1 %v3710_v4  ;;  %v3714_v30 = vsel %vm1030_vm14, %v7614_v37, %v3628_v38  ;;  %v3717_v37 = vsel %vm1030_vm14, %v7618_v7, %v7612_v34  ;;  %v3695_v45 = vsel %vm1030_vm14, %v7599_v47, %v7629_v15 }
 0xaa2   : > { %3814 = vmatpush1.bf16.msra.mxu0 %v3708_v11  ;;  %5035 = vmatpush3.bf16.msra.mxu1 %v3686_v19  ;;  %v3724_v47 = vsel %vm1030_vm14, %v3652_v25, %v3654_v2  ;;  %v5461_v19 = vld [vmem:[%s8263_s14 + $0x18] ss:$12 sps:$4 sm:$0xff]  }
 0xaa3   : > { %3815 = vmatprep.subr.bf16.mxu0 %v3712_v16  ;;  %5036 = vmatprep.subr.bf16.mxu1 %v3713_v10  ;;  %v3584_v28 = vpop.permute.xlu0 %3583 }
 0xaa4   : > { %v3650_v62 = vpop.permute.xlu1 %3649  ;;  %v3698_v29 = vsel %vm1030_vm14, %v7622_v20, %v3584_v28 }
 0xaa6   : > { %3816 = vmatpush1.bf16.msra.mxu0 %v3711_v31  ;;  %5037 = vmatpush3.bf16.msra.mxu1 %v3689_v52 }
 0xaa7   : > { %v3630_v49 = vpop.permute.xlu0 %3629 }
 0xaa8   : > { %v3644_v32 = vpop.permute.xlu1 %3643  ;;  %v3715_v40 = vsel %vm1030_vm14, %v3628_v38, %v3630_v49  ;;  %v3716_v53 = vsel %vm1030_vm14, %v3630_v49, %v7573_v58 }
 0xaa9   : > { %3817 = vmatprep.subr.bf16.mxu0 %v3715_v40  ;;  %5038 = vmatprep.subr.bf16.mxu1 %v3716_v53  ;;  %v3720_v34 = vsel %vm1030_vm14, %v7640_v8, %v3644_v32  ;;  %v5463_v40 = vld [vmem:[%s8263_s14 + $0x20] ss:$12 sps:$4 sm:$0xff]  }
 0xaaa   : > { %3818 = vmatpush1.bf16.msra.mxu0 %v3714_v30  ;;  %5039 = vmatpush3.bf16.msra.mxu1 %v3692_v60 }
 0xaab   : > { %3819 = vmatprep.subr.bf16.mxu0 %v3718_v12  ;;  %5040 = vmatprep.subr.bf16.mxu1 %v3719_v42  ;;  %v3656_v58 = vpop.permute.xlu0 %3655 }
 0xaac   : > { %v3592_v24 = vpop.permute.xlu1 %3591  ;;  %v3725_v7 = vsel %vm1030_vm14, %v3654_v2, %v3656_v58  ;;  %v5456_v2 = vld [vmem:[%s8263_s14] ss:$12 sps:$4 sm:$0xff]  }
 0xaad   : > { %v3701_v20 = vsel %vm1030_vm14, %v7604_v3, %v3592_v24  ;;  %v5459_v3 = vld [vmem:[%s8263_s14 + $0x1c] ss:$12 sps:$4 sm:$0xff]  }
 0xaae   : > { %3820 = vmatpush1.bf16.msra.mxu0 %v3717_v37  ;;  %5041 = vmatpush3.bf16.msra.mxu1 %v3695_v45 }
 0xaaf   : > { %v3646_v23 = vpop.permute.xlu0 %3645 }
 0xab0   : > { %v3660_v18 = vpop.permute.xlu1 %3659  ;;  %v3721_v55 = vsel %vm1030_vm14, %v3644_v32, %v3646_v23  ;;  %v3722_v27 = vsel %vm1030_vm14, %v3646_v23, %v3648_v26  ;;  %v3723_v26 = vsel %vm1030_vm14, %v3650_v62, %v3652_v25  ;;  %v5462_v62 = vld [vmem:[%s8263_s14 + $0x8] ss:$12 sps:$4 sm:$0xff]  }
 0xab1   : > { %3821 = vmatprep.subr.bf16.mxu0 %v3721_v55  ;;  %5042 = vmatprep.subr.bf16.mxu1 %v3722_v27 }
 0xab2   : > { %3822 = vmatpush1.bf16.msra.mxu0 %v3720_v34  ;;  %5043 = vmatpush3.bf16.msra.mxu1 %v3698_v29 }
 0xab3   : > { %3823 = vmatprep.subr.bf16.mxu0 %v3724_v47  ;;  %5044 = vmatprep.subr.bf16.mxu1 %v3725_v7  ;;  %v3658_v15 = vpop.permute.xlu0 %3657 }
 0xab4   : > { %v3664_v36 = vpop.permute.xlu1 %3663  ;;  %v3726_v59 = vsel %vm1030_vm14, %v3658_v15, %v3660_v18 }
 0xab6   : > { %3824 = vmatpush1.bf16.msra.mxu0 %v3723_v26  ;;  %5045 = vmatpush3.bf16.msra.mxu1 %v3701_v20 }
 0xab7   : > { %v3662_v17 = vpop.permute.xlu0 %3661 }
 0xab8   : > { %v3668_v35 = vpop.permute.xlu1 %3667  ;;  %v3727_v8 = vsel %vm1030_vm14, %v3660_v18, %v3662_v17  ;;  %v3728_v50 = vsel %vm1030_vm14, %v3662_v17, %v3664_v36 }
 0xab9   : > { %3825 = vmatprep.subr.bf16.mxu0 %v3727_v8  ;;  %5046 = vmatprep.subr.bf16.mxu1 %v3728_v50 }
 0xaba   : > { %3826 = vmatpush1.bf16.msra.mxu0 %v3726_v59 }
 0xabb   : > { %v3600_v25 = vpop.permute.xlu0 %3599 }
 0xabc   : > { %v3704_v9 = vsel %vm1030_vm14, %v7633_v51, %v3600_v25  ;;  %v3666_v5 = vpop.permute.xlu1 %3665 }
 0xabd   : > { %3828 = vmatmul.mubr.bf16.vlgmr.msra.gmra.mrb[32].mxu0 %v5456_v2  ;;  %5047 = vmatpush3.bf16.msra.mxu1 %v3704_v9  ;;  %v3729_v11 = vsel %vm1030_vm14, %v3666_v5, %v3668_v35 }
 0xabe   : > { %3837 = vmatprep.mubr.bf16.mxu0 %v5459_v3 }
 0xabf   : > { %v3670_v38 = vpop.permute.xlu0 %3669 }
 0xac0   : > { %v3676_v44 = vpop.permute.xlu1 %3675  ;;  %3934 = vmatmul.mubr.bf16.vlgmr.msra.gmra.mrb[24].mxu1 %v5456_v2  ;;  %v3730_v4 = vsel %vm1030_vm14, %v3668_v35, %v3670_v38 }
 0xac1   : > { %3848 = vmatprep.subr.bf16.mxu0 %v3730_v4  ;;  %3941 = vmatprep.mubr.bf16.mxu1 %v5459_v3 }
 0xac2   : > { %3849 = vmatpush1.bf16.msra.mxu0 %v3729_v11 }
 0xac3   : > { %v3672_v16 = vpop.permute.xlu0 %3671 }
 0xac4   : > { %v3731_v51 = vsel %vm1030_vm14, %v3670_v38, %v3672_v16  ;;  %v3674_v10 = vpop.permute.xlu1 %3673 }
 0xac5   : > { %3838 = vmatmul.mubr.bf16.gmra.mrb[36].mxu0 %v5461_v19  ;;  %5119 = vmatprep.subr.bf16.mxu1 %v3731_v51  ;;  %v3732_v52 = vsel %vm1030_vm14, %v3674_v10, %v3676_v44 }
 0xac6   : > { %5120 = vmatpush3.bf16.msra.mxu1 %v3731_v51  ;;  %3880 = vmatprep.mubr.bf16.mxu0 %v8355_v39 }
 0xac7   : > { %v3678_v28 = vpop.permute.xlu0 %3677 }
 0xac8   : > { %3942 = vmatmul.mubr.bf16.gmra.mrb[28].mxu1 %v5461_v19  ;;  %v3733_v31 = vsel %vm1030_vm14, %v3676_v44, %v3678_v28 }
 0xac9   : > { %3850 = vmatprep.subr.bf16.mxu0 %v3733_v31  ;;  %5123 = vmatprep.mubr.msk.bf16.mxu1 %vm1742_vm15, %v5462_v62 }
 0xaca   : > { %3851 = vmatpush1.bf16.msra.mxu0 %v3732_v52 }
 0xacb   : > { %v3680_v49 = vpop.permute.xlu0 %3679 }
 0xacc   : > { %v3734_v32 = vsel %vm1030_vm14, %v3678_v28, %v3680_v49 }
 0xacd   : > { %4957 = vmatmul.mubr.msk.bf16.vlgmr.msra.gmra.mrb[32].mxu0 %vm1742_vm15, %v5462_v62  ;;  %5121 = vmatprep.subr.bf16.mxu1 %v3734_v32 }
 0xace   : > { %5122 = vmatpush3.bf16.msra.mxu1 %v3734_v32  ;;  %3890 = vmatprep.mubr.bf16.mxu0 %v8355_v39 }
 0xad1   : > { %5124 = vmatmul.mubr.msk.bf16.vlgmr.msra.gmra.mrb[32].mxu1 %vm1742_vm15, %v5463_v40 }
 0xad5   : > { %4958 = vmatmul.mubr.msk.bf16.gmra.mrb[36].mxu0 %vm1742_vm15, %v5463_v40  ;;  %v3490_v37 = vpop.permute.xlu1 %3489 }
 0xad9   : > { %v3500_v15 = vpop.permute.xlu1 %3499 }
 0xadc   : > { %v3495_v55 = vpop.permute.xlu0 %3494 }
 0xae0   : > { %v3505_v50 = vpop.permute.xlu0 %3504 }
 0xb93   : > { %v5048_v53 = vpop.f32.mrb[24].mxu1 }
 0xb94   : > { %v5049_v30 = vpop.f32.mrb[25].mxu1 }
 0xb95   : > { %v5050_v60 = vadd.f32 %v5049_v30, %v5048_v53  ;;  %v5051_v12 = vpop.f32.mrb[26].mxu1 }
 0xb96   : > { %v5052_v42 = vpop.f32.mrb[27].mxu1 }
 0xb97   : > { %v5053_v58 = vadd.f32 %v5052_v42, %v5051_v12  ;;  %v3936_v25 = vadd.f32 %v5050_v60, %v3490_v37 }
 0xb99   : > { %v3939_v10 = vadd.f32 %v5053_v58, %v3495_v55 }
 0xb9b   : > { %v5054_v24 = vpop.f32.mrb[28].mxu1 }
 0xb9c   : > { %v5055_v45 = vpop.f32.mrb[29].mxu1 }
 0xb9d   : > { %v5056_v23 = vadd.f32 %v5055_v45, %v5054_v24  ;;  %v5057_v18 = vpop.f32.mrb[30].mxu1 }
 0xb9e   : > { %v5058_v27 = vpop.f32.mrb[31].mxu1 }
 0xb9f   : > { %v5059_v29 = vadd.f32 %v5058_v27, %v5057_v18  ;;  %v3944_v8 = vadd.f32 %v5056_v23, %v3500_v15 }
 0xba0   : > { %v3882_v34 = vpop.f32.mrb[32].mxu0 }
 0xba1   : > { %v5145_v47 = vadd.f32 %v3882_v34, %v3490_v37  ;;  %v3884_v7 = vpop.f32.mrb[33].mxu0  ;;  %v3947_v4 = vadd.f32 %v5059_v29, %v3505_v50 }
 0xba2   : > { %v5146_v36 = vadd.f32 %v3884_v7, %v3490_v37  ;;  %v3886_v26 = vpop.f32.mrb[34].mxu0 }
 0xba3   : > { %v3999_v20 = vadd.f32 %v5145_v47, %v7182_v1  ;;  %v5147_v17 = vadd.f32 %v3886_v26, %v3495_v55  ;;  %v3888_v35 = vpop.f32.mrb[35].mxu0 }
 0xba4   : > { %v4000_v59 = vadd.f32 %v5146_v36, %v7182_v1  ;;  %v5148_v2 = vadd.f32 %v3888_v35, %v3495_v55  ;;  %v5125_v3 = vpop.f32.mrb[32].mxu1 }
 0xba5   : > { %v4011_v9 = vmax.f32 %v3999_v20, 0.0  ;;  %v4002_v5 = vadd.f32 %v5147_v17, %v7180_v41  ;;  %v3993_v38 = vadd.f32 %v5125_v3, %v3944_v8  ;;  %v3984_v44 = vpop.f32.mrb[33].mxu1 }
 0xba6   : > { %v4012_v11 = vmax.f32 %v4000_v59, 0.0  ;;  %v4003_v19 = vadd.f32 %v5148_v2, %v7180_v41  ;;  %v3985_v16 = vadd.f32 %v3984_v44, %v3936_v25  ;;  %v5126_v51 = vpop.f32.mrb[34].mxu1 }
 0xba7   : > { %v4023_v28 = vmul.f32 %v4011_v9, %v5857_v48  ;;  %v4014_v62 = vmax.f32 %v4002_v5, 0.0  ;;  %v4007_v31 = vadd.f32 %v3993_v38, %v7194_v6  ;;  %v3996_v52 = vadd.f32 %v5126_v51, %v3947_v4  ;;  %v3987_v49 = vpop.f32.mrb[35].mxu1 }
 0xba8   : > { %v4024_v32 = vmul.f32 %v4012_v11, %v5906_v22  ;;  %v4015_v40 = vmax.f32 %v4003_v19, 0.0  ;;  %v4001_v53 = vadd.f32 %v3985_v16, %v7182_v1  ;;  %v3988_v30 = vadd.f32 %v3987_v49, %v3939_v10  ;;  %v3892_v60 = vpop.f32.mrb[36].mxu0  ;;  %v8401_v10 = vld [vmem:[#allocation14_spill] sm:$0xff] }
 0xba9   : > { %v4035_v12 = vadd.f32 %v4023_v28, %v7199_v43  ;;  %v4026_v42 = vmul.f32 %v4014_v62, %v5857_v48  ;;  %v4019_v24 = vmax.f32 %v4007_v31, 0.0  ;;  %v4010_v58 = vadd.f32 %v3996_v52, %v7190_v14  ;;  %v3894_v37 = vpop.f32.mrb[37].mxu0  ;;  %v7845_v52 = vpop.permute.xlu1 %5408 }
 0xbaa   : > { %v4036_v45 = vadd.f32 %v4024_v32, %v7248_v63  ;;  %v4027_v23 = vmul.f32 %v4015_v40, %v5906_v22  ;;  %v4013_v18 = vmax.f32 %v4001_v53, 0.0  ;;  %v4004_v55 = vadd.f32 %v3988_v30, %v7180_v41  ;;  %v3896_v27 = vpop.f32.mrb[38].mxu0 }
 0xbab   : > { %v4038_v1 = vadd.f32 %v4026_v42, %v7202_v46  ;;  %v4031_v29 = vmul.f32 %v4019_v24, %v5865_v57  ;;  %v4022_v34 = vmax.f32 %v4010_v58, 0.0  ;;  %v5149_v43 = vadd.f32 %v3892_v60, %v3500_v15  ;;  %v3898_v47 = vpop.f32.mrb[39].mxu0 }
 0xbac   : > { %v4039_v7 = vadd.f32 %v4027_v23, %v7242_v56  ;;  %v4025_v36 = vmul.f32 %v4013_v18, %v5865_v57  ;;  %v4016_v26 = vmax.f32 %v4004_v55, 0.0  ;;  %v5150_v20 = vadd.f32 %v3894_v37, %v3500_v15 }
 0xbad   : > { %v4047_v63 = vpack.c.bf16 %v4038_v1, %v4035_v12  ;;  %v4034_v17 = vmul.f32 %v4022_v34, %v5865_v57  ;;  %v4005_v35 = vadd.f32 %v5149_v43, %v7194_v6  ;;  %v4043_v46 = vadd.f32 %v4031_v29, %v7214_v21  ;;  %v7849_v32 = vpop.permute.xlu1 %5423 }
 0xbae   : > { %v7764_v41 = vpack.c.bf16 %v4039_v7, %v4036_v45  ;;  %v4028_v8 = vmul.f32 %v4016_v26, %v5865_v57  ;;  %v4006_v59 = vadd.f32 %v5150_v20, %v7194_v6  ;;  %v5151_v3 = vadd.f32 %v3896_v27, %v3505_v50 }
 0xbaf   : > { %v4046_v2 = vadd.f32 %v4034_v17, %v7207_v61  ;;  %v4017_v56 = vmax.f32 %v4005_v35, 0.0  ;;  %v5152_v25 = vadd.f32 %v3898_v47, %v3505_v50  ;;  %v4037_v15 = vadd.f32 %v4025_v36, %v7245_v0 }
 0xbb0   : > { %v4040_v9 = vadd.f32 %v4028_v8, %v7239_v13  ;;  %v4018_v5 = vmax.f32 %v4006_v59, 0.0  ;;  %v4008_v44 = vadd.f32 %v5151_v3, %v7190_v14 }
 0xbb1   : > { %v4052_v38 = vpack.c.bf16 %v4046_v2, %v4043_v46  ;;  %v4009_v4 = vadd.f32 %v5152_v25, %v7190_v14  ;;  %v4029_v11 = vmul.f32 %v4017_v56, %v5857_v48  ;;  %v8400_v14 = vld [vmem:[#allocation13_spill] sm:$0xff]  ;;  %v7855_v53 = vpop.permute.xlu1 %5433 }
 0xbb2   : > { %v4049_v21 = vpack.c.bf16 %v4040_v9, %v4037_v15  ;;  %v4030_v6 = vmul.f32 %v4018_v5, %v5906_v22  ;;  %v4020_v19 = vmax.f32 %v4008_v44, 0.0  ;;  %v5410_v44 = vunpack.i.l.bf16 %v7845_v52 }
 0xbb3   : > { %v4021_v61 = vmax.f32 %v4009_v4, 0.0  ;;  %4113 = vrot.lane.b32.xlu0 %v4052_v38, %s8356_s25  ;;  %4091 = vrot.lane.b32.xlu1 %v4052_v38, %s8344_s29  ;;  %v4041_v50 = vadd.f32 %v4029_v11, %v7280_v54  ;;  %v7835_v54 = vpop.permute.xlu0 %5403 }
 0xbb4   : > { %v4032_v0 = vmul.f32 %v4020_v19, %v5857_v48  ;;  %v4042_v16 = vadd.f32 %v4030_v6, %v7302_v33  ;;  %v5405_v25 = vunpack.i.l.bf16 %v7835_v54 }
 0xbb5   : > { %v4033_v13 = vmul.f32 %v4021_v61, %v5906_v22 }
 0xbb6   : > { %v4044_v51 = vadd.f32 %v4032_v0, %v8400_v14 }
 0xbb7   : > { %v4045_v28 = vadd.f32 %v4033_v13, %v8401_v10  ;;  %4195 = vrot.lane.b32.xlu0 %v4052_v38, %s8348_s24  ;;  %4135 = vrot.lane.b32.xlu1 %v4052_v38, %s8346_s4  ;;  %v7839_v33 = vpop.permute.xlu0 %5413 }
 0xbb8   : > { %v4050_v62 = vpack.c.bf16 %v4044_v51, %v4041_v50  ;;  %v5415_v19 = vunpack.i.l.bf16 %v7839_v33 }
 0xbb9   : > { %v4051_v31 = vpack.c.bf16 %v4045_v28, %v4042_v16 }
 0xbbb   : > { %4105 = vrot.lane.b32.xlu0 %v4049_v21, %s8356_s25  ;;  %4153 = vrot.lane.b32.xlu1 %v4052_v38, %s8351_s28  ;;  %v5419_v49 = vpop.permute.xlu0 %5418 }
 0xbbc   : > { %v5420_v18 = vunpack.i.l.bf16 %v5419_v49  ;;  %v5421_v26 = vunpack.i.h.bf16 %v5419_v49 }
 0xbbf   : > { %4147 = vrot.lane.b32.xlu0 %v4049_v21, %s8351_s28  ;;  %4173 = vrot.lane.b32.xlu1 %v4052_v38, %s8343_s17  ;;  %v7851_v40 = vpop.permute.xlu0 %5428 }
 0xbc0   : > { %v5430_v16 = vunpack.i.l.bf16 %v7851_v40 }
 0xbc3   : > { %4165 = vrot.lane.b32.xlu0 %v4049_v21, %s8343_s17  ;;  %4217 = vrot.lane.b32.xlu1 %v4052_v38, %s8345_s0  ;;  %v7857_v30 = vpop.permute.xlu0 %5438 }
 0xbc7   : > { %4209 = vrot.lane.b32.xlu0 %v4049_v21, %s8345_s0  ;;  %4239 = vrot.lane.b32.xlu1 %v4052_v38, %s8349_s23 }
 0xbcb   : > { %4231 = vrot.lane.b32.xlu0 %v4049_v21, %s8349_s23  ;;  %4300 = vrot.lane.b32.xlu1 %v4052_v38, %s8347_s30 }
 0xbcf   : > { %4292 = vrot.lane.b32.xlu0 %v4049_v21, %s8347_s30  ;;  %4083 = vrot.lane.b32.xlu1 %v4049_v21, %s8344_s29 }
 0xbd3   : > { %4101 = vrot.lane.b32.xlu0 %v4047_v63, %s8356_s25  ;;  %4127 = vrot.lane.b32.xlu1 %v4049_v21, %s8346_s4 }
 0xbd7   : > { %4143 = vrot.lane.b32.xlu0 %v4047_v63, %s8351_s28  ;;  %4187 = vrot.lane.b32.xlu1 %v4049_v21, %s8348_s24 }
 0xbdb   : > { %4161 = vrot.lane.b32.xlu0 %v4047_v63, %s8343_s17  ;;  %4079 = vrot.lane.b32.xlu1 %v4047_v63, %s8344_s29 }
 0xbdf   : > { %4205 = vrot.lane.b32.xlu0 %v4047_v63, %s8345_s0  ;;  %4123 = vrot.lane.b32.xlu1 %v4047_v63, %s8346_s4 }
 0xbe3   : > { %4227 = vrot.lane.b32.xlu0 %v4047_v63, %s8349_s23  ;;  %4183 = vrot.lane.b32.xlu1 %v4047_v63, %s8348_s24 }
 0xbe7   : > { %4081 = vrot.lane.b32.xlu0 %v7764_v41, %s8344_s29  ;;  %4288 = vrot.lane.b32.xlu1 %v4047_v63, %s8347_s30 }
 0xbeb   : > { %4125 = vrot.lane.b32.xlu0 %v7764_v41, %s8346_s4  ;;  %4103 = vrot.lane.b32.xlu1 %v7764_v41, %s8356_s25 }
 0xbef   : > { %4185 = vrot.lane.b32.xlu0 %v7764_v41, %s8348_s24  ;;  %4145 = vrot.lane.b32.xlu1 %v7764_v41, %s8351_s28 }
 0xbf3   : > { %4290 = vrot.lane.b32.xlu0 %v7764_v41, %s8347_s30  ;;  %4163 = vrot.lane.b32.xlu1 %v7764_v41, %s8343_s17 }
 0xbf7   : > { %4109 = vrot.lane.b32.xlu0 %v4050_v62, %s8356_s25  ;;  %4207 = vrot.lane.b32.xlu1 %v7764_v41, %s8345_s0 }
 0xbfb   : > { %4191 = vrot.lane.b32.xlu0 %v4050_v62, %s8348_s24  ;;  %4229 = vrot.lane.b32.xlu1 %v7764_v41, %s8349_s23 }
 0xbff   : > { %4296 = vrot.lane.b32.xlu0 %v4050_v62, %s8347_s30  ;;  %4087 = vrot.lane.b32.xlu1 %v4050_v62, %s8344_s29 }
 0xc03   : > { %4089 = vrot.lane.b32.xlu0 %v4051_v31, %s8344_s29  ;;  %4131 = vrot.lane.b32.xlu1 %v4050_v62, %s8346_s4 }
 0xc07   : > { %4133 = vrot.lane.b32.xlu0 %v4051_v31, %s8346_s4  ;;  %4149 = vrot.lane.b32.xlu1 %v4050_v62, %s8351_s28 }
 0xc0b   : > { %4151 = vrot.lane.b32.xlu0 %v4051_v31, %s8351_s28  ;;  %4169 = vrot.lane.b32.xlu1 %v4050_v62, %s8343_s17 }
 0xc0f   : > { %4171 = vrot.lane.b32.xlu0 %v4051_v31, %s8343_s17  ;;  %4213 = vrot.lane.b32.xlu1 %v4050_v62, %s8345_s0 }
 0xc13   : > { %4215 = vrot.lane.b32.xlu0 %v4051_v31, %s8345_s0  ;;  %4235 = vrot.lane.b32.xlu1 %v4050_v62, %s8349_s23 }
 0xc17   : > { %4237 = vrot.lane.b32.xlu0 %v4051_v31, %s8349_s23  ;;  %4111 = vrot.lane.b32.xlu1 %v4051_v31, %s8356_s25 }
 0xc1b   : > { %4193 = vrot.lane.b32.xlu1 %v4051_v31, %s8348_s24 }
 0xc1f   : > { %4298 = vrot.lane.b32.xlu1 %v4051_v31, %s8347_s30 }
 0xc25   : > { %v7859_v60 = vpop.permute.xlu1 %4091  ;;  %v7861_v12 = vpop.permute.xlu0 %4113 }
 0xc26   : > { %4316 = vrot.lane.b32.xlu1 %v7859_v60, %s8347_s30 }
 0xc29   : > { %v7865_v42 = vpop.permute.xlu1 %4135  ;;  %v7867_v24 = vpop.permute.xlu0 %4195 }
 0xc2d   : > { %v7869_v58 = vpop.permute.xlu1 %4153  ;;  %v7871_v37 = vpop.permute.xlu0 %4105 }
 0xc2e   : > { %4364 = vrot.lane.b32.xlu0 %v7869_v58, %s8347_s30 }
 0xc31   : > { %v7875_v45 = vpop.permute.xlu1 %4173  ;;  %v4148_v23 = vpop.permute.xlu0 %4147 }
 0xc32   : > { %4356 = vrot.lane.b32.xlu1 %v4148_v23, %s8347_s30  ;;  %v4182_v17 = vsel %vm8402_vm9, %v7875_v45, %v5421_v26 }
 0xc35   : > { %v7878_v55 = vpop.permute.xlu1 %4217  ;;  %v4166_v27 = vpop.permute.xlu0 %4165 }
 0xc36   : > { %v4179_v1 = vsel %vm8385_vm2, %v4166_v27, %v5420_v18 }
 0xc37   : > { %4372 = vrot.lane.b32.xlu1 %v4179_v1, %s8347_s30 }
 0xc39   : > { %v7882_v29 = vpop.permute.xlu1 %4239  ;;  %v7884_v34 = vpop.permute.xlu0 %4209 }
 0xc3d   : > { %v7886_v43 = vpop.permute.xlu1 %4300  ;;  %v7888_v47 = vpop.permute.xlu0 %4231 }
 0xc41   : > { %v4084_v7 = vpop.permute.xlu1 %4083  ;;  %v7890_v36 = vpop.permute.xlu0 %4292 }
 0xc42   : > { %4308 = vrot.lane.b32.xlu0 %v4084_v7, %s8347_s30 }
 0xc45   : > { %v7893_v20 = vpop.permute.xlu1 %4127  ;;  %v4102_v63 = vpop.permute.xlu0 %4101 }
 0xc46   : > { %4380 = vrot.lane.b32.xlu0 %v4182_v17, %s8347_s30  ;;  %v4115_v11 = vsel %vm832_vm1, %v5410_v44, %v4102_v63 }
 0xc49   : > { %v7898_v35 = vpop.permute.xlu1 %4187  ;;  %v4144_v41 = vpop.permute.xlu0 %4143 }
 0xc4a   : > { %4350 = vrot.lane.b32.xlu1 %v4144_v41, %s8347_s30 }
 0xc4d   : > { %v4080_v46 = vpop.permute.xlu1 %4079  ;;  %v4162_v8 = vpop.permute.xlu0 %4161 }
 0xc4e   : > { %4366 = vrot.lane.b32.xlu1 %v4162_v8, %s8347_s30  ;;  %v4093_v5 = vsel %vm816_vm0, %v5405_v25, %v4080_v46 }
 0xc51   : > { %v4124_v59 = vpop.permute.xlu1 %4123  ;;  %v7902_v2 = vpop.permute.xlu0 %4205 }
 0xc52   : > { %v4137_v13 = vsel %vm848_vm3, %v5415_v19, %v4124_v59 }
 0xc55   : > { %v4184_v56 = vpop.permute.xlu1 %4183  ;;  %v7904_v3 = vpop.permute.xlu0 %4227 }
 0xc56   : > { %4382 = vrot.lane.b32.xlu1 %v4184_v56, %s8347_s30 }
 0xc59   : > { %v4289_v15 = vpop.permute.xlu1 %4288  ;;  %v4082_v9 = vpop.permute.xlu0 %4081 }
 0xc5a   : > { %v4094_v38 = vsel %vm816_vm0, %v4080_v46, %v4082_v9  ;;  %4302 = vrot.lane.b32.xlu1 %v4093_v5, %s8347_s30  ;;  %v4095_v14 = vsel %vm816_vm0, %v4082_v9, %v4084_v7  ;;  %v4430_v31 = vsel %vm1030_vm14, %v5430_v16, %v4289_v15  ;;  %v5431_v16 = vunpack.i.h.bf16 %v7851_v40 }
 0xc5b   : > { %4304 = vrot.lane.b32.xlu0 %v4094_v38, %s8347_s30 }
 0xc5d   : > { %v4104_v4 = vpop.permute.xlu1 %4103  ;;  %v4126_v21 = vpop.permute.xlu0 %4125 }
 0xc5e   : > { %v4117_v6 = vsel %vm832_vm1, %v4104_v4, %v7871_v37  ;;  %4318 = vrot.lane.b32.xlu1 %v4115_v11, %s8347_s30  ;;  %v4139_v50 = vsel %vm848_vm3, %v4126_v21, %v7893_v20  ;;  %v4116_v49 = vsel %vm832_vm1, %v4102_v63, %v4104_v4 }
 0xc5f   : > { %4322 = vrot.lane.b32.xlu0 %v4117_v6, %s8347_s30  ;;  %v5411_v6 = vunpack.i.h.bf16 %v7845_v52 }
 0xc61   : > { %v4146_v61 = vpop.permute.xlu1 %4145  ;;  %v4186_v0 = vpop.permute.xlu0 %4185 }
 0xc62   : > { %4334 = vrot.lane.b32.xlu1 %v4137_v13, %s8347_s30  ;;  %v4156_v28 = vsel %vm8403_vm12, %v4146_v61, %v4148_v23  ;;  %v4138_v23 = vsel %vm848_vm3, %v4124_v59, %v4126_v21  ;;  %v4200_v17 = vsel %vm897_vm10, %v4186_v0, %v7898_v35  ;;  %v4155_v63 = vsel %vm8405_vm5, %v4144_v41, %v4146_v61 }
 0xc63   : > { %4338 = vrot.lane.b32.xlu0 %v4139_v50, %s8347_s30  ;;  %v4199_v9 = vsel %vm897_vm10, %v4184_v56, %v4186_v0  ;;  %v5416_v0 = vunpack.i.h.bf16 %v7839_v33 }
 0xc65   : > { %v4164_v51 = vpop.permute.xlu1 %4163  ;;  %v7926_v10 = vpop.permute.xlu0 %4290 }
 0xc66   : > { %4306 = vrot.lane.b32.xlu1 %v4095_v14, %s8347_s30  ;;  %v4431_v62 = vsel %vm1030_vm14, %v4289_v15, %v7926_v10  ;;  %v4178_v7 = vsel %vm8404_vm4, %v4164_v51, %v4166_v27  ;;  %v4177_v15 = vsel %vm8406_vm6, %v4162_v8, %v4164_v51  ;;  %v5425_v8 = vunpack.i.l.bf16 %v7849_v32 }
 0xc67   : > { %4541 = vmatprep.subr.bf16.mxu1 %v4431_v62  ;;  %4354 = vrot.lane.b32.xlu0 %v4156_v28, %s8347_s30  ;;  %vm8418_vm4 = vmmov 0  }
 0xc68   : > { %4542 = vmatpush1.bf16.msra.mxu1 %v4430_v31  ;;  %v4201_v56 = vsel %vm897_vm10, %v7898_v35, %v5425_v8 }
 0xc69   : > { %v7935_v18 = vpop.permute.xlu1 %4207  ;;  %v4110_v1 = vpop.permute.xlu0 %4109 }
 0xc6a   : > { %4320 = vrot.lane.b32.xlu1 %v4116_v49, %s8347_s30  ;;  %v4118_v19 = vsel %vm832_vm1, %v5411_v6, %v4110_v1  ;;  %v4221_v50 = vsel %vm913_vm11, %v7902_v2, %v7935_v18  ;;  %v5440_v6 = vunpack.i.l.bf16 %v7857_v30 }
 0xc6b   : > { %4370 = vrot.lane.b32.xlu0 %v4178_v7, %s8347_s30  ;;  %v4222_v7 = vsel %vm913_vm11, %v7935_v18, %v7884_v34 }
 0xc6d   : > { %v7941_v26 = vpop.permute.xlu1 %4229  ;;  %v7945_v46 = vpop.permute.xlu0 %4191 }
 0xc6e   : > { %4336 = vrot.lane.b32.xlu1 %v4138_v23, %s8347_s30  ;;  %v5435_v23 = vunpack.i.l.bf16 %v7855_v53 }
 0xc6f   : > { %4386 = vrot.lane.b32.xlu0 %v4200_v17, %s8347_s30 }
 0xc71   : > { %v4088_v27 = vpop.permute.xlu1 %4087  ;;  %v4297_v25 = vpop.permute.xlu0 %4296 }
 0xc72   : > { %4352 = vrot.lane.b32.xlu1 %v4155_v63, %s8347_s30  ;;  %v4433_v62 = vsel %vm1030_vm14, %v5431_v16, %v4297_v25 }
 0xc75   : > { %v4132_v59 = vpop.permute.xlu1 %4131  ;;  %v4090_v38 = vpop.permute.xlu0 %4089 }
 0xc76   : > { %4368 = vrot.lane.b32.xlu1 %v4177_v15, %s8347_s30  ;;  %v4098_v41 = vsel %vm816_vm0, %v4090_v38, %v7859_v60  ;;  %v5406_v60 = vunpack.i.h.bf16 %v7835_v54  ;;  %v4140_v54 = vsel %vm848_vm3, %v5416_v0, %v4132_v59  ;;  %v4097_v14 = vsel %vm816_vm0, %v4088_v27, %v4090_v38 }
 0xc78   : > { %v4096_v21 = vsel %vm816_vm0, %v5406_v60, %v4088_v27  ;;  %vm8407_vm0 = vmmov %vm8405_vm5 }
 0xc79   : > { %v4150_v5 = vpop.permute.xlu1 %4149  ;;  %v4134_v52 = vpop.permute.xlu0 %4133 }
 0xc7a   : > { %4358 = vrot.lane.b32.xlu0 %v4150_v5, %s8347_s30  ;;  %4384 = vrot.lane.b32.xlu1 %v4199_v9, %s8347_s30  ;;  %v4142_v33 = vsel %vm848_vm3, %v4134_v52, %v7865_v42  ;;  %v4243_v9 = vsel %vm8399_vm8, %v7904_v3, %v7941_v26 }
 0xc7d   : > { %v7958_v44 = vpop.permute.xlu1 %4169  ;;  %v4152_v40 = vpop.permute.xlu0 %4151 }
 0xc7e   : > { %4374 = vrot.lane.b32.xlu0 %v7958_v44, %s8347_s30  ;;  %4314 = vrot.lane.b32.xlu1 %v4098_v41, %s8347_s30  ;;  %v4158_v49 = vsel %vm8407_vm0, %v4152_v40, %v7869_v58  ;;  %v5426_v58 = vunpack.i.h.bf16 %v7849_v32  ;;  %v5436_v32 = vunpack.i.h.bf16 %v7855_v53  ;;  %v8050_v53 = vld.sshfl [vmem:[%s8265_s16] sm:$0x13 pattern:$0x75316420] }
 0xc80   : > { %v4204_v18 = vsel %vm897_vm10, %v7867_v24, %v5426_v58  ;;  %v4226_v63 = vsel %vm913_vm11, %v7878_v55, %v5436_v32 }
 0xc81   : > { %v7964_v4 = vpop.permute.xlu1 %4213 }
 0xc82   : > { %4390 = vrot.lane.b32.xlu0 %v7945_v46, %s8347_s30  ;;  %4388 = vrot.lane.b32.xlu1 %v4201_v56, %s8347_s30 }
 0xc85   : > { %v7973_v11 = vpop.permute.xlu1 %4235 }
 0xc86   : > { %4310 = vrot.lane.b32.xlu0 %v4096_v21, %s8347_s30  ;;  %v4250_v21 = vld [vmem:[#allocation4] sm:$0x1] }
 0xc89   : > { %v4112_v61 = vpop.permute.xlu1 %4111 }
 0xc8a   : > { %v4120_v35 = vsel %vm832_vm1, %v4112_v61, %v7861_v12  ;;  %4326 = vrot.lane.b32.xlu0 %v4118_v19, %s8347_s30  ;;  %v4119_v31 = vsel %vm832_vm1, %v4110_v1, %v4112_v61  ;;  %vm8408_vm1 = vmmov %vm8385_vm2 }
 0xc8b   : > { %4330 = vrot.lane.b32.xlu1 %v4120_v35, %s8347_s30  ;;  %vm8410_vm7 = vmmov %vm8408_vm1 }
 0xc8c   : > { %vm8412_vm2 = vmmov %vm8399_vm8 }
 0xc8d   : > { %v4194_v13 = vpop.permute.xlu1 %4193  ;;  %vm8415_vm9 = vmmov %vm8412_vm2 }
 0xc8e   : > { %4342 = vrot.lane.b32.xlu0 %v4140_v54, %s8347_s30  ;;  %v4203_v17 = vsel %vm897_vm10, %v4194_v13, %v7867_v24  ;;  %v4202_v38 = vsel %vm897_vm10, %v7945_v46, %v4194_v13  ;;  %vm8413_vm10 = vmmov %vm8412_vm2 }
 0xc8f   : > { %4400 = vrot.lane.b32.xlu1 %v4221_v50, %s8347_s30  ;;  %vm8416_vm12 = vmmov %vm8412_vm2 }
 0xc91   : > { %v7991_v51 = vpop.permute.xlu1 %4298 }
 0xc92   : > { %4312 = vrot.lane.b32.xlu0 %v4097_v14, %s8347_s30  ;;  %v4434_v28 = vsel %vm1030_vm14, %v4297_v25, %v7991_v51 }
 0xc93   : > { %4543 = vmatprep.subr.bf16.mxu1 %v4434_v28  ;;  %4346 = vrot.lane.b32.xlu1 %v4142_v33, %s8347_s30 }
 0xc94   : > { %4544 = vmatpush1.bf16.msra.mxu1 %v4433_v62 }
 0xc96   : > { %4324 = vrot.lane.b32.xlu0 %v7871_v37, %s8347_s30  ;;  %v4172_v37 = vpop.permute.xlu0 %4171 }
 0xc97   : > { %4398 = vrot.lane.b32.xlu1 %v7902_v2, %s8347_s30  ;;  %v4141_v2 = vsel %vm848_vm3, %v4132_v59, %v4134_v52  ;;  %v4181_v1 = vsel %vm8408_vm1, %v4172_v37, %v7875_v45  ;;  %vm8409_vm3 = vmmov %vm8407_vm0  ;;  %v4180_v24 = vsel %vm8410_vm7, %v7958_v44, %v4172_v37  ;;  %v4268_v59 = vcombine.high %v8050_v53, %v8050_v53 }
 0xc98   : > { %v4157_v45 = vsel %vm8409_vm3, %v4150_v5, %v4152_v40  ;;  %v8039_v27 = vpop.permute.xlu1 %4316 }
 0xc9a   : > { %4328 = vrot.lane.b32.xlu0 %v4119_v31, %s8347_s30 }
 0xc9b   : > { %4362 = vrot.lane.b32.xlu1 %v4158_v49, %s8347_s30 }
 0xc9e   : > { %4402 = vrot.lane.b32.xlu0 %v4222_v7, %s8347_s30 }
 0xc9f   : > { %4332 = vrot.lane.b32.xlu1 %v7861_v12, %s8347_s30  ;;  %v4223_v12 = vsel %vm913_vm11, %v7884_v34, %v5435_v23  ;;  %v4216_v34 = vpop.permute.xlu0 %4215 }
 0xca0   : > { %v4225_v25 = vsel %vm913_vm11, %v4216_v34, %v7878_v55  ;;  %v8411_v55 = vld [vmem:[#allocation16_spill] sm:$0xff]  ;;  %v4224_v46 = vsel %vm913_vm11, %v7964_v4, %v4216_v34  ;;  %vm8414_vm11 = vmmov %vm8412_vm2 }
 0xca1   : > { %v4282_v5 = vrot.slane %v4268_v59, %v8411_v55  ;;  %v4245_v61 = vsel %vm8414_vm11, %v7888_v47, %v5440_v6 }
 0xca2   : > { %4344 = vrot.lane.b32.xlu0 %v4141_v2, %s8347_s30 }
 0xca3   : > { %4378 = vrot.lane.b32.xlu1 %v4181_v1, %s8347_s30  ;;  %4655 = vmatprep.mubr.bf16.mxu0 %v4282_v5  ;;  %v4238_v44 = vpop.permute.xlu0 %4237 }
 0xca4   : > { %v4357_v15 = vpop.permute.xlu1 %4356  ;;  %4573 = vmatprep.mubr.bf16.mxu1 %v4282_v5  ;;  %v4247_v35 = vsel %vm8415_vm9, %v4238_v44, %v7882_v29 }
 0xca6   : > { %4396 = vrot.lane.b32.xlu0 %v4204_v18, %s8347_s30 }
 0xca7   : > { %4404 = vrot.lane.b32.xlu1 %v4223_v12, %s8347_s30  ;;  %v8074_v56 = vpop.permute.xlu0 %4364 }
 0xca9   : > { %v8063_v41 = vpop.permute.xlu1 %4372 }
 0xcaa   : > { %4360 = vrot.lane.b32.xlu0 %v4157_v45, %s8347_s30 }
 0xcab   : > { %4394 = vrot.lane.b32.xlu1 %v4203_v17, %s8347_s30 }
 0xcae   : > { %4406 = vrot.lane.b32.xlu0 %v7964_v4, %s8347_s30 }
 0xcaf   : > { %4412 = vrot.lane.b32.xlu1 %v4226_v63, %s8347_s30 }
 0xcb2   : > { %4376 = vrot.lane.b32.xlu0 %v4180_v24, %s8347_s30 }
 0xcb3   : > { %4410 = vrot.lane.b32.xlu1 %v4225_v25, %s8347_s30 }
 0xcb4   : > { %v8080_v60 = vpop.permute.xlu0 %4308 }
 0xcb6   : > { %4340 = vrot.lane.b32.xlu0 %v7893_v20, %s8347_s30  ;;  %v4246_v20 = vsel %vm8412_vm2, %v7973_v11, %v4238_v44 }
 0xcb7   : > { %4416 = vrot.lane.b32.xlu1 %v4243_v9, %s8347_s30 }
 0xcb8   : > { %v8093_v19 = vpop.permute.xlu0 %4380 }
 0xcba   : > { %4392 = vrot.lane.b32.xlu0 %v4202_v38, %s8347_s30 }
 0xcbb   : > { %4414 = vrot.lane.b32.xlu1 %v7904_v3, %s8347_s30 }
 0xcbc   : > { %v8070_v8 = vpop.permute.xlu1 %4350 }
 0xcbe   : > { %4348 = vrot.lane.b32.xlu0 %v7865_v42, %s8347_s30  ;;  %v4244_v42 = vsel %vm8413_vm10, %v7941_v26, %v7888_v47  ;;  %v5441_v26 = vunpack.i.h.bf16 %v7857_v30 }
 0xcbf   : > { %4424 = vrot.lane.b32.xlu1 %v4246_v20, %s8347_s30 }
 0xcc0   : > { %v8084_v3 = vpop.permute.xlu1 %4366  ;;  %v4248_v50 = vsel %vm8416_vm12, %v7882_v29, %v5441_v26  ;;  %v4432_v29 = vsel %vm1030_vm14, %v7926_v10, %v7890_v36 }
 0xcc2   : > { %4408 = vrot.lane.b32.xlu0 %v4224_v46, %s8347_s30 }
 0xcc3   : > { %4422 = vrot.lane.b32.xlu1 %v7973_v11, %s8347_s30 }
 0xcc6   : > { %4418 = vrot.lane.b32.xlu0 %v4244_v42, %s8347_s30  ;;  %v4435_v42 = vsel %vm1030_vm14, %v7991_v51, %v7886_v43 }
 0xcc7   : > { %4253 = vperm.xlu1 %5281, %v4250_v21  }
 0xcc8   : > { %v8091_v4 = vpop.permute.xlu1 %4382 }
 0xcca   : > { %4420 = vrot.lane.b32.xlu0 %v4245_v61, %s8347_s30 }
 0xccc   : > { %v4303_v11 = vpop.permute.xlu1 %4302 }
 0xccd   : > { %v4305_v0 = vpop.permute.xlu0 %4304 }
 0xcce   : > { %4426 = vrot.lane.b32.xlu0 %v4247_v35, %s8347_s30  ;;  %v4436_v28 = vsel %vm1030_vm14, %v4303_v11, %v4305_v0 }
 0xcd0   : > { %v4319_v54 = vpop.permute.xlu1 %4318 }
 0xcd1   : > { %v8102_v13 = vpop.permute.xlu0 %4322 }
 0xcd2   : > { %4428 = vrot.lane.b32.xlu0 %v4248_v50, %s8347_s30  ;;  %s760_s30 = scalar_lea.vmem %s8269_s20, %s5181_s8 }
 0xcd4   : > { %v4335_v47 = vpop.permute.xlu1 %4334 }
 0xcd5   : > { %v8107_v52 = vpop.permute.xlu0 %4338 }
 0xcd8   : > { %v4307_v16 = vpop.permute.xlu1 %4306 }
 0xcd9   : > { %v8109_v14 = vpop.permute.xlu0 %4354  ;;  %v4437_v33 = vsel %vm1030_vm14, %v4305_v0, %v4307_v16  ;;  %v4438_v43 = vsel %vm1030_vm14, %v4307_v16, %v8080_v60 }
 0xcda   : > { %4545 = vmatprep.subr.bf16.mxu1 %v4437_v33  ;;  %v4456_v30 = vsel %vm1030_vm14, %v8109_v14, %v4357_v15 }
 0xcdb   : > { %4546 = vmatpush1.bf16.msra.mxu1 %v4436_v28  ;;  %5064 = vmatprep.subr.bf16.mxu0 %v4456_v30 }
 0xcdc   : > { %5065 = vmatpush3.bf16.msra.mxu0 %v4432_v29  ;;  %v4321_v62 = vpop.permute.xlu1 %4320 }
 0xcdd   : > { %v8118_v31 = vpop.permute.xlu0 %4370  ;;  %v4443_v15 = vsel %vm1030_vm14, %v4321_v62, %v8102_v13  ;;  %v4442_v5 = vsel %vm1030_vm14, %v4319_v54, %v4321_v62 }
 0xcde   : > { %v4462_v11 = vsel %vm1030_vm14, %v8118_v31, %v8063_v41 }
 0xce0   : > { %v4337_v40 = vpop.permute.xlu1 %4336 }
 0xce1   : > { %v8122_v7 = vpop.permute.xlu0 %4386  ;;  %v4449_v6 = vsel %vm1030_vm14, %v4337_v40, %v8107_v52 }
 0xce4   : > { %v8120_v49 = vpop.permute.xlu1 %4352 }
 0xce5   : > { %v4455_v60 = vsel %vm1030_vm14, %v8120_v49, %v8109_v14 }
 0xce8   : > { %v8124_v37 = vpop.permute.xlu1 %4368 }
 0xcec   : > { %v8126_v2 = vpop.permute.xlu0 %4358  ;;  %v8128_v1 = vpop.permute.xlu1 %4384 }
 0xcf0   : > { %v8130_v58 = vpop.permute.xlu0 %4374  ;;  %v4315_v36 = vpop.permute.xlu1 %4314 }
 0xcf1   : > { %v4441_v50 = vsel %vm1030_vm14, %v4315_v36, %v8039_v27 }
 0xcf4   : > { %v8132_v10 = vpop.permute.xlu0 %4390  ;;  %v4389_v18 = vpop.permute.xlu1 %4388 }
 0xcf5   : > { %v4468_v16 = vsel %vm1030_vm14, %v8122_v7, %v4389_v18 }
 0xcf8   : > { %v4311_v23 = vpop.permute.xlu0 %4310 }
 0xcfc   : > { %v4327_v12 = vpop.permute.xlu0 %4326 }
 0xcfd   : > { %v4331_v45 = vpop.permute.xlu1 %4330 }
 0xd00   : > { %v4343_v17 = vpop.permute.xlu0 %4342 }
 0xd01   : > { %v8134_v32 = vpop.permute.xlu1 %4400 }
 0xd04   : > { %v4313_v63 = vpop.permute.xlu0 %4312 }
 0xd05   : > { %v4439_v34 = vsel %vm1030_vm14, %v4311_v23, %v4313_v63  ;;  %v8137_v24 = vpop.permute.xlu1 %4346  ;;  %v4440_v25 = vsel %vm1030_vm14, %v4313_v63, %v4315_v36  ;;  %v4460_v36 = vsel %vm1030_vm14, %v8084_v3, %v8124_v37  ;;  %v4466_v3 = vsel %vm1030_vm14, %v8091_v4, %v8128_v1 }
 0xd06   : > { %4547 = vmatprep.subr.bf16.mxu1 %v4440_v25 }
 0xd07   : > { %4548 = vmatpush1.bf16.msra.mxu1 %v4439_v34 }
 0xd08   : > { %v4325_v59 = vpop.permute.xlu0 %4324  ;;  %4549 = vmatprep.subr.bf16.mxu1 %v4443_v15 }
 0xd09   : > { %v8142_v9 = vpop.permute.xlu1 %4398  ;;  %v4444_v27 = vsel %vm1030_vm14, %v8102_v13, %v4325_v59 }
 0xd0b   : > { %4550 = vmatpush1.bf16.msra.mxu1 %v4442_v5  ;;  %v8417_v5 = vmov 0.0  }
 0xd0c   : > { %v4329_v38 = vpop.permute.xlu0 %4328 }
 0xd0d   : > { %v4445_v44 = vsel %vm1030_vm14, %v4327_v12, %v4329_v38  ;;  %v4363_v20 = vpop.permute.xlu1 %4362  ;;  %v4446_v46 = vsel %vm1030_vm14, %v4329_v38, %v4331_v45 }
 0xd0e   : > { %4551 = vmatprep.subr.bf16.mxu1 %v4446_v46  ;;  %v4459_v21 = vsel %vm1030_vm14, %v4363_v20, %v8074_v56  ;;  %v4448_v56 = vsel %vm1030_vm14, %v4335_v47, %v4337_v40 }
 0xd0f   : > { %4552 = vmatpush1.bf16.msra.mxu1 %v4445_v44  ;;  %5066 = vmatprep.subr.bf16.mxu0 %v4459_v21 }
 0xd10   : > { %v8154_v61 = vpop.permute.xlu0 %4402  ;;  %4553 = vmatprep.subr.bf16.mxu1 %v4449_v6  ;;  %5067 = vmatpush3.bf16.msra.mxu0 %v4435_v42 }
 0xd11   : > { %5068 = vmatprep.subr.bf16.mxu0 %v4462_v11  ;;  %v4333_v35 = vpop.permute.xlu1 %4332 }
 0xd12   : > { %v4447_v40 = vsel %vm1030_vm14, %v4331_v45, %v4333_v35  ;;  %v4467_v45 = vsel %vm1030_vm14, %v8128_v1, %v8122_v7  ;;  %v4275_v1 = vrot.slane %v8050_v53, %v8411_v55 }
 0xd13   : > { %4554 = vmatpush1.bf16.msra.mxu1 %v4448_v56 }
 0xd14   : > { %v4345_v51 = vpop.permute.xlu0 %4344  ;;  %5069 = vmatpush3.bf16.msra.mxu0 %v4438_v43  ;;  %v4283_v35 = vcombine.high %v4275_v1, %v4275_v1 }
 0xd15   : > { %v4451_v0 = vsel %vm1030_vm14, %v4343_v17, %v4345_v51  ;;  %v4379_v26 = vpop.permute.xlu1 %4378  ;;  %v4452_v54 = vsel %vm1030_vm14, %v4345_v51, %v8137_v24 }
 0xd16   : > { %4555 = vmatprep.subr.bf16.mxu1 %v4452_v54  ;;  %v4465_v41 = vsel %vm1030_vm14, %v4379_v26, %v8093_v19  ;;  %v4454_v19 = vsel %vm1030_vm14, %v8070_v8, %v8120_v49  ;;  %v4461_v8 = vsel %vm1030_vm14, %v8124_v37, %v8118_v31 }
 0xd17   : > { %4556 = vmatpush1.bf16.msra.mxu1 %v4451_v0  ;;  %5070 = vmatprep.subr.bf16.mxu0 %v4465_v41 }
 0xd18   : > { %v4397_v47 = vpop.permute.xlu0 %4396  ;;  %4557 = vmatprep.subr.bf16.mxu1 %v4455_v60  ;;  %5071 = vmatpush3.bf16.msra.mxu0 %v4441_v50  ;;  %v8419_v50 = vld [vmem:[#allocation12_spill] sm:$0xff] }
 0xd19   : > { %5072 = vmatprep.subr.bf16.mxu0 %v4468_v16  ;;  %v4405_v33 = vpop.permute.xlu1 %4404 }
 0xd1a   : > { %v4474_v49 = vsel %vm1030_vm14, %v8154_v61, %v4405_v33 }
 0xd1b   : > { %4558 = vmatpush1.bf16.msra.mxu1 %v4454_v19 }
 0xd1c   : > { %v4361_v28 = vpop.permute.xlu0 %4360  ;;  %5073 = vmatpush3.bf16.msra.mxu0 %v4444_v27 }
 0xd1d   : > { %v4457_v14 = vsel %vm1030_vm14, %v8126_v2, %v4361_v28  ;;  %v4395_v30 = vpop.permute.xlu1 %4394  ;;  %v4458_v29 = vsel %vm1030_vm14, %v4361_v28, %v4363_v20 }
 0xd1e   : > { %4559 = vmatprep.subr.bf16.mxu1 %v4458_v29  ;;  %v4471_v62 = vsel %vm1030_vm14, %v4395_v30, %v4397_v47 }
 0xd1f   : > { %4560 = vmatpush1.bf16.msra.mxu1 %v4457_v14  ;;  %5074 = vmatprep.subr.bf16.mxu0 %v4471_v62 }
 0xd20   : > { %v4407_v13 = vpop.permute.xlu0 %4406  ;;  %4561 = vmatprep.subr.bf16.mxu1 %v4461_v8  ;;  %5075 = vmatpush3.bf16.msra.mxu0 %v4447_v40 }
 0xd21   : > { %5076 = vmatprep.subr.bf16.mxu0 %v4474_v49  ;;  %v4413_v2 = vpop.permute.xlu1 %4412 }
 0xd23   : > { %4562 = vmatpush1.bf16.msra.mxu1 %v4460_v36 }
 0xd24   : > { %v4377_v23 = vpop.permute.xlu0 %4376 }
 0xd25   : > { %v4463_v18 = vsel %vm1030_vm14, %v8130_v58, %v4377_v23  ;;  %v4464_v12 = vsel %vm1030_vm14, %v4377_v23, %v4379_v26  ;;  %v4411_v31 = vpop.permute.xlu1 %4410 }
 0xd26   : > { %4563 = vmatprep.subr.bf16.mxu1 %v4464_v12  ;;  %v4477_v37 = vsel %vm1030_vm14, %v4411_v31, %v4413_v2 }
 0xd27   : > { %4564 = vmatpush1.bf16.msra.mxu1 %v4463_v18 }
 0xd28   : > { %v4341_v17 = vpop.permute.xlu0 %4340  ;;  %4565 = vmatprep.subr.bf16.mxu1 %v4467_v45 }
 0xd29   : > { %v4450_v63 = vsel %vm1030_vm14, %v8107_v52, %v4341_v17  ;;  %v4417_v34 = vpop.permute.xlu1 %4416  ;;  %v4473_v52 = vsel %vm1030_vm14, %v8134_v32, %v8154_v61 }
 0xd2a   : > { %5077 = vmatpush3.bf16.msra.mxu0 %v4450_v63 }
 0xd2b   : > { %4566 = vmatpush1.bf16.msra.mxu1 %v4466_v3  ;;  %5078 = vmatprep.subr.bf16.mxu0 %v4477_v37 }
 0xd2c   : > { %v4393_v58 = vpop.permute.xlu0 %4392 }
 0xd2d   : > { %v4469_v25 = vsel %vm1030_vm14, %v8132_v10, %v4393_v58  ;;  %v4470_v7 = vsel %vm1030_vm14, %v4393_v58, %v4395_v30  ;;  %v4472_v10 = vsel %vm1030_vm14, %v8142_v9, %v8134_v32  ;;  %v4415_v59 = vpop.permute.xlu1 %4414 }
 0xd2e   : > { %4567 = vmatprep.subr.bf16.mxu1 %v4470_v7  ;;  %v4478_v9 = vsel %vm1030_vm14, %v4415_v59, %v4417_v34 }
 0xd2f   : > { %4568 = vmatpush1.bf16.msra.mxu1 %v4469_v25 }
 0xd30   : > { %v4349_v15 = vpop.permute.xlu0 %4348  ;;  %4569 = vmatprep.subr.bf16.mxu1 %v4473_v52 }
 0xd31   : > { %v4453_v4 = vsel %vm1030_vm14, %v8137_v24, %v4349_v15  ;;  %v4425_v24 = vpop.permute.xlu1 %4424 }
 0xd32   : > { %5079 = vmatpush3.bf16.msra.mxu0 %v4453_v4 }
 0xd33   : > { %4570 = vmatpush1.bf16.msra.mxu1 %v4472_v10  ;;  %5127 = vmatprep.subr.bf16.mxu0 %v8417_v5 }
 0xd34   : > { %v4409_v38 = vpop.permute.xlu0 %4408 }
 0xd35   : > { %v4475_v44 = vsel %vm1030_vm14, %v4407_v13, %v4409_v38  ;;  %4656 = vmatmul.mubr.bf16.vlgmr.msra.gmra.mrb[40].mxu0 %v4275_v1  ;;  %v4476_v20 = vsel %vm1030_vm14, %v4409_v38, %v4411_v31  ;;  %v4423_v42 = vpop.permute.xlu1 %4422 }
 0xd36   : > { %4571 = vmatprep.subr.bf16.mxu1 %v4476_v20  ;;  %5131 = vmatprep.mubr.msk.bf16.mxu0 %vm8418_vm4, %v8417_v5  ;;  %v4481_v11 = vsel %vm1030_vm14, %v4423_v42, %v4425_v24 }
 0xd37   : > { %4572 = vmatpush1.bf16.msra.mxu1 %v4475_v44 }
 0xd38   : > { %v4419_v53 = vpop.permute.xlu0 %4418 }
 0xd39   : > { %v4479_v32 = vsel %vm1030_vm14, %v4417_v34, %v4419_v53 }
 0xd3a   : > { %4574 = vmatmul.mubr.bf16.vlgmr.msra.gmra.mrb[36].mxu1 %v4275_v1  ;;  %4582 = vmatprep.subr.bf16.mxu1 %v4479_v32 }
 0xd3b   : > { %4583 = vmatpush1.bf16.msra.mxu1 %v4478_v9  ;;  %4614 = vmatprep.mubr.bf16.mxu1 %v8355_v39 }
 0xd3c   : > { %v4421_v46 = vpop.permute.xlu0 %4420 }
 0xd3d   : > { %v4480_v21 = vsel %vm1030_vm14, %v4419_v53, %v4421_v46 }
 0xd3e   : > { %5128 = vmatpush3.bf16.msra.mxu0 %v4480_v21 }
 0xd3f   : > { %5129 = vmatprep.subr.bf16.mxu0 %v8417_v5 }
 0xd40   : > { %v4427_v6 = vpop.permute.xlu0 %4426 }
 0xd41   : > { %v4482_v61 = vsel %vm1030_vm14, %v4425_v24, %v4427_v6 }
 0xd42   : > { %4584 = vmatprep.subr.bf16.mxu1 %v4482_v61 }
 0xd43   : > { %4585 = vmatpush1.bf16.msra.mxu1 %v4481_v11 }
 0xd44   : > { %v4429_v56 = vpop.permute.xlu0 %4428 }
 0xd45   : > { %v4483_v43 = vsel %vm1030_vm14, %v4427_v6, %v4429_v56 }
 0xd46   : > { %4962 = vmatmul.mubr.msk.bf16.vlgmr.msra.gmra.mrb[36].mxu1 %vm1742_vm15, %v4283_v35  ;;  %5130 = vmatpush3.bf16.msra.mxu0 %v4483_v43  ;;  %v4254_v41 = vpop.permute.xlu1 %4253 }
 0xd47   : > { %v4259_v60 = vrot.slane %v4254_v41, %v8419_v50 }
 0xd49   : > { %5132 = vmatmul.mubr.msk.bf16.vlgmr.msra.gmra.mrb[44].mxu0 %vm1742_vm15, %v4283_v35 }
 0xe08   : > { %v5080_v39 = vpop.f32.mrb[40].mxu0 }
 0xe09   : > { %v5081_v51 = vpop.f32.mrb[41].mxu0 }
 0xe0a   : > { %v5082_v0 = vadd.f32 %v5081_v51, %v5080_v39  ;;  %v5083_v26 = vpop.f32.mrb[42].mxu0 }
 0xe0b   : > { %v5084_v54 = vpop.f32.mrb[43].mxu0 }
 0xe0c   : > { %v4658_v28 = vadd.f32 %v5082_v0, %v4259_v60 }
 0xe19   : > { %v4616_v47 = vpop.f32.mrb[36].mxu1 }
 0xe1a   : > { %v5153_v16 = vadd.f32 %v4616_v47, %v4259_v60  ;;  %v4618_v33 = vpop.f32.mrb[37].mxu1 }
 0xe1b   : > { %v5154_v19 = vadd.f32 %v4618_v33, %v4259_v60  ;;  %v4620_v27 = vpop.f32.mrb[38].mxu1 }
 0xe1c   : > { %v4703_v14 = vmul.f32 %v5153_v16, %v5857_v48  ;;  %v4621_v30 = vpop.f32.mrb[39].mxu1  ;;  %v4697_v29 = vpop.f32.mrb[44].mxu0 }
 0xe1d   : > { %v4704_v62 = vmul.f32 %v5154_v19, %v5906_v22  ;;  %v4698_v40 = vadd.f32 %v4697_v29, %v4658_v28  ;;  %v5133_v8 = vpop.f32.mrb[45].mxu0 }
 0xe1e   : > { %v4700_v13 = vpop.f32.mrb[46].mxu0 }
 0xe1f   : > { %v4709_v49 = vcombine.low %v4703_v14, %v4704_v62  ;;  %v4705_v2 = vmul.f32 %v4698_v40, %v5865_v57  ;;  %v5134_v36 = vpop.f32.mrb[47].mxu0 }
 0xe21   : > { %v4716_v23 = vrot.slane %v4709_v49, %v8411_v55  ;;  %v4723_v18 = vrot.slane %v4705_v2, %v8411_v55 }
 0xe23   : > { %v4724_v12 = vcombine.low %v4716_v23, %v4723_v18 }
 0xe25   : > { %v4731_v48 = vrot.slane %v4724_v12, %v8411_v55 }
 0xe27   : > { %4733 = vst.msk [vmem:[%s760_s30] sm:$0x7] %vm6967_vm13, %v4731_v48 }
 0xe28 PF: > { %s8421_s24 = sld [smem:[#allocation8_spill]] }
 0xe2e   : > { %s35_s26 = sadd.s32 1, %s8421_s24  }
 0xe2f   : > { %p32_p1 = scmp.ge.s32.totalorder %s35_s26, 4  }
 0xe31   :  { %34 = sbr.rel (!%p32_p1) target bundleno = 15 (0xf), region = 167 }
 0xe38   :  { %4783 = vsyncpa [#allocation6], 1 }
 0xe39   :  { %4785 = vsyncpa [#allocation6 + $0x1], 1 }

</bundles_post_ra>
